<compile_context>
chip_gen: v6e
topology: v6e:2x2x1
jax: 0.10.0
libtpu: 0.0.40
codegen_flags: <defaults>
</compile_context>

<pallas_src>
import jax
import jax.numpy as jnp
from jax.experimental import pallas as pl
from jax.experimental.pallas import tpu as pltpu


def _silu(z):
    return z * jax.nn.sigmoid(z)


def _max_tree(vals):
    """Pairwise-tree maximum of a list of equally shaped arrays."""
    vals = list(vals)
    while len(vals) > 1:
        nxt = [jnp.maximum(vals[i], vals[i + 1]) for i in range(0, len(vals) - 1, 2)]
        if len(vals) % 2:
            nxt.append(vals[-1])
        vals = nxt
    return vals[0]


# ----------------------------------------------------------------------------
# Fused SPPELAN kernel: 1x1 conv+SiLU -> 3 chained 5x5 maxpools -> 1x1 conv+SiLU
# Layout inside the kernel is channels-first 2D: activations are (C, H*W).
# ----------------------------------------------------------------------------
def _sppelan_kernel(x_ref, w1_ref, b1_ref, w5_ref, b5_ref, o_ref, buf_ref):
    # x_ref  : (1, c1, H*W)      one batch element, NCHW flattened
    # w1_ref : (c3, c1)          cv1 weight (BN folded, torch (cout,cin) layout)
    # b1_ref : (c3, 1)           cv1 bias   (BN folded)
    # w5_ref : (c2, 4*c3)        cv5 weight (BN folded)
    # b5_ref : (c2, 1)           cv5 bias   (BN folded)
    # o_ref  : (1, c2, H*W)
    # buf_ref: VMEM scratch (c3, H+4, W+4), -inf halo for the 5x5/s1/p2 maxpool
    _, c1, HW = x_ref.shape
    c3, Hp, Wp = buf_ref.shape
    H, W = Hp - 4, Wp - 4
    c2 = o_ref.shape[1]

    # --- halo init: only the border strips, ONCE per grid step (interior is
    #     fully overwritten by every pool5 store below).
    ninf = -jnp.inf
    buf_ref[:, 0:2, :] = jnp.full((c3, 2, Wp), ninf, jnp.float32)
    buf_ref[:, H + 2:H + 4, :] = jnp.full((c3, 2, Wp), ninf, jnp.float32)
    buf_ref[:, :, 0:2] = jnp.full((c3, Hp, 2), ninf, jnp.float32)
    buf_ref[:, :, W + 2:W + 4] = jnp.full((c3, Hp, 2), ninf, jnp.float32)

    # --- cv1: 1x1 conv == (c3,c1)@(c1,HW) matmul on the MXU, f32 accumulation.
    x2d = x_ref[0]                                               # (c1, HW)
    y0 = _silu(jnp.dot(w1_ref[...], x2d,
                       preferred_element_type=jnp.float32) + b1_ref[...])  # (c3, HW)

    def pool5(y2d):
        # 5x5, stride 1, pad 2 maxpool (separable), entirely in VMEM.
        buf_ref[:, 2:2 + H, 2:2 + W] = y2d.reshape(c3, H, W)
        # vertical pass: tree-max over 5 row-shifted windows
        t = _max_tree([buf_ref[:, ky:ky + H, :] for ky in range(5)])   # (c3, H, W+4)
        # horizontal pass: tree-max over 5 column-shifted windows
        p = _max_tree([t[:, :, kx:kx + W] for kx in range(5)])         # (c3, H, W)
        return p.reshape(c3, HW)

    w5 = w5_ref[...]                                             # (c2, 4*c3)

    if 4 * c3 <= 128:
        # Small-channel config: one K=4*c3 matmul over a sublane concat is far
        # better MXU utilization than four K=c3 matmuls + a VPU add chain.
        y1 = pool5(y0)
        y2 = pool5(y1)
        y3 = pool5(y2)
        ycat = jnp.concatenate([y0, y1, y2, y3], axis=0)         # (4*c3, HW)
        acc = jnp.dot(w5, ycat, preferred_element_type=jnp.float32)
    else:
        # Real model sizes (c3 >= 128): interleave the cv5 branch matmuls with
        # the pool chain so MXU work overlaps the pooling and only ~2 branch
        # activations stay live at a time.
        acc = jnp.dot(w5[:, 0:c3], y0, preferred_element_type=jnp.float32)
        y1 = pool5(y0)
        acc = acc + jnp.dot(w5[:, c3:2 * c3], y1, preferred_element_type=jnp.float32)
        y2 = pool5(y1)
        acc = acc + jnp.dot(w5[:, 2 * c3:3 * c3], y2, preferred_element_type=jnp.float32)
        y3 = pool5(y2)
        acc = acc + jnp.dot(w5[:, 3 * c3:4 * c3], y3, preferred_element_type=jnp.float32)

    out = _silu(acc + b5_ref[...])                               # (c2, HW) f32
    o_ref[...] = out.reshape(1, c2, HW).astype(o_ref.dtype)


def sppelan_forward(x_nchw, params):
    """Public wrapper: PyTorch-style NCHW in/out; only FREE reshapes outside."""
    N, c1, H, W = x_nchw.shape
    HW = H * W
    c3 = params["w1t"].shape[0]
    c2 = params["w5t"].shape[0]

    x = x_nchw.reshape(N, c1, HW)                                # free (contiguous dims)

    # Per-shape VMEM budget (blocks are double-buffered by the pipeline).
    f32 = 4
    block_bytes = f32 * HW * (c1 + c2)                            # x block + out block
    const_bytes = f32 * (c3 * c1 + c3 + c2 * 4 * c3 + c2)         # weights/biases
    scratch_bytes = f32 * c3 * (H + 4) * (W + 4)
    live_bytes = f32 * HW * (4 * c3 + c2 + c3)                    # live intermediates (upper bound)
    est = 2 * block_bytes + 2 * const_bytes + scratch_bytes + live_bytes
    vmem_limit = min(48 * 1024 * 1024, max(2 * est, 16 * 1024 * 1024))

    out = pl.pallas_call(
        _sppelan_kernel,
        out_shape=jax.ShapeDtypeStruct((N, c2, HW), x_nchw.dtype),
        grid=(N,),
        in_specs=[
            pl.BlockSpec((1, c1, HW), lambda n: (n, 0, 0)),
            pl.BlockSpec((c3, c1), lambda n: (0, 0)),
            pl.BlockSpec((c3, 1), lambda n: (0, 0)),
            pl.BlockSpec((c2, 4 * c3), lambda n: (0, 0)),
            pl.BlockSpec((c2, 1), lambda n: (0, 0)),
        ],
        out_specs=pl.BlockSpec((1, c2, HW), lambda n: (n, 0, 0)),
        scratch_shapes=[pltpu.VMEM((c3, H + 4, W + 4), jnp.float32)],
        compiler_params=pltpu.CompilerParams(
            dimension_semantics=("parallel",),
            vmem_limit_bytes=vmem_limit,
        ),
    )(x, params["w1t"], params["b1"].reshape(c3, 1),
      params["w5t"], params["b5"].reshape(c2, 1))

    return out.reshape(N, c2, H, W)                              # free


# ----------------------------------------------------------------------------
# Parameter setup: Conv2d(bias=False) + BatchNorm2d folded into (weight, bias)
# Weights are kept in torch (cout, cin) layout -> exactly what the kernel wants.
# ----------------------------------------------------------------------------
def init_conv_bn_1x1(key, cin, cout):
    kw, kg, kb, km, kv = jax.random.split(key, 5)
    w = jax.random.normal(kw, (cout, cin, 1, 1), jnp.float32) * 0.1    # torch OIHW
    gamma = jax.random.uniform(kg, (cout,), jnp.float32, 0.5, 1.5)
    beta = jax.random.normal(kb, (cout,), jnp.float32) * 0.1
    mean = jax.random.normal(km, (cout,), jnp.float32) * 0.1
    var = jax.random.uniform(kv, (cout,), jnp.float32, 0.5, 1.5)
    eps = 1e-3                                                          # ultralytics BN eps
    scale = gamma / jnp.sqrt(var + eps)
    w_eff = w[:, :, 0, 0] * scale[:, None]                              # (cout, cin)
    b_eff = beta - mean * scale                                         # (cout,)
    return w_eff, b_eff


def init_sppelan_params(key, c1, c2, c3):
    k1, k5 = jax.random.split(key)
    w1t, b1 = init_conv_bn_1x1(k1, c1, c3)                              # (c3, c1)
    w5t, b5 = init_conv_bn_1x1(k5, 4 * c3, c2)                          # (c2, 4*c3)
    return {"w1t": w1t, "b1": b1, "w5t": w5t, "b5": b5}


# ----------------------------------------------------------------------------
# Pure-JAX reference
# ----------------------------------------------------------------------------
def sppelan_ref(x_nchw, params):
    x = jnp.transpose(x_nchw, (0, 2, 3, 1))                             # NHWC
    y0 = _silu(jnp.einsum("nhwc,dc->nhwd", x, params["w1t"]) + params["b1"])

    def pool(z):
        return jax.lax.reduce_window(z, -jnp.inf, jax.lax.max,
                                     (1, 5, 5, 1), (1, 1, 1, 1), "SAME")

    y1 = pool(y0)
    y2 = pool(y1)
    y3 = pool(y2)
    cat = jnp.concatenate([y0, y1, y2, y3], axis=-1)                    # (n,h,w,4c3)
    out = _silu(jnp.einsum("nhwc,dc->nhwd", cat, params["w5t"]) + params["b5"])
    return jnp.transpose(out, (0, 3, 1, 2))                             # NCHW


if __name__ == "__main__":
    key = jax.random.PRNGKey(0)
    kx, kp = jax.random.split(key)

    N, c1, c2, c3, H, W = 2, 16, 32, 16, 16, 16
    x = jax.random.normal(kx, (N, c1, H, W), jnp.float32)               # PyTorch NCHW input
    params = init_sppelan_params(kp, c1, c2, c3)

    out = jax.block_until_ready(sppelan_forward(x, params))
    ref = jax.block_until_ready(sppelan_ref(x, params))

    assert out.shape == (N, c2, H, W), out.shape
    err = float(jnp.max(jnp.abs(out - ref)))
    assert jnp.allclose(out, ref, atol=5e-3, rtol=5e-3), err
    print("KERNEL_OK")
</pallas_src>

<mosaic_0001>
module attributes {stable_mosaic.version = 11 : i64} {
  func.func @_sppelan_kernel(%arg0: i32, %arg1: memref<1x16x256xf32, #tpu.memory_space<vmem>>, %arg2: memref<16x16xf32, #tpu.memory_space<vmem>>, %arg3: memref<16x1xf32, #tpu.memory_space<vmem>>, %arg4: memref<32x64xf32, #tpu.memory_space<vmem>>, %arg5: memref<32x1xf32, #tpu.memory_space<vmem>>, %arg6: memref<1x32x256xf32, #tpu.memory_space<vmem>>, %arg7: memref<16x20x20xf32, #tpu.memory_space<vmem>>) attributes {dimension_semantics = [#tpu.dimension_semantics<parallel>], iteration_bounds = array<i64: 2>, scalar_prefetch = 0 : i64, scratch_operands = 1 : i64, tpu.core_type = #tpu.core_type<tc>, window_params = [{transform_indices = @transform_0, window_bounds = array<i64: 1, 16, 256>}, {pipeline_mode = #tpu.pipeline_mode<synchronous>, transform_indices = @transform_1, window_bounds = array<i64: 16, 16>}, {pipeline_mode = #tpu.pipeline_mode<synchronous>, transform_indices = @transform_2, window_bounds = array<i64: 16, 1>}, {pipeline_mode = #tpu.pipeline_mode<synchronous>, transform_indices = @transform_3, window_bounds = array<i64: 32, 64>}, {pipeline_mode = #tpu.pipeline_mode<synchronous>, transform_indices = @transform_4, window_bounds = array<i64: 32, 1>}, {transform_indices = @transform_5, window_bounds = array<i64: 1, 32, 256>}]} {
    %cst = arith.constant 0xFF800000 : f32
    %0 = vector.broadcast %cst : f32 to vector<16x2x20xf32>
    %c0 = arith.constant 0 : index
    %c0_0 = arith.constant 0 : index
    %c0_1 = arith.constant 0 : index
    %1 = vector.load %arg7[%c0, %c0_0, %c0_1] : memref<16x20x20xf32, #tpu.memory_space<vmem>>, vector<16x2x20xf32>
    tpu.vector_store %arg7[%c0, %c0_0, %c0_1], %0 {strides = array<i32>} : memref<16x20x20xf32, #tpu.memory_space<vmem>>, vector<16x2x20xf32>,
    %cst_2 = arith.constant 0xFF800000 : f32
    %2 = vector.broadcast %cst_2 : f32 to vector<16x2x20xf32>
    %c0_3 = arith.constant 0 : index
    %c18 = arith.constant 18 : index
    %c0_4 = arith.constant 0 : index
    %3 = vector.load %arg7[%c0_3, %c18, %c0_4] : memref<16x20x20xf32, #tpu.memory_space<vmem>>, vector<16x2x20xf32>
    tpu.vector_store %arg7[%c0_3, %c18, %c0_4], %2 {strides = array<i32>} : memref<16x20x20xf32, #tpu.memory_space<vmem>>, vector<16x2x20xf32>,
    %cst_5 = arith.constant 0xFF800000 : f32
    %4 = vector.broadcast %cst_5 : f32 to vector<16x20x2xf32>
    %c0_6 = arith.constant 0 : index
    %c0_7 = arith.constant 0 : index
    %c0_8 = arith.constant 0 : index
    %5 = vector.load %arg7[%c0_6, %c0_7, %c0_8] : memref<16x20x20xf32, #tpu.memory_space<vmem>>, vector<16x20x2xf32>
    tpu.vector_store %arg7[%c0_6, %c0_7, %c0_8], %4 {strides = array<i32>} : memref<16x20x20xf32, #tpu.memory_space<vmem>>, vector<16x20x2xf32>,
    %cst_9 = arith.constant 0xFF800000 : f32
    %6 = vector.broadcast %cst_9 : f32 to vector<16x20x2xf32>
    %c0_10 = arith.constant 0 : index
    %c0_11 = arith.constant 0 : index
    %c18_12 = arith.constant 18 : index
    %7 = vector.load %arg7[%c0_10, %c0_11, %c18_12] : memref<16x20x20xf32, #tpu.memory_space<vmem>>, vector<16x20x2xf32>
    tpu.vector_store %arg7[%c0_10, %c0_11, %c18_12], %6 {strides = array<i32>} : memref<16x20x20xf32, #tpu.memory_space<vmem>>, vector<16x20x2xf32>,
    %c0_13 = arith.constant 0 : index
    %c0_14 = arith.constant 0 : index
    %c0_15 = arith.constant 0 : index
    %8 = vector.load %arg1[%c0_13, %c0_14, %c0_15] : memref<1x16x256xf32, #tpu.memory_space<vmem>>, vector<1x16x256xf32>
    %9 = vector.shape_cast %8 : vector<1x16x256xf32> to vector<16x256xf32>
    %c0_16 = arith.constant 0 : index
    %c0_17 = arith.constant 0 : index
    %10 = vector.load %arg2[%c0_16, %c0_17] : memref<16x16xf32, #tpu.memory_space<vmem>>, vector<16x16xf32>
    %cst_18 = arith.constant dense<0.000000e+00> : vector<16x256xf32>
    %11 = tpu.matmul %10, %9, %cst_18 {dimension_numbers = #tpu.dot_dimension_numbers<[1], [0], [0], [1], [0, 0, 1, 1], [], []>} : vector<16x16xf32>, vector<16x256xf32>, vector<16x256xf32> -> vector<16x256xf32>
    %c0_19 = arith.constant 0 : index
    %c0_20 = arith.constant 0 : index
    %12 = vector.load %arg3[%c0_19, %c0_20] : memref<16x1xf32, #tpu.memory_space<vmem>>, vector<16x1xf32>
    %13 = vector.broadcast %12 : vector<16x1xf32> to vector<16x256xf32>
    %14 = arith.addf %11, %13 : vector<16x256xf32>
    %15 = arith.negf %14 : vector<16x256xf32>
    %16 = math.exp %15 : vector<16x256xf32>
    %cst_21 = arith.constant 1.000000e+00 : f32
    %17 = vector.broadcast %cst_21 : f32 to vector<16x256xf32>
    %18 = arith.addf %17, %16 : vector<16x256xf32>
    %19 = arith.divf %17, %18 : vector<16x256xf32>
    %20 = arith.mulf %14, %19 : vector<16x256xf32>
    %c0_22 = arith.constant 0 : index
    %c0_23 = arith.constant 0 : index
    %21 = vector.load %arg4[%c0_22, %c0_23] : memref<32x64xf32, #tpu.memory_space<vmem>>, vector<32x64xf32>
    %22 = vector.shape_cast %20 : vector<16x256xf32> to vector<16x16x16xf32>
    %c0_24 = arith.constant 0 : index
    %c2 = arith.constant 2 : index
    %c2_25 = arith.constant 2 : index
    %23 = vector.load %arg7[%c0_24, %c2, %c2_25] : memref<16x20x20xf32, #tpu.memory_space<vmem>>, vector<16x16x16xf32>
    tpu.vector_store %arg7[%c0_24, %c2, %c2_25], %22 {strides = array<i32>} : memref<16x20x20xf32, #tpu.memory_space<vmem>>, vector<16x16x16xf32>,
    %c0_26 = arith.constant 0 : index
    %c0_27 = arith.constant 0 : index
    %c0_28 = arith.constant 0 : index
    %24 = vector.load %arg7[%c0_26, %c0_27, %c0_28] : memref<16x20x20xf32, #tpu.memory_space<vmem>>, vector<16x16x20xf32>
    %c0_29 = arith.constant 0 : index
    %c1 = arith.constant 1 : index
    %c0_30 = arith.constant 0 : index
    %25 = vector.load %arg7[%c0_29, %c1, %c0_30] : memref<16x20x20xf32, #tpu.memory_space<vmem>>, vector<16x16x20xf32>
    %c0_31 = arith.constant 0 : index
    %c2_32 = arith.constant 2 : index
    %c0_33 = arith.constant 0 : index
    %26 = vector.load %arg7[%c0_31, %c2_32, %c0_33] : memref<16x20x20xf32, #tpu.memory_space<vmem>>, vector<16x16x20xf32>
    %c0_34 = arith.constant 0 : index
    %c3 = arith.constant 3 : index
    %c0_35 = arith.constant 0 : index
    %27 = vector.load %arg7[%c0_34, %c3, %c0_35] : memref<16x20x20xf32, #tpu.memory_space<vmem>>, vector<16x16x20xf32>
    %c0_36 = arith.constant 0 : index
    %c4 = arith.constant 4 : index
    %c0_37 = arith.constant 0 : index
    %28 = vector.load %arg7[%c0_36, %c4, %c0_37] : memref<16x20x20xf32, #tpu.memory_space<vmem>>, vector<16x16x20xf32>
    %29 = arith.maximumf %24, %25 : vector<16x16x20xf32>
    %30 = arith.maximumf %26, %27 : vector<16x16x20xf32>
    %31 = arith.maximumf %29, %30 : vector<16x16x20xf32>
    %32 = arith.maximumf %31, %28 : vector<16x16x20xf32>
    %33 = vector.extract_strided_slice %32 {offsets = [0, 0, 0], sizes = [16, 16, 16], strides = [1, 1, 1]} : vector<16x16x20xf32> to vector<16x16x16xf32>
    %34 = vector.extract_strided_slice %32 {offsets = [0, 0, 1], sizes = [16, 16, 16], strides = [1, 1, 1]} : vector<16x16x20xf32> to vector<16x16x16xf32>
    %35 = vector.extract_strided_slice %32 {offsets = [0, 0, 2], sizes = [16, 16, 16], strides = [1, 1, 1]} : vector<16x16x20xf32> to vector<16x16x16xf32>
    %36 = vector.extract_strided_slice %32 {offsets = [0, 0, 3], sizes = [16, 16, 16], strides = [1, 1, 1]} : vector<16x16x20xf32> to vector<16x16x16xf32>
    %37 = vector.extract_strided_slice %32 {offsets = [0, 0, 4], sizes = [16, 16, 16], strides = [1, 1, 1]} : vector<16x16x20xf32> to vector<16x16x16xf32>
    %38 = arith.maximumf %33, %34 : vector<16x16x16xf32>
    %39 = arith.maximumf %35, %36 : vector<16x16x16xf32>
    %40 = arith.maximumf %38, %39 : vector<16x16x16xf32>
    %41 = arith.maximumf %40, %37 : vector<16x16x16xf32>
    %42 = vector.shape_cast %41 : vector<16x16x16xf32> to vector<16x256xf32>
    %43 = vector.shape_cast %42 : vector<16x256xf32> to vector<16x16x16xf32>
    %c0_38 = arith.constant 0 : index
    %c2_39 = arith.constant 2 : index
    %c2_40 = arith.constant 2 : index
    %44 = vector.load %arg7[%c0_38, %c2_39, %c2_40] : memref<16x20x20xf32, #tpu.memory_space<vmem>>, vector<16x16x16xf32>
    tpu.vector_store %arg7[%c0_38, %c2_39, %c2_40], %43 {strides = array<i32>} : memref<16x20x20xf32, #tpu.memory_space<vmem>>, vector<16x16x16xf32>,
    %c0_41 = arith.constant 0 : index
    %c0_42 = arith.constant 0 : index
    %c0_43 = arith.constant 0 : index
    %45 = vector.load %arg7[%c0_41, %c0_42, %c0_43] : memref<16x20x20xf32, #tpu.memory_space<vmem>>, vector<16x16x20xf32>
    %c0_44 = arith.constant 0 : index
    %c1_45 = arith.constant 1 : index
    %c0_46 = arith.constant 0 : index
    %46 = vector.load %arg7[%c0_44, %c1_45, %c0_46] : memref<16x20x20xf32, #tpu.memory_space<vmem>>, vector<16x16x20xf32>
    %c0_47 = arith.constant 0 : index
    %c2_48 = arith.constant 2 : index
    %c0_49 = arith.constant 0 : index
    %47 = vector.load %arg7[%c0_47, %c2_48, %c0_49] : memref<16x20x20xf32, #tpu.memory_space<vmem>>, vector<16x16x20xf32>
    %c0_50 = arith.constant 0 : index
    %c3_51 = arith.constant 3 : index
    %c0_52 = arith.constant 0 : index
    %48 = vector.load %arg7[%c0_50, %c3_51, %c0_52] : memref<16x20x20xf32, #tpu.memory_space<vmem>>, vector<16x16x20xf32>
    %c0_53 = arith.constant 0 : index
    %c4_54 = arith.constant 4 : index
    %c0_55 = arith.constant 0 : index
    %49 = vector.load %arg7[%c0_53, %c4_54, %c0_55] : memref<16x20x20xf32, #tpu.memory_space<vmem>>, vector<16x16x20xf32>
    %50 = arith.maximumf %45, %46 : vector<16x16x20xf32>
    %51 = arith.maximumf %47, %48 : vector<16x16x20xf32>
    %52 = arith.maximumf %50, %51 : vector<16x16x20xf32>
    %53 = arith.maximumf %52, %49 : vector<16x16x20xf32>
    %54 = vector.extract_strided_slice %53 {offsets = [0, 0, 0], sizes = [16, 16, 16], strides = [1, 1, 1]} : vector<16x16x20xf32> to vector<16x16x16xf32>
    %55 = vector.extract_strided_slice %53 {offsets = [0, 0, 1], sizes = [16, 16, 16], strides = [1, 1, 1]} : vector<16x16x20xf32> to vector<16x16x16xf32>
    %56 = vector.extract_strided_slice %53 {offsets = [0, 0, 2], sizes = [16, 16, 16], strides = [1, 1, 1]} : vector<16x16x20xf32> to vector<16x16x16xf32>
    %57 = vector.extract_strided_slice %53 {offsets = [0, 0, 3], sizes = [16, 16, 16], strides = [1, 1, 1]} : vector<16x16x20xf32> to vector<16x16x16xf32>
    %58 = vector.extract_strided_slice %53 {offsets = [0, 0, 4], sizes = [16, 16, 16], strides = [1, 1, 1]} : vector<16x16x20xf32> to vector<16x16x16xf32>
    %59 = arith.maximumf %54, %55 : vector<16x16x16xf32>
    %60 = arith.maximumf %56, %57 : vector<16x16x16xf32>
    %61 = arith.maximumf %59, %60 : vector<16x16x16xf32>
    %62 = arith.maximumf %61, %58 : vector<16x16x16xf32>
    %63 = vector.shape_cast %62 : vector<16x16x16xf32> to vector<16x256xf32>
    %64 = vector.shape_cast %63 : vector<16x256xf32> to vector<16x16x16xf32>
    %c0_56 = arith.constant 0 : index
    %c2_57 = arith.constant 2 : index
    %c2_58 = arith.constant 2 : index
    %65 = vector.load %arg7[%c0_56, %c2_57, %c2_58] : memref<16x20x20xf32, #tpu.memory_space<vmem>>, vector<16x16x16xf32>
    tpu.vector_store %arg7[%c0_56, %c2_57, %c2_58], %64 {strides = array<i32>} : memref<16x20x20xf32, #tpu.memory_space<vmem>>, vector<16x16x16xf32>,
    %c0_59 = arith.constant 0 : index
    %c0_60 = arith.constant 0 : index
    %c0_61 = arith.constant 0 : index
    %66 = vector.load %arg7[%c0_59, %c0_60, %c0_61] : memref<16x20x20xf32, #tpu.memory_space<vmem>>, vector<16x16x20xf32>
    %c0_62 = arith.constant 0 : index
    %c1_63 = arith.constant 1 : index
    %c0_64 = arith.constant 0 : index
    %67 = vector.load %arg7[%c0_62, %c1_63, %c0_64] : memref<16x20x20xf32, #tpu.memory_space<vmem>>, vector<16x16x20xf32>
    %c0_65 = arith.constant 0 : index
    %c2_66 = arith.constant 2 : index
    %c0_67 = arith.constant 0 : index
    %68 = vector.load %arg7[%c0_65, %c2_66, %c0_67] : memref<16x20x20xf32, #tpu.memory_space<vmem>>, vector<16x16x20xf32>
    %c0_68 = arith.constant 0 : index
    %c3_69 = arith.constant 3 : index
    %c0_70 = arith.constant 0 : index
    %69 = vector.load %arg7[%c0_68, %c3_69, %c0_70] : memref<16x20x20xf32, #tpu.memory_space<vmem>>, vector<16x16x20xf32>
    %c0_71 = arith.constant 0 : index
    %c4_72 = arith.constant 4 : index
    %c0_73 = arith.constant 0 : index
    %70 = vector.load %arg7[%c0_71, %c4_72, %c0_73] : memref<16x20x20xf32, #tpu.memory_space<vmem>>, vector<16x16x20xf32>
    %71 = arith.maximumf %66, %67 : vector<16x16x20xf32>
    %72 = arith.maximumf %68, %69 : vector<16x16x20xf32>
    %73 = arith.maximumf %71, %72 : vector<16x16x20xf32>
    %74 = arith.maximumf %73, %70 : vector<16x16x20xf32>
    %75 = vector.extract_strided_slice %74 {offsets = [0, 0, 0], sizes = [16, 16, 16], strides = [1, 1, 1]} : vector<16x16x20xf32> to vector<16x16x16xf32>
    %76 = vector.extract_strided_slice %74 {offsets = [0, 0, 1], sizes = [16, 16, 16], strides = [1, 1, 1]} : vector<16x16x20xf32> to vector<16x16x16xf32>
    %77 = vector.extract_strided_slice %74 {offsets = [0, 0, 2], sizes = [16, 16, 16], strides = [1, 1, 1]} : vector<16x16x20xf32> to vector<16x16x16xf32>
    %78 = vector.extract_strided_slice %74 {offsets = [0, 0, 3], sizes = [16, 16, 16], strides = [1, 1, 1]} : vector<16x16x20xf32> to vector<16x16x16xf32>
    %79 = vector.extract_strided_slice %74 {offsets = [0, 0, 4], sizes = [16, 16, 16], strides = [1, 1, 1]} : vector<16x16x20xf32> to vector<16x16x16xf32>
    %80 = arith.maximumf %75, %76 : vector<16x16x16xf32>
    %81 = arith.maximumf %77, %78 : vector<16x16x16xf32>
    %82 = arith.maximumf %80, %81 : vector<16x16x16xf32>
    %83 = arith.maximumf %82, %79 : vector<16x16x16xf32>
    %84 = vector.shape_cast %83 : vector<16x16x16xf32> to vector<16x256xf32>
    %85 = tpu.concatenate %20, %42, %63, %84 in 0 : vector<16x256xf32>, vector<16x256xf32>, vector<16x256xf32>, vector<16x256xf32> -> vector<64x256xf32>
    %cst_74 = arith.constant dense<0.000000e+00> : vector<32x256xf32>
    %86 = tpu.matmul %21, %85, %cst_74 {dimension_numbers = #tpu.dot_dimension_numbers<[1], [0], [0], [1], [0, 0, 1, 1], [], []>} : vector<32x64xf32>, vector<64x256xf32>, vector<32x256xf32> -> vector<32x256xf32>
    %c0_75 = arith.constant 0 : index
    %c0_76 = arith.constant 0 : index
    %87 = vector.load %arg5[%c0_75, %c0_76] : memref<32x1xf32, #tpu.memory_space<vmem>>, vector<32x1xf32>
    %88 = vector.broadcast %87 : vector<32x1xf32> to vector<32x256xf32>
    %89 = arith.addf %86, %88 : vector<32x256xf32>
    %90 = arith.negf %89 : vector<32x256xf32>
    %91 = math.exp %90 : vector<32x256xf32>
    %cst_77 = arith.constant 1.000000e+00 : f32
    %92 = vector.broadcast %cst_77 : f32 to vector<32x256xf32>
    %93 = arith.addf %92, %91 : vector<32x256xf32>
    %94 = arith.divf %92, %93 : vector<32x256xf32>
    %95 = arith.mulf %89, %94 : vector<32x256xf32>
    %96 = vector.shape_cast %95 : vector<32x256xf32> to vector<1x32x256xf32>
    %c0_78 = arith.constant 0 : index
    %c0_79 = arith.constant 0 : index
    %c0_80 = arith.constant 0 : index
    %97 = vector.load %arg6[%c0_78, %c0_79, %c0_80] : memref<1x32x256xf32, #tpu.memory_space<vmem>>, vector<1x32x256xf32>
    tpu.vector_store %arg6[%c0_78, %c0_79, %c0_80], %96 {strides = array<i32>} : memref<1x32x256xf32, #tpu.memory_space<vmem>>, vector<1x32x256xf32>,
    return
  }
  func.func @transform_0(%arg0: i32) -> (i32, i32, i32) {
    %c0_i32 = arith.constant 0 : i32
    %c0_i32_0 = arith.constant 0 : i32
    %c0_i32_1 = arith.constant 0 : i32
    return %arg0, %c0_i32, %c0_i32_0 : i32, i32, i32
  }
  func.func @transform_1(%arg0: i32) -> (i32, i32) {
    %c0_i32 = arith.constant 0 : i32
    %c0_i32_0 = arith.constant 0 : i32
    %c0_i32_1 = arith.constant 0 : i32
    return %c0_i32, %c0_i32_0 : i32, i32
  }
  func.func @transform_2(%arg0: i32) -> (i32, i32) {
    %c0_i32 = arith.constant 0 : i32
    %c0_i32_0 = arith.constant 0 : i32
    %c0_i32_1 = arith.constant 0 : i32
    return %c0_i32, %c0_i32_0 : i32, i32
  }
  func.func @transform_3(%arg0: i32) -> (i32, i32) {
    %c0_i32 = arith.constant 0 : i32
    %c0_i32_0 = arith.constant 0 : i32
    %c0_i32_1 = arith.constant 0 : i32
    return %c0_i32, %c0_i32_0 : i32, i32
  }
  func.func @transform_4(%arg0: i32) -> (i32, i32) {
    %c0_i32 = arith.constant 0 : i32
    %c0_i32_0 = arith.constant 0 : i32
    %c0_i32_1 = arith.constant 0 : i32
    return %c0_i32, %c0_i32_0 : i32, i32
  }
  func.func @transform_5(%arg0: i32) -> (i32, i32, i32) {
    %c0_i32 = arith.constant 0 : i32
    %c0_i32_0 = arith.constant 0 : i32
    %c0_i32_1 = arith.constant 0 : i32
    return %arg0, %c0_i32, %c0_i32_0 : i32, i32, i32
  }
}

</mosaic_0001>

<bundles_post_ra>
// kernel: tpu_custom_call.1
= control target key start
LH: loop header
LB: loop body
LE: loop exit
PB: predicated region body
PF: predicated region fallthrough
CT: control target
= control target key end

     0   :  { %10 = vsyncpa [#allocation4], 0  ;;  %s10005_s0 = inlined_call_operand.hbm [shape: f32[2,16,256], index: 0, kind: input, shape index: {}]   ;;  %s10006_s1 = inlined_call_operand.vmem [shape: f32[16,16], index: 1, kind: input, shape index: {}]   ;;  %s10007_s2 = inlined_call_operand.vmem [shape: f32[16,1], index: 2, kind: input, shape index: {}]   ;;  %s10008_s3 = inlined_call_operand.vmem [shape: f32[32,64], index: 3, kind: input, shape index: {}]   ;;  %s10009_s4 = inlined_call_operand.vmem [shape: f32[32,1], index: 4, kind: input, shape index: {}]   ;;  %s10010_s5 = inlined_call_operand.hbm [shape: f32[2,32,256], index: 5, kind: output, shape index: {}]  }
   0x1   :  { %12 = vsyncpa [#allocation4 + $0x1], 0 }
   0x2   :  { %13 = vsyncpa [#allocation5], 0 }
   0x3   :  { %15 = vsyncpa [#allocation5 + $0x1], 0  ;;  %s6475_s18 = smov 0   ;;  %s6477_s19 = smov 0  }
   0x4   :  { %s6479_s20 = smov 0   ;;  %s6481_s21 = smov 0  }
   0x5 LB: > { %s6496_s22 = sadd.s32 4294967295, %s6422_s21   ;;  %s6165_s23 = sadd.s32 4294967294, %s6422_s21   ;;  %s6422_s21 = sphi %s6481_s21, %s10365_s21   ;;  %s6418_s20 = sphi %s6479_s20, %s10364_s20   ;;  %s6414_s19 = sphi %s6477_s19, %s10363_s19   ;;  %s6410_s18 = sphi %s6475_s18, %s10362_s18  }
   0x6   : > { %s6500_s24 = sadd.s32 1, %s6422_s21   ;;  %s28_s25 = sadd.s32 1, %s6418_s20 }
   0x7   : > { %s25_s26 = ssub.s32 %s6422_s21, %s6500_s24  ;;  %p35_p0 = scmp.ne.s32.totalorder %s6418_s20, %s6414_s19 }
   0x8   : > { %p26_p1 = scmp.eq.s32.totalorder %s25_s26, 0  ;;  %p36_p2 = scmp.eq.s32.totalorder %s6422_s21, 0 }
   0x9   : > { %p41_p3 = scmp.ne.s32.totalorder %s6414_s19, %s6410_s18  ;;  %p42_p4 = scmp.eq.s32.totalorder %s6496_s22, 0 }
   0xa   : > { %s6512_s27 = scalar_select %p26_p1, %s6418_s20, %s28_s25  }
   0xb   : > { %p6514_p5 = por %p36_p2, %p35_p0  ;;  %p6518_p6 = por %p42_p4, %p41_p3 }
   0xc   : > { %p149_p7 = scmp.eq.s32.totalorder %s6496_s22, 1  ;;  %p155_p8 = scmp.eq.s32.totalorder %s6165_s23, 1 }
   0xd   : > { %s10088_s29 = scalar_select %p6518_p6, 1, 0 }
   0xe   : > { %p6227_p10 = scmp.lt.s32.totalorder %s6422_s21, 2  ;;  %p6525_p11 = por %p149_p7, %p35_p0 }
   0xf   : > { %p6529_p12 = por %p155_p8, %p41_p3  ;;  %s187_s7 = sand.u32 1, %s6418_s20  }
  0x10   : > { %s10089_s30 = scalar_select %p6525_p11, 1, 0 }
  0x11   : > { %s10090_s6 = scalar_select %p6529_p12, 1, 0 }
  0x12   : > { %s6197_s8 = sshll.u32 %s6422_s21, 9  ;;  %s6168_s9 = sshll.u32 %s187_s7, 5 }
  0x13   : > { %s6538_s12 = scalar_lea.hbm %s10005_s0, %s6197_s8  ;;  %s191_s13 = scalar_lea.vmem [#allocation3], %s6168_s9 }
  0x14   : > { %s198_s14 = sshll.u32 %s191_s13, 4  ;;  %p6542_p13 = pnand %p6227_p10, %p6514_p5  ;;  %s6546_s14 = int_to_ptr.vmem [resolvable:$true] %s198_s14 }
  0x15   : > { %s6548_s16 = scalar_lea.sflag [#allocation4], %s187_s7  ;;  %s6330_s17 = scalar_lea.hbm %s6538_s12, 512 }
  0x16   : > { %p6331_p0 = scmp.ne.s32.totalorder %s6538_s12, %s6330_s17  ;;  %p6332_p1 = pneg %p6542_p13 }
  0x17   : > { %s6335_s26 = scalar_lea.hbm %s10005_s0, 1024  ;;  %p6336_p4 = scmp.lt.s32.totalorder %s6538_s12, %s10005_s0 }
  0x18   : > { %p6333_p2 = pnand %p6332_p1, %p6331_p0  ;;  %p6337_p5 = scmp.lt.s32.totalorder %s6335_s26, %s6330_s17 }
  0x1a   : > { %p6334_p3 = pneg %p6333_p2  ;;  %p6338_p7 = por %p6337_p5, %p6336_p4 }
  0x1c   : > { %p6339_p8 = pnand %p6338_p7, %p6334_p3 }
  0x1e   : > { %6342 = shalt.err (!%p6339_p8)
}
  0x1f   : > { %s6343_s7 = scalar_lea.vmem %s6546_s14, 512  ;;  %s6424_s9 = smov [#allocation3]  }
  0x20   : > { %p6344_p10 = scmp.ne.s32.totalorder %s6546_s14, %s6343_s7  ;;  %s6348_s10 = sshll.u32 %s6424_s9, 4  ;;  %s6349_s10 = int_to_ptr.vmem [resolvable:$false] %s6348_s10 }
  0x21   : > { %s6350_s11 = scalar_lea.vmem %s6349_s10, 1024  ;;  %p6351_p2 = scmp.lt.s32.totalorder %s6546_s14, %s6349_s10 }
  0x22   : > { %p6346_p9 = pnand %p6344_p10, %p6332_p1  ;;  %p6352_p12 = scmp.lt.s32.totalorder %s6350_s11, %s6343_s7 }
  0x24   : > { %p6347_p0 = pneg %p6346_p9  ;;  %p6353_p11 = por %p6352_p12, %p6351_p2 }
  0x26   : > { %p6354_p6 = pnand %p6353_p11, %p6347_p0 }
  0x28   : > { %6357 = shalt.err (!%p6354_p6)
}
  0x29   : > { %s6425_s13 = smov 256   ;;  %s6426_s17 = smov 16  }
  0x2a   : > { %6222 = dma.hbm_to_vmem [thread:$0]  (!%p6542_p13), %s6538_s12, 512, %s6546_s14, %s6548_s16, %s6425_s13, %s6425_s13, %s6426_s17  }
  0x2b   : > { %p6171_p9 = scmp.ge.s32.totalorder %s6422_s21, 1  ;;  %p206_p1 = scmp.lt.s32.totalorder %s6422_s21, 3 }
  0x2d   : > { %p207_p3 = pnand %p6171_p9, %p206_p1 }
  0x2f   : > { %210 = sbr.rel (%p207_p3) target bundleno = 2112 (0x840), region = 40 }
  0x34   : > { %s6572_s23 = sand.u32 1, %s6414_s19   ;;  %p10092_p6 = scmp.ne.s32.totalorder %s10088_s29, 0 }
  0x35   : > { %s6172_s25 = sshll.u32 %s6572_s23, 5  ;;  %s213_s26 = scalar_lea.sflag [#allocation4], %s6572_s23 }
  0x36   : > { %s216_s28 = scalar_lea.vmem [#allocation3], %s6172_s25 }
  0x37   : > { %6401 = dma.done.wait (%p10092_p6), %s213_s26, 512  }
  0x38   : > { %6403 = vsyncadd (%p10092_p6), %s213_s26, 4294966784  ;;  %v10013_v0 = vmov 0.0   ;;  %v6428_v1 = vmov 0   ;;  %v379_v2 = vld [vmem:[%s216_s28 + $0x18] sm:$0xff]  ;;  %v378_v3 = vld [vmem:[%s216_s28 + $0x10] sm:$0xff]  ;;  %vm394_vm0 = vcmask 130048   ;;  %v603_v49 = vlaneseq }
  0x39   : > { %465 = vmatprep.mubr.f32.mxu0 %v10013_v0  ;;  %6280 = vset.pattern.permute.xlu0 %v6428_v1  ;;  %v377_v4 = vld [vmem:[%s216_s28 + $0x8] sm:$0xff]  ;;  %v376_v5 = vld [vmem:[%s216_s28] sm:$0xff]  ;;  %s6429_s10 = smov 96   ;;  %s6430_s11 = smov 112   ;;  %vm243_vm1 = vcmask 156672   ;;  %vm276_vm2 = vcmask 15360  }
  0x3a   : > { %5995 = vmatprep.mubr.f32.mxu1 %v10013_v0  ;;  %6281 = vset.pattern.permute.xlu1 %v6428_v1  ;;  %v380_v6 = vld [vmem:[%s10006_s1] sm:$0xff]  ;;  %v383_v7 = vld [vmem:[%s10007_s2 + $0x8] sm:$0xff]  ;;  %s6431_s13 = smov 80   ;;  %s6432_s17 = smov 64   ;;  %vm326_vm3 = vcmask 162960   ;;  %v6436_v40 = vmov -inf  }
  0x3b   : > { %429 = vmatprep.subr.mxu0 %v379_v2  ;;  %391 = vperm.xlu0 %6280, %v383_v7   ;;  %v382_v8 = vld [vmem:[%s10007_s2] sm:$0xff]  ;;  %v381_v9 = vld [vmem:[%s10006_s1 + $0x8] sm:$0xff]  ;;  %s6433_s25 = smov 48   ;;  %s6434_s26 = smov 32   ;;  %244 = vst.msk [vmem:[#allocation2] sm:$0x3] %vm243_vm1, %v6436_v40 }
  0x3c   : > { %430 = vmatpush1.msra.mxu0 %v378_v3  ;;  %s6435_s28 = smov 16   ;;  %278 = vst.msk [vmem:[#allocation2 + $0x8] sm:$0xff] %vm276_vm2, %v6436_v40  ;;  %282 = vst.msk [vmem:[#allocation2 + $0x20] sm:$0xff] %vm276_vm2, %v6436_v40  ;;  %v6437_v47 = vmov 1983009808   ;;  %v604_v53 = vshrl.u32 %v603_v49, 7 }
  0x3d   : > { %431 = vmatprep.subr.mxu0 %v377_v4  ;;  %245 = vst.msk [vmem:[#allocation2 + $0x18] sm:$0x3] %vm243_vm1, %v6436_v40  ;;  %246 = vst.msk [vmem:[#allocation2 + $0x30] sm:$0x3] %vm243_vm1, %v6436_v40  ;;  %v601_v48 = vunpack.c.l.s4 %v6437_v47  ;;  %v6438_v55 = vmov 1934713408  }
  0x3e   : > { %432 = vmatpush1.msra.mxu0 %v376_v5  ;;  %247 = vst.msk [vmem:[#allocation2 + $0x48] sm:$0x3] %vm243_vm1, %v6436_v40  ;;  %248 = vst.msk [vmem:[#allocation2 + $0x60] sm:$0x3] %vm243_vm1, %v6436_v40  ;;  %v665_v56 = vunpack.c.l.s4 %v6438_v55  ;;  %s6439_s12 = smov 2   ;;  %vm279_vm4 = vcmask 11264  }
  0x3f   : > { %6174 = vmatmul.mubr.msk.f32.vlgmr.msra.gmra.mxu0 %vm394_vm0, %v380_v6  ;;  %386 = vperm.xlu0 %6280, %v382_v8   ;;  %249 = vst.msk [vmem:[#allocation2 + $0x78] sm:$0x3] %vm243_vm1, %v6436_v40  ;;  %250 = vst.msk [vmem:[#allocation2 + $0x90] sm:$0x3] %vm243_vm1, %v6436_v40  ;;  %v602_v52 = vunpack.c.0.s8 %v601_v48  ;;  %vm329_vm5 = vcmask 158864   ;;  %vm1270_vm6 = vcmask 146448  }
  0x40   : > { %471 = vmatprep.mubr.f32.mxu0 %v10013_v0  ;;  %251 = vst.msk [vmem:[#allocation2 + $0xa8] sm:$0x3] %vm243_vm1, %v6436_v40  ;;  %252 = vst.msk [vmem:[#allocation2 + $0xc0] sm:$0x3] %vm243_vm1, %v6436_v40  ;;  %v666_v63 = vunpack.c.0.s8 %v665_v56  ;;  %s6440_s14 = smov 127   ;;  %s6441_s29 = smov 124  }
  0x41   : > { %253 = vst.msk [vmem:[#allocation2 + $0xd8] sm:$0x3] %vm243_vm1, %v6436_v40  ;;  %254 = vst.msk [vmem:[#allocation2 + $0xf0] sm:$0x3] %vm243_vm1, %v6436_v40  ;;  %v6864_v59 = vsub.s32 %v602_v52, %v604_v53  ;;  %s6442_s15 = smov 126   ;;  %vm2697_vm7 = vcmask 261120  }
  0x42   : > { %255 = vst.msk [vmem:[#allocation2 + $0x108] sm:$0x3] %vm243_vm1, %v6436_v40  ;;  %256 = vst.msk [vmem:[#allocation2 + $0x120] sm:$0x3] %vm243_vm1, %v6436_v40  ;;  %v6874_v8 = vsub.s32 %v666_v63, %v604_v53  ;;  %vm2700_vm8 = vcmask 392192   ;;  %vm2703_vm9 = vcmask 523264  }
  0x43   : > { %6175 = vmatmul.mubr.msk.f32.gmra.mxu0 %vm394_vm0, %v381_v9  ;;  %257 = vst.msk [vmem:[#allocation2 + $0x138] sm:$0x3] %vm243_vm1, %v6436_v40  ;;  %258 = vst.msk [vmem:[#allocation2 + $0x150] sm:$0x3] %vm243_vm1, %v6436_v40  ;;  %vm2706_vm10 = vcmask 654336   ;;  %vm2709_vm11 = vcmask 785408  }
  0x44   : > { %5989 = vmatprep.mubr.f32.mxu0 %v10013_v0  ;;  %259 = vst.msk [vmem:[#allocation2 + $0x168] sm:$0x3] %vm243_vm1, %v6436_v40  ;;  %260 = vst.msk [vmem:[#allocation2 + $0x12] sm:$0x3] %vm243_vm1, %v6436_v40  ;;  %vm2712_vm12 = vcmask 916480   ;;  %s6173_s7 = sshll.u32 %s6572_s23, 6 }
  0x45   : > { %261 = vst.msk [vmem:[#allocation2 + $0x2a] sm:$0x3] %vm243_vm1, %v6436_v40  ;;  %262 = vst.msk [vmem:[#allocation2 + $0x42] sm:$0x3] %vm243_vm1, %v6436_v40  ;;  %s242_s9 = scalar_lea.vmem [#allocation6], %s6173_s7  ;;  %p10359_p12 = scmp.ne.s32.totalorder %s10089_s30, 0 }
  0x46   : > { %263 = vst.msk [vmem:[#allocation2 + $0x5a] sm:$0x3] %vm243_vm1, %v6436_v40  ;;  %264 = vst.msk [vmem:[#allocation2 + $0x72] sm:$0x3] %vm243_vm1, %v6436_v40 }
  0x47   : > { %265 = vst.msk [vmem:[#allocation2 + $0x8a] sm:$0x3] %vm243_vm1, %v6436_v40  ;;  %266 = vst.msk [vmem:[#allocation2 + $0xa2] sm:$0x3] %vm243_vm1, %v6436_v40 }
  0x48   : > { %267 = vst.msk [vmem:[#allocation2 + $0xba] sm:$0x3] %vm243_vm1, %v6436_v40  ;;  %268 = vst.msk [vmem:[#allocation2 + $0xd2] sm:$0x3] %vm243_vm1, %v6436_v40 }
  0x49   : > { %269 = vst.msk [vmem:[#allocation2 + $0xea] sm:$0x3] %vm243_vm1, %v6436_v40  ;;  %270 = vst.msk [vmem:[#allocation2 + $0x102] sm:$0x3] %vm243_vm1, %v6436_v40 }
  0x4a   : > { %271 = vst.msk [vmem:[#allocation2 + $0x11a] sm:$0x3] %vm243_vm1, %v6436_v40  ;;  %272 = vst.msk [vmem:[#allocation2 + $0x132] sm:$0x3] %vm243_vm1, %v6436_v40 }
  0x4b   : > { %273 = vst.msk [vmem:[#allocation2 + $0x14a] sm:$0x3] %vm243_vm1, %v6436_v40  ;;  %274 = vst.msk [vmem:[#allocation2 + $0x162] sm:$0x3] %vm243_vm1, %v6436_v40 }
  0x4c   : > { %275 = vst.msk [vmem:[#allocation2 + $0x17a] sm:$0x3] %vm243_vm1, %v6436_v40 }
  0x4d   : > { %285 = vst.msk [vmem:[#allocation2 + $0x38] sm:$0xff] %vm276_vm2, %v6436_v40  ;;  %288 = vst.msk [vmem:[#allocation2 + $0x50] sm:$0xff] %vm276_vm2, %v6436_v40 }
  0x4e   : > { %291 = vst.msk [vmem:[#allocation2 + $0x68] sm:$0xff] %vm276_vm2, %v6436_v40  ;;  %294 = vst.msk [vmem:[#allocation2 + $0x80] sm:$0xff] %vm276_vm2, %v6436_v40 }
  0x4f   : > { %297 = vst.msk [vmem:[#allocation2 + $0x98] sm:$0xff] %vm276_vm2, %v6436_v40  ;;  %300 = vst.msk [vmem:[#allocation2 + $0xb0] sm:$0xff] %vm276_vm2, %v6436_v40 }
  0x50   : > { %303 = vst.msk [vmem:[#allocation2 + $0xc8] sm:$0xff] %vm276_vm2, %v6436_v40  ;;  %306 = vst.msk [vmem:[#allocation2 + $0xe0] sm:$0xff] %vm276_vm2, %v6436_v40 }
  0x51   : > { %309 = vst.msk [vmem:[#allocation2 + $0xf8] sm:$0xff] %vm276_vm2, %v6436_v40  ;;  %312 = vst.msk [vmem:[#allocation2 + $0x110] sm:$0xff] %vm276_vm2, %v6436_v40 }
  0x52   : > { %315 = vst.msk [vmem:[#allocation2 + $0x128] sm:$0xff] %vm276_vm2, %v6436_v40  ;;  %318 = vst.msk [vmem:[#allocation2 + $0x140] sm:$0xff] %vm276_vm2, %v6436_v40 }
  0x53   : > { %321 = vst.msk [vmem:[#allocation2 + $0x158] sm:$0xff] %vm276_vm2, %v6436_v40  ;;  %324 = vst.msk [vmem:[#allocation2 + $0x170] sm:$0xff] %vm276_vm2, %v6436_v40 }
  0x54   : > { %277 = vst.msk [vmem:[#allocation2] sm:$0xff] %vm276_vm2, %v6436_v40  ;;  %281 = vst.msk [vmem:[#allocation2 + $0x18] sm:$0xff] %vm276_vm2, %v6436_v40 }
  0x55   : > { %328 = vst.msk [vmem:[#allocation2 + $0x8] sm:$0xff] %vm326_vm3, %v6436_v40  ;;  %332 = vst.msk [vmem:[#allocation2 + $0x20] sm:$0xff] %vm326_vm3, %v6436_v40 }
  0x56   : > { %284 = vst.msk [vmem:[#allocation2 + $0x30] sm:$0xff] %vm276_vm2, %v6436_v40  ;;  %287 = vst.msk [vmem:[#allocation2 + $0x48] sm:$0xff] %vm276_vm2, %v6436_v40 }
  0x57   : > { %290 = vst.msk [vmem:[#allocation2 + $0x60] sm:$0xff] %vm276_vm2, %v6436_v40  ;;  %293 = vst.msk [vmem:[#allocation2 + $0x78] sm:$0xff] %vm276_vm2, %v6436_v40 }
  0x58   : > { %296 = vst.msk [vmem:[#allocation2 + $0x90] sm:$0xff] %vm276_vm2, %v6436_v40  ;;  %299 = vst.msk [vmem:[#allocation2 + $0xa8] sm:$0xff] %vm276_vm2, %v6436_v40 }
  0x59   : > { %302 = vst.msk [vmem:[#allocation2 + $0xc0] sm:$0xff] %vm276_vm2, %v6436_v40  ;;  %305 = vst.msk [vmem:[#allocation2 + $0xd8] sm:$0xff] %vm276_vm2, %v6436_v40 }
  0x5a   : > { %308 = vst.msk [vmem:[#allocation2 + $0xf0] sm:$0xff] %vm276_vm2, %v6436_v40  ;;  %311 = vst.msk [vmem:[#allocation2 + $0x108] sm:$0xff] %vm276_vm2, %v6436_v40 }
  0x5b   : > { %314 = vst.msk [vmem:[#allocation2 + $0x120] sm:$0xff] %vm276_vm2, %v6436_v40  ;;  %317 = vst.msk [vmem:[#allocation2 + $0x138] sm:$0xff] %vm276_vm2, %v6436_v40 }
  0x5c   : > { %320 = vst.msk [vmem:[#allocation2 + $0x150] sm:$0xff] %vm276_vm2, %v6436_v40  ;;  %323 = vst.msk [vmem:[#allocation2 + $0x168] sm:$0xff] %vm276_vm2, %v6436_v40 }
  0x5d   : > { %335 = vst.msk [vmem:[#allocation2 + $0x38] sm:$0xff] %vm326_vm3, %v6436_v40  ;;  %338 = vst.msk [vmem:[#allocation2 + $0x50] sm:$0xff] %vm326_vm3, %v6436_v40 }
  0x5e   : > { %341 = vst.msk [vmem:[#allocation2 + $0x68] sm:$0xff] %vm326_vm3, %v6436_v40  ;;  %344 = vst.msk [vmem:[#allocation2 + $0x80] sm:$0xff] %vm326_vm3, %v6436_v40 }
  0x5f   : > { %347 = vst.msk [vmem:[#allocation2 + $0x98] sm:$0xff] %vm326_vm3, %v6436_v40  ;;  %350 = vst.msk [vmem:[#allocation2 + $0xb0] sm:$0xff] %vm326_vm3, %v6436_v40 }
  0x60   : > { %353 = vst.msk [vmem:[#allocation2 + $0xc8] sm:$0xff] %vm326_vm3, %v6436_v40  ;;  %356 = vst.msk [vmem:[#allocation2 + $0xe0] sm:$0xff] %vm326_vm3, %v6436_v40 }
  0x61   : > { %359 = vst.msk [vmem:[#allocation2 + $0xf8] sm:$0xff] %vm326_vm3, %v6436_v40  ;;  %362 = vst.msk [vmem:[#allocation2 + $0x110] sm:$0xff] %vm326_vm3, %v6436_v40 }
  0x62   : > { %365 = vst.msk [vmem:[#allocation2 + $0x128] sm:$0xff] %vm326_vm3, %v6436_v40  ;;  %368 = vst.msk [vmem:[#allocation2 + $0x140] sm:$0xff] %vm326_vm3, %v6436_v40 }
  0x63   : > { %371 = vst.msk [vmem:[#allocation2 + $0x158] sm:$0xff] %vm326_vm3, %v6436_v40  ;;  %374 = vst.msk [vmem:[#allocation2 + $0x170] sm:$0xff] %vm326_vm3, %v6436_v40 }
  0x64   : > { %327 = vst.msk [vmem:[#allocation2] sm:$0xff] %vm326_vm3, %v6436_v40  ;;  %331 = vst.msk [vmem:[#allocation2 + $0x18] sm:$0xff] %vm326_vm3, %v6436_v40 }
  0x65   : > { %334 = vst.msk [vmem:[#allocation2 + $0x30] sm:$0xff] %vm326_vm3, %v6436_v40  ;;  %337 = vst.msk [vmem:[#allocation2 + $0x48] sm:$0xff] %vm326_vm3, %v6436_v40 }
  0x66   : > { %340 = vst.msk [vmem:[#allocation2 + $0x60] sm:$0xff] %vm326_vm3, %v6436_v40  ;;  %343 = vst.msk [vmem:[#allocation2 + $0x78] sm:$0xff] %vm326_vm3, %v6436_v40 }
  0x67   : > { %346 = vst.msk [vmem:[#allocation2 + $0x90] sm:$0xff] %vm326_vm3, %v6436_v40  ;;  %349 = vst.msk [vmem:[#allocation2 + $0xa8] sm:$0xff] %vm326_vm3, %v6436_v40 }
  0x68   : > { %352 = vst.msk [vmem:[#allocation2 + $0xc0] sm:$0xff] %vm326_vm3, %v6436_v40  ;;  %355 = vst.msk [vmem:[#allocation2 + $0xd8] sm:$0xff] %vm326_vm3, %v6436_v40 }
  0x69   : > { %358 = vst.msk [vmem:[#allocation2 + $0xf0] sm:$0xff] %vm326_vm3, %v6436_v40  ;;  %361 = vst.msk [vmem:[#allocation2 + $0x108] sm:$0xff] %vm326_vm3, %v6436_v40 }
  0x6a   : > { %364 = vst.msk [vmem:[#allocation2 + $0x120] sm:$0xff] %vm326_vm3, %v6436_v40  ;;  %367 = vst.msk [vmem:[#allocation2 + $0x138] sm:$0xff] %vm326_vm3, %v6436_v40 }
  0x6b   : > { %370 = vst.msk [vmem:[#allocation2 + $0x150] sm:$0xff] %vm326_vm3, %v6436_v40  ;;  %373 = vst.msk [vmem:[#allocation2 + $0x168] sm:$0xff] %vm326_vm3, %v6436_v40 }
  0x6c   : > { %280 = vst.msk [vmem:[#allocation2 + $0x10] sm:$0xf] %vm279_vm4, %v6436_v40  ;;  %283 = vst.msk [vmem:[#allocation2 + $0x28] sm:$0xf] %vm279_vm4, %v6436_v40 }
  0x6d   : > { %286 = vst.msk [vmem:[#allocation2 + $0x40] sm:$0xf] %vm279_vm4, %v6436_v40  ;;  %289 = vst.msk [vmem:[#allocation2 + $0x58] sm:$0xf] %vm279_vm4, %v6436_v40 }
  0x6e   : > { %292 = vst.msk [vmem:[#allocation2 + $0x70] sm:$0xf] %vm279_vm4, %v6436_v40  ;;  %295 = vst.msk [vmem:[#allocation2 + $0x88] sm:$0xf] %vm279_vm4, %v6436_v40 }
  0x6f   : > { %298 = vst.msk [vmem:[#allocation2 + $0xa0] sm:$0xf] %vm279_vm4, %v6436_v40  ;;  %301 = vst.msk [vmem:[#allocation2 + $0xb8] sm:$0xf] %vm279_vm4, %v6436_v40 }
  0x70   : > { %304 = vst.msk [vmem:[#allocation2 + $0xd0] sm:$0xf] %vm279_vm4, %v6436_v40  ;;  %307 = vst.msk [vmem:[#allocation2 + $0xe8] sm:$0xf] %vm279_vm4, %v6436_v40 }
  0x71   : > { %310 = vst.msk [vmem:[#allocation2 + $0x100] sm:$0xf] %vm279_vm4, %v6436_v40  ;;  %313 = vst.msk [vmem:[#allocation2 + $0x118] sm:$0xf] %vm279_vm4, %v6436_v40 }
  0x72   : > { %316 = vst.msk [vmem:[#allocation2 + $0x130] sm:$0xf] %vm279_vm4, %v6436_v40  ;;  %319 = vst.msk [vmem:[#allocation2 + $0x148] sm:$0xf] %vm279_vm4, %v6436_v40 }
  0x73   : > { %322 = vst.msk [vmem:[#allocation2 + $0x160] sm:$0xf] %vm279_vm4, %v6436_v40  ;;  %325 = vst.msk [vmem:[#allocation2 + $0x178] sm:$0xf] %vm279_vm4, %v6436_v40 }
  0x74   : > { %330 = vst.msk [vmem:[#allocation2 + $0x10] sm:$0xf] %vm329_vm5, %v6436_v40  ;;  %333 = vst.msk [vmem:[#allocation2 + $0x28] sm:$0xf] %vm329_vm5, %v6436_v40 }
  0x75   : > { %336 = vst.msk [vmem:[#allocation2 + $0x40] sm:$0xf] %vm329_vm5, %v6436_v40  ;;  %339 = vst.msk [vmem:[#allocation2 + $0x58] sm:$0xf] %vm329_vm5, %v6436_v40 }
  0x76   : > { %342 = vst.msk [vmem:[#allocation2 + $0x70] sm:$0xf] %vm329_vm5, %v6436_v40  ;;  %345 = vst.msk [vmem:[#allocation2 + $0x88] sm:$0xf] %vm329_vm5, %v6436_v40 }
  0x77   : > { %348 = vst.msk [vmem:[#allocation2 + $0xa0] sm:$0xf] %vm329_vm5, %v6436_v40  ;;  %351 = vst.msk [vmem:[#allocation2 + $0xb8] sm:$0xf] %vm329_vm5, %v6436_v40 }
  0x78   : > { %354 = vst.msk [vmem:[#allocation2 + $0xd0] sm:$0xf] %vm329_vm5, %v6436_v40  ;;  %357 = vst.msk [vmem:[#allocation2 + $0xe8] sm:$0xf] %vm329_vm5, %v6436_v40 }
  0x79   : > { %360 = vst.msk [vmem:[#allocation2 + $0x100] sm:$0xf] %vm329_vm5, %v6436_v40  ;;  %363 = vst.msk [vmem:[#allocation2 + $0x118] sm:$0xf] %vm329_vm5, %v6436_v40 }
  0x7a   : > { %366 = vst.msk [vmem:[#allocation2 + $0x130] sm:$0xf] %vm329_vm5, %v6436_v40  ;;  %369 = vst.msk [vmem:[#allocation2 + $0x148] sm:$0xf] %vm329_vm5, %v6436_v40 }
  0x7b   : > { %372 = vst.msk [vmem:[#allocation2 + $0x160] sm:$0xf] %vm329_vm5, %v6436_v40  ;;  %375 = vst.msk [vmem:[#allocation2 + $0x178] sm:$0xf] %vm329_vm5, %v6436_v40 }
  0xb6   : > { %v392_v10 = vpop.permute.xlu0 %391 }
  0xba   : > { %v387_v11 = vpop.permute.xlu0 %386 }
  0xff   : > { %v467_v12 = vpop.f32.mrf.mxu0 }
 0x100   : > { %v468_v13 = vadd.f32 %v467_v12, %v387_v11 }
 0x101   : > { %v469_v14 = vpop.f32.mrf.mxu0 }
 0x102   : > { %v6176_v15 = vmul.f32 -1.442695, %v468_v13  ;;  %v470_v16 = vadd.f32 %v469_v14, %v387_v11 }
 0x103   : > { %v473_v18 = vpop.f32.mrf.mxu0 }
 0x104   : > { %6282 = vpow2.f32 %v6176_v15  ;;  %v6177_v17 = vmul.f32 -1.442695, %v470_v16  ;;  %v474_v19 = vadd.f32 %v473_v18, %v392_v10 }
 0x105   : > { %v475_v25 = vpop.f32.mrf.mxu0 }
 0x106   : > { %6284 = vpow2.f32 %v6177_v17  ;;  %v6178_v20 = vmul.f32 -1.442695, %v474_v19  ;;  %v476_v26 = vadd.f32 %v475_v25, %v392_v10 }
 0x108   : > { %6286 = vpow2.f32 %v6178_v20  ;;  %v6179_v27 = vmul.f32 -1.442695, %v476_v26 }
 0x111   : > { %v6283_v21 = vpop.eup %6282 }
 0x112   : > { %v490_v22 = vadd.f32 1.0, %v6283_v21 }
 0x113   : > { %v6285_v23 = vpop.eup %6284 }
 0x114   : > { %6288 = vrcp.f32 %v490_v22  ;;  %v491_v24 = vadd.f32 1.0, %v6285_v23 }
 0x115   : > { %v6287_v28 = vpop.eup %6286 }
 0x116   : > { %6290 = vrcp.f32 %v491_v24  ;;  %v492_v31 = vadd.f32 1.0, %v6287_v28 }
 0x117   : > { %6292 = vpow2.f32 %v6179_v27 }
 0x118   : > { %6294 = vrcp.f32 %v492_v31 }
 0x121   : > { %v6289_v29 = vpop.eup %6288 }
 0x122   : > { %v6598_v30 = vmul.f32 %v6289_v29, %v468_v13 }
 0x123   : > { %v6291_v32 = vpop.eup %6290 }
 0x124   : > { %10093 = vst [vmem:[#allocation9_spill] sm:$0xff] %v6598_v30  ;;  %518 = vrot.lane.b32.xlu0 %v6598_v30, %s6429_s10  ;;  %512 = vrot.lane.b32.xlu1 %v6598_v30, %s6430_s11  ;;  %v6604_v33 = vmul.f32 %v6291_v32, %v470_v16  ;;  %v6293_v34 = vpop.eup %6292 }
 0x125   : > { %v493_v35 = vadd.f32 1.0, %v6293_v34  ;;  %v6295_v36 = vpop.eup %6294 }
 0x126   : > { %10094 = vst [vmem:[#allocation10_spill] sm:$0xff] %v6604_v33  ;;  %v6622_v37 = vmul.f32 %v6295_v36, %v474_v19 }
 0x127   : > { %6296 = vrcp.f32 %v493_v35 }
 0x128   : > { %524 = vrot.lane.b32.xlu0 %v6598_v30, %s6431_s13  ;;  %556 = vrot.lane.b32.xlu1 %v6604_v33, %s6430_s11  ;;  %10095 = vst [vmem:[#allocation11_spill] sm:$0xff] %v6622_v37 }
 0x12c   : > { %530 = vrot.lane.b32.xlu0 %v6598_v30, %s6432_s17  ;;  %568 = vrot.lane.b32.xlu1 %v6604_v33, %s6431_s13 }
 0x130   : > { %536 = vrot.lane.b32.xlu0 %v6598_v30, %s6433_s25  ;;  %580 = vrot.lane.b32.xlu1 %v6604_v33, %s6433_s25 }
 0x134   : > { %542 = vrot.lane.b32.xlu0 %v6598_v30, %s6434_s26  ;;  %592 = vrot.lane.b32.xlu1 %v6604_v33, %s6435_s28  ;;  %v6297_v38 = vpop.eup %6296 }
 0x135   : > { %v6640_v39 = vmul.f32 %v6297_v38, %v476_v26 }
 0x137   : > { %10096 = vst [vmem:[#allocation12_spill] sm:$0xff] %v6640_v39 }
 0x138   : > { %548 = vrot.lane.b32.xlu0 %v6598_v30, %s6435_s28  ;;  %514 = vrot.lane.b32.xlu1 %v6622_v37, %s6430_s11 }
 0x13c   : > { %562 = vrot.lane.b32.xlu0 %v6604_v33, %s6429_s10  ;;  %520 = vrot.lane.b32.xlu1 %v6622_v37, %s6429_s10 }
 0x140   : > { %574 = vrot.lane.b32.xlu0 %v6604_v33, %s6432_s17  ;;  %526 = vrot.lane.b32.xlu1 %v6622_v37, %s6431_s13 }
 0x144   : > { %586 = vrot.lane.b32.xlu0 %v6604_v33, %s6434_s26  ;;  %532 = vrot.lane.b32.xlu1 %v6622_v37, %s6432_s17 }
 0x148   : > { %558 = vrot.lane.b32.xlu0 %v6640_v39, %s6430_s11  ;;  %538 = vrot.lane.b32.xlu1 %v6622_v37, %s6433_s25 }
 0x14c   : > { %570 = vrot.lane.b32.xlu0 %v6640_v39, %s6431_s13  ;;  %544 = vrot.lane.b32.xlu1 %v6622_v37, %s6434_s26 }
 0x150   : > { %582 = vrot.lane.b32.xlu0 %v6640_v39, %s6433_s25  ;;  %550 = vrot.lane.b32.xlu1 %v6622_v37, %s6435_s28 }
 0x154   : > { %594 = vrot.lane.b32.xlu0 %v6640_v39, %s6435_s28  ;;  %564 = vrot.lane.b32.xlu1 %v6640_v39, %s6429_s10 }
 0x158   : > { %576 = vrot.lane.b32.xlu1 %v6640_v39, %s6432_s17 }
 0x15c   : > { %588 = vrot.lane.b32.xlu1 %v6640_v39, %s6434_s26 }
 0x196   : > { %v6854_v41 = vpop.permute.xlu0 %518  ;;  %v513_v42 = vpop.permute.xlu1 %512 }
 0x197   : > { %v598_v60 = vcombine.low %v6598_v30, %v6854_v41  ;;  %v599_v24 = vcombine.high %v6598_v30, %v6854_v41 }
 0x199   : > { %v606_v3 = vrot.slane %v598_v60, %v6864_v59 }
 0x19a   : > { %v525_v43 = vpop.permute.xlu0 %524  ;;  %v6856_v44 = vpop.permute.xlu1 %556 }
 0x19b   : > { %v614_v54 = vcombine.low %v513_v42, %v525_v43  ;;  %v615_v21 = vcombine.high %v513_v42, %v525_v43  ;;  %v6920_v42 = vrot.slane %v599_v24, %v6864_v59 }
 0x19d   : > { %v622_v61 = vrot.slane %v614_v54, %v6864_v59  ;;  %v6912_v36 = vrot.slane %v615_v21, %v6864_v59 }
 0x19e   : > { %v531_v45 = vpop.permute.xlu0 %530  ;;  %v6858_v46 = vpop.permute.xlu1 %568 }
 0x19f   : > { %v662_v5 = vcombine.low %v606_v3, %v622_v61  ;;  %v750_v20 = vcombine.low %v6856_v44, %v6858_v46  ;;  %v663_v22 = vcombine.high %v606_v3, %v622_v61  ;;  %v678_v53 = vcombine.low %v6920_v42, %v6912_v36 }
 0x1a1   : > { %v670_v12 = vrot.slane %v662_v5, %v6874_v8  ;;  %v6907_v34 = vrot.slane %v750_v20, %v6864_v59  ;;  %v677_v41 = vrot.slane %v663_v22, %v6874_v8  ;;  %v686_v40 = vrot.slane %v678_v53, %v6874_v8 }
 0x1a2   : > { %v537_v50 = vpop.permute.xlu0 %536  ;;  %v6860_v51 = vpop.permute.xlu1 %580 }
 0x1a6   : > { %v543_v57 = vpop.permute.xlu0 %542  ;;  %v6862_v58 = vpop.permute.xlu1 %592 }
 0x1a7   : > { %v630_v62 = vcombine.low %v531_v45, %v543_v57  ;;  %v631_v23 = vcombine.high %v531_v45, %v543_v57  ;;  %v782_v25 = vcombine.low %v6860_v51, %v6862_v58  ;;  %v783_v3 = vcombine.high %v6860_v51, %v6862_v58 }
 0x1a8   : > { %v751_v51 = vcombine.high %v6856_v44, %v6858_v46 }
 0x1a9   : > { %v638_v6 = vrot.slane %v630_v62, %v6864_v59  ;;  %v6915_v38 = vrot.slane %v631_v23, %v6864_v59  ;;  %v6923_v43 = vrot.slane %v782_v25, %v6864_v59 }
 0x1aa   : > { %v549_v1 = vpop.permute.xlu0 %548  ;;  %v6869_v2 = vpop.permute.xlu1 %514  ;;  %v765_v25 = vrot.slane %v751_v51, %v6864_v59 }
 0x1ab   : > { %v646_v4 = vcombine.low %v537_v50, %v549_v1  ;;  %v647_v17 = vcombine.high %v537_v50, %v549_v1 }
 0x1ad   : > { %v654_v7 = vrot.slane %v646_v4, %v6864_v59  ;;  %v6903_v29 = vrot.slane %v647_v17, %v6864_v59 }
 0x1ae   : > { %v6876_v9 = vpop.permute.xlu0 %562  ;;  %v6878_v10 = vpop.permute.xlu1 %520 }
 0x1af   : > { %v694_v11 = vcombine.low %v638_v6, %v654_v7  ;;  %v734_v14 = vcombine.low %v6604_v33, %v6876_v9  ;;  %v695_v18 = vcombine.high %v638_v6, %v654_v7  ;;  %v710_v49 = vcombine.low %v6915_v38, %v6903_v29 }
 0x1b0   : > { %v735_v4 = vcombine.high %v6604_v33, %v6876_v9  ;;  %v711_v7 = vcombine.high %v6915_v38, %v6903_v29  ;;  %v870_v21 = vcombine.low %v6622_v37, %v6878_v10 }
 0x1b1   : > { %v702_v13 = vrot.slane %v694_v11, %v6874_v8  ;;  %v6896_v26 = vrot.slane %v734_v14, %v6864_v59  ;;  %v709_v32 = vrot.slane %v695_v18, %v6874_v8  ;;  %v718_v61 = vrot.slane %v710_v49, %v6874_v8 }
 0x1b2   : > { %v6884_v15 = vpop.permute.xlu0 %574  ;;  %v6886_v16 = vpop.permute.xlu1 %526  ;;  %v749_v44 = vrot.slane %v735_v4, %v6864_v59  ;;  %v725_v24 = vrot.slane %v711_v7, %v6874_v8  ;;  %v878_v38 = vrot.slane %v870_v21, %v6864_v59 }
 0x1b3   : > { %v726_v19 = vcombine.low %v670_v12, %v702_v13  ;;  %v727_v31 = vcombine.high %v670_v12, %v702_v13  ;;  %v798_v45 = vcombine.low %v6896_v26, %v6907_v34  ;;  %v728_v50 = vcombine.low %v677_v41, %v709_v32 }
 0x1b4   : > { %v729_v60 = vcombine.high %v677_v41, %v709_v32  ;;  %v799_v5 = vcombine.high %v6896_v26, %v6907_v34  ;;  %v730_v13 = vcombine.low %v686_v40, %v718_v61  ;;  %v886_v17 = vcombine.low %v6869_v2, %v6886_v16 }
 0x1b5   : > { %1174 = vrot.lane.b32.xlu0 %v726_v19, %s6439_s12  ;;  %v806_v56 = vrot.slane %v798_v45, %v6874_v8  ;;  %v797_v19 = vrot.slane %v783_v3, %v6864_v59  ;;  %v731_v23 = vcombine.high %v686_v40, %v718_v61 }
 0x1b6   : > { %v6898_v27 = vpop.permute.xlu0 %586  ;;  %v6900_v28 = vpop.permute.xlu1 %532  ;;  %v813_v20 = vrot.slane %v799_v5, %v6874_v8  ;;  %v894_v29 = vrot.slane %v886_v17, %v6864_v59  ;;  %v871_v17 = vcombine.high %v6622_v37, %v6878_v10 }
 0x1b7   : > { %v766_v35 = vcombine.low %v6884_v15, %v6898_v27  ;;  %v767_v62 = vcombine.high %v6884_v15, %v6898_v27  ;;  %v679_v15 = vcombine.high %v6920_v42, %v6912_v36 }
 0x1b8   : > { %v885_v10 = vrot.slane %v871_v17, %v6864_v59 }
 0x1b9   : > { %1178 = vrot.lane.b32.xlu0 %v727_v31, %s6439_s12  ;;  %v6928_v47 = vrot.slane %v766_v35, %v6864_v59  ;;  %v781_v58 = vrot.slane %v767_v62, %v6864_v59  ;;  %v693_v34 = vrot.slane %v679_v15, %v6874_v8  ;;  %v814_v35 = vcombine.low %v749_v44, %v765_v25 }
 0x1ba   : > { %v6930_v48 = vpop.permute.xlu1 %538  ;;  %v6970_v54 = vpop.permute.xlu0 %558 }
 0x1bb   : > { %v830_v52 = vcombine.low %v6928_v47, %v6923_v43  ;;  %v831_v63 = vcombine.high %v6928_v47, %v6923_v43  ;;  %v846_v26 = vcombine.low %v781_v58, %v797_v19  ;;  %v732_v42 = vcombine.low %v693_v34, %v725_v24 }
 0x1bc   : > { %v934_v47 = vcombine.low %v878_v38, %v894_v29  ;;  %v733_v53 = vcombine.high %v693_v34, %v725_v24 }
 0x1bd   : > { %1182 = vrot.lane.b32.xlu0 %v728_v50, %s6439_s12  ;;  %v838_v57 = vrot.slane %v830_v52, %v6874_v8  ;;  %v845_v14 = vrot.slane %v831_v63, %v6874_v8  ;;  %v854_v45 = vrot.slane %v846_v26, %v6874_v8  ;;  %v822_v50 = vrot.slane %v814_v35, %v6874_v8 }
 0x1be   : > { %v7005_v55 = vpop.permute.xlu1 %544  ;;  %v7027_v11 = vpop.permute.xlu0 %570  ;;  %v942_v62 = vrot.slane %v934_v47, %v6874_v8  ;;  %v815_v63 = vcombine.high %v749_v44, %v765_v25 }
 0x1bf   : > { %v862_v1 = vcombine.low %v806_v56, %v838_v57  ;;  %v863_v9 = vcombine.high %v806_v56, %v838_v57  ;;  %v902_v18 = vcombine.low %v6900_v28, %v7005_v55  ;;  %v864_v27 = vcombine.low %v813_v20, %v845_v14 }
 0x1c0   : > { %v865_v43 = vcombine.high %v813_v20, %v845_v14  ;;  %v847_v57 = vcombine.high %v781_v58, %v797_v19  ;;  %v866_v61 = vcombine.low %v822_v50, %v854_v45  ;;  %v1022_v7 = vcombine.low %v6970_v54, %v7027_v11 }
 0x1c1   : > { %1186 = vrot.lane.b32.xlu0 %v729_v60, %s6439_s12  ;;  %1176 = vrot.lane.b32.xlu1 %v862_v1, %s6439_s12  ;;  %v910_v31 = vrot.slane %v902_v18, %v6864_v59  ;;  %v887_v58 = vcombine.high %v6869_v2, %v6886_v16  ;;  %v903_v14 = vcombine.high %v6900_v28, %v7005_v55 }
 0x1c2   : > { %v7023_v6 = vpop.permute.xlu1 %550  ;;  %v7055_v32 = vpop.permute.xlu0 %582  ;;  %v861_v51 = vrot.slane %v847_v57, %v6874_v8  ;;  %v829_v15 = vrot.slane %v815_v63, %v6874_v8  ;;  %v1030_v28 = vrot.slane %v1022_v7, %v6864_v59 }
 0x1c3   : > { %v918_v12 = vcombine.low %v6930_v48, %v7023_v6  ;;  %v919_v3 = vcombine.high %v6930_v48, %v7023_v6  ;;  %v901_v44 = vrot.slane %v887_v58, %v6864_v59  ;;  %v917_v20 = vrot.slane %v903_v14, %v6864_v59 }
 0x1c4   : > { %v868_v19 = vcombine.low %v829_v15, %v861_v51  ;;  %v869_v25 = vcombine.high %v829_v15, %v861_v51 }
 0x1c5   : > { %1190 = vrot.lane.b32.xlu0 %v730_v13, %s6439_s12  ;;  %1180 = vrot.lane.b32.xlu1 %v863_v9, %s6439_s12  ;;  %v926_v22 = vrot.slane %v918_v12, %v6864_v59  ;;  %v867_v13 = vcombine.high %v822_v50, %v854_v45  ;;  %v935_v9 = vcombine.high %v878_v38, %v894_v29 }
 0x1c6   : > { %v7045_v46 = vpop.permute.xlu1 %564  ;;  %v7069_v52 = vpop.permute.xlu0 %594  ;;  %v933_v18 = vrot.slane %v919_v3, %v6864_v59 }
 0x1c7   : > { %v966_v41 = vcombine.low %v910_v31, %v926_v22  ;;  %v1054_v1 = vcombine.low %v7055_v32, %v7069_v52  ;;  %v1006_v40 = vcombine.low %v6640_v39, %v7045_v46  ;;  %v967_v4 = vcombine.high %v910_v31, %v926_v22 }
 0x1c8   : > { %v949_v21 = vrot.slane %v935_v9, %v6874_v8  ;;  %v1007_v45 = vcombine.high %v6640_v39, %v7045_v46  ;;  %v983_v50 = vcombine.high %v917_v20, %v933_v18 }
 0x1c9   : > { %1194 = vrot.lane.b32.xlu0 %v731_v23, %s6439_s12  ;;  %1184 = vrot.lane.b32.xlu1 %v864_v27, %s6439_s12  ;;  %v974_v56 = vrot.slane %v966_v41, %v6874_v8  ;;  %v1062_v48 = vrot.slane %v1054_v1, %v6864_v59  ;;  %v1014_v6 = vrot.slane %v1006_v40, %v6864_v59 }
 0x1ca   : > { %v7060_v36 = vpop.permute.xlu1 %576  ;;  %v981_v16 = vrot.slane %v967_v4, %v6874_v8  ;;  %v982_v23 = vcombine.low %v917_v20, %v933_v18  ;;  %v950_v27 = vcombine.low %v885_v10, %v901_v44  ;;  %v1021_v46 = vrot.slane %v1007_v45, %v6864_v59 }
 0x1cb   : > { %v998_v5 = vcombine.low %v942_v62, %v974_v56  ;;  %v999_v2 = vcombine.high %v942_v62, %v974_v56  ;;  %v1070_v22 = vcombine.low %v1014_v6, %v1030_v28  ;;  %v1071_v47 = vcombine.high %v1014_v6, %v1030_v28 }
 0x1cc   : > { %v1000_v24 = vcombine.low %v949_v21, %v981_v16  ;;  %v1001_v31 = vcombine.high %v949_v21, %v981_v16  ;;  %v990_v34 = vrot.slane %v982_v23, %v6874_v8  ;;  %v997_v62 = vrot.slane %v983_v50, %v6874_v8 }
 0x1cd   : > { %1198 = vrot.lane.b32.xlu0 %v732_v42, %s6439_s12  ;;  %1188 = vrot.lane.b32.xlu1 %v865_v43, %s6439_s12  ;;  %v1078_v29 = vrot.slane %v1070_v22, %v6874_v8  ;;  %v958_v42 = vrot.slane %v950_v27, %v6874_v8  ;;  %v1055_v43 = vcombine.high %v7055_v32, %v7069_v52 }
 0x1ce   : > { %v7066_v49 = vpop.permute.xlu1 %588  ;;  %v1085_v52 = vrot.slane %v1071_v47, %v6874_v8 }
 0x1cf   : > { %v1038_v60 = vcombine.low %v7060_v36, %v7066_v49  ;;  %v1039_v35 = vcombine.high %v7060_v36, %v7066_v49  ;;  %v1023_v36 = vcombine.high %v6970_v54, %v7027_v11  ;;  %v1069_v32 = vrot.slane %v1055_v43, %v6864_v59 }
 0x1d1   : > { %1202 = vrot.lane.b32.xlu0 %v733_v53, %s6439_s12  ;;  %1192 = vrot.lane.b32.xlu1 %v866_v61, %s6439_s12  ;;  %v1046_v12 = vrot.slane %v1038_v60, %v6864_v59  ;;  %v1002_v53 = vcombine.low %v958_v42, %v990_v34  ;;  %v1053_v49 = vrot.slane %v1039_v35, %v6864_v59 }
 0x1d2   : > { %v951_v60 = vcombine.high %v885_v10, %v901_v44  ;;  %v1003_v61 = vcombine.high %v958_v42, %v990_v34  ;;  %v1037_v54 = vrot.slane %v1023_v36, %v6864_v59 }
 0x1d3   : > { %v1102_v55 = vcombine.low %v1046_v12, %v1062_v48  ;;  %v1103_v38 = vcombine.high %v1046_v12, %v1062_v48  ;;  %v1118_v11 = vcombine.low %v1053_v49, %v1069_v32 }
 0x1d4   : > { %v965_v1 = vrot.slane %v951_v60, %v6874_v8  ;;  %v1086_v40 = vcombine.low %v1021_v46, %v1037_v54  ;;  %v1087_v58 = vcombine.high %v1021_v46, %v1037_v54 }
 0x1d5   : > { %1206 = vrot.lane.b32.xlu0 %v998_v5, %s6439_s12  ;;  %1196 = vrot.lane.b32.xlu1 %v867_v13, %s6439_s12  ;;  %v1110_v26 = vrot.slane %v1102_v55, %v6874_v8  ;;  %v1117_v57 = vrot.slane %v1103_v38, %v6874_v8  ;;  %v1126_v5 = vrot.slane %v1118_v11, %v6874_v8 }
 0x1d6   : > { %v1004_v3 = vcombine.low %v965_v1, %v997_v62  ;;  %v1094_v7 = vrot.slane %v1086_v40, %v6874_v8  ;;  %v1005_v12 = vcombine.high %v965_v1, %v997_v62  ;;  %v1119_v13 = vcombine.high %v1053_v49, %v1069_v32 }
 0x1d7   : > { %v1134_v41 = vcombine.low %v1078_v29, %v1110_v26  ;;  %v1135_v56 = vcombine.high %v1078_v29, %v1110_v26  ;;  %v1136_v63 = vcombine.low %v1085_v52, %v1117_v57  ;;  %v1137_v4 = vcombine.high %v1085_v52, %v1117_v57 }
 0x1d8   : > { %v1138_v51 = vcombine.low %v1094_v7, %v1126_v5  ;;  %v1139_v9 = vcombine.high %v1094_v7, %v1126_v5  ;;  %v1133_v14 = vrot.slane %v1119_v13, %v6874_v8  ;;  %v1101_v48 = vrot.slane %v1087_v58, %v6874_v8 }
 0x1d9   : > { %1210 = vrot.lane.b32.xlu0 %v999_v2, %s6439_s12  ;;  %1200 = vrot.lane.b32.xlu1 %v868_v19, %s6439_s12 }
 0x1da   : > { %v1140_v6 = vcombine.low %v1101_v48, %v1133_v14  ;;  %v1141_v15 = vcombine.high %v1101_v48, %v1133_v14 }
 0x1dd   : > { %1214 = vrot.lane.b32.xlu0 %v1000_v24, %s6439_s12  ;;  %1204 = vrot.lane.b32.xlu1 %v869_v25, %s6439_s12 }
 0x1e1   : > { %1218 = vrot.lane.b32.xlu0 %v1001_v31, %s6439_s12  ;;  %1208 = vrot.lane.b32.xlu1 %v1134_v41, %s6439_s12 }
 0x1e5   : > { %1222 = vrot.lane.b32.xlu0 %v1002_v53, %s6439_s12  ;;  %1212 = vrot.lane.b32.xlu1 %v1135_v56, %s6439_s12 }
 0x1e9   : > { %1226 = vrot.lane.b32.xlu0 %v1003_v61, %s6439_s12  ;;  %1216 = vrot.lane.b32.xlu1 %v1136_v63, %s6439_s12 }
 0x1ed   : > { %1230 = vrot.lane.b32.xlu0 %v1004_v3, %s6439_s12  ;;  %1220 = vrot.lane.b32.xlu1 %v1137_v4, %s6439_s12 }
 0x1f1   : > { %1234 = vrot.lane.b32.xlu0 %v1005_v12, %s6439_s12  ;;  %1224 = vrot.lane.b32.xlu1 %v1138_v51, %s6439_s12 }
 0x1f5   : > { %1228 = vrot.lane.b32.xlu1 %v1139_v9, %s6439_s12 }
 0x1f9   : > { %1232 = vrot.lane.b32.xlu1 %v1140_v6, %s6439_s12 }
 0x1fd   : > { %1236 = vrot.lane.b32.xlu1 %v1141_v15, %s6439_s12 }
 0x227   : > { %v1175_v17 = vpop.permute.xlu0 %1174 }
 0x228   : > { %1271 = vst.msk [vmem:[#allocation2 + $0x2] sm:$0xff] %vm1270_vm6, %v1175_v17 }
 0x22b   : > { %v1179_v18 = vpop.permute.xlu0 %1178 }
 0x22c   : > { %1273 = vst.msk [vmem:[#allocation2 + $0x1a] sm:$0xff] %vm1270_vm6, %v1179_v18 }
 0x22f   : > { %v1183_v2 = vpop.permute.xlu0 %1182  ;;  %v1303_v20 = vld [vmem:[#allocation2] sm:$0xff] }
 0x230   : > { %1275 = vst.msk [vmem:[#allocation2 + $0x32] sm:$0xff] %vm1270_vm6, %v1183_v2  ;;  %v1335_v21 = vld [vmem:[#allocation2 + $0x1] sm:$0xff] }
 0x231   : > { %v1367_v27 = vld [vmem:[#allocation2 + $0x2] sm:$0xff]  ;;  %v1463_v34 = vmax.f32 %v1303_v20, %v1335_v21 }
 0x233   : > { %v1187_v16 = vpop.permute.xlu0 %1186  ;;  %v1177_v28 = vpop.permute.xlu1 %1176  ;;  %v1305_v38 = vld [vmem:[#allocation2 + $0x18] sm:$0xff] }
 0x234   : > { %1277 = vst.msk [vmem:[#allocation2 + $0x4a] sm:$0xff] %vm1270_vm6, %v1187_v16  ;;  %1272 = vst.msk [vmem:[#allocation2 + $0xa] sm:$0xff] %vm1270_vm6, %v1177_v28  ;;  %v1337_v41 = vld [vmem:[#allocation2 + $0x19] sm:$0xff] }
 0x235   : > { %v1369_v45 = vld [vmem:[#allocation2 + $0x1a] sm:$0xff]  ;;  %v1465_v52 = vmax.f32 %v1305_v38, %v1337_v41 }
 0x237   : > { %v1191_v55 = vpop.permute.xlu0 %1190  ;;  %v1181_v19 = vpop.permute.xlu1 %1180  ;;  %v1307_v63 = vld [vmem:[#allocation2 + $0x30] sm:$0xff] }
 0x238   : > { %1279 = vst.msk [vmem:[#allocation2 + $0x62] sm:$0xff] %vm1270_vm6, %v1191_v55  ;;  %1274 = vst.msk [vmem:[#allocation2 + $0x22] sm:$0xff] %vm1270_vm6, %v1181_v19  ;;  %v1339_v1 = vld [vmem:[#allocation2 + $0x31] sm:$0xff] }
 0x239   : > { %v1371_v4 = vld [vmem:[#allocation2 + $0x32] sm:$0xff]  ;;  %v1467_v15 = vmax.f32 %v1307_v63, %v1339_v1 }
 0x23b   : > { %v1195_v44 = vpop.permute.xlu0 %1194  ;;  %v1185_v22 = vpop.permute.xlu1 %1184  ;;  %v1304_v10 = vld [vmem:[#allocation2 + $0x8] sm:$0xff] }
 0x23c   : > { %1281 = vst.msk [vmem:[#allocation2 + $0x7a] sm:$0xff] %vm1270_vm6, %v1195_v44  ;;  %v1336_v23 = vld [vmem:[#allocation2 + $0x9] sm:$0xff]  ;;  %1276 = vst.msk [vmem:[#allocation2 + $0x3a] sm:$0xff] %vm1270_vm6, %v1185_v22 }
 0x23d   : > { %v1368_v24 = vld [vmem:[#allocation2 + $0xa] sm:$0xff]  ;;  %v1464_v26 = vmax.f32 %v1304_v10, %v1336_v23 }
 0x23e   : > { %v1400_v25 = vld [vmem:[#allocation2 + $0xb] sm:$0xff]  ;;  %v1399_v29 = vld [vmem:[#allocation2 + $0x3] sm:$0xff] }
 0x23f   : > { %v1496_v31 = vmax.f32 %v1368_v24, %v1400_v25  ;;  %v1495_v35 = vmax.f32 %v1367_v27, %v1399_v29  ;;  %v1199_v42 = vpop.permute.xlu0 %1198  ;;  %v1432_v43 = vld [vmem:[#allocation2 + $0xc] sm:$0xff]  ;;  %v1189_v47 = vpop.permute.xlu1 %1188  ;;  %v1306_v36 = vld [vmem:[#allocation2 + $0x20] sm:$0xff] }
 0x240   : > { %1283 = vst.msk [vmem:[#allocation2 + $0x92] sm:$0xff] %vm1270_vm6, %v1199_v42  ;;  %v1338_v49 = vld [vmem:[#allocation2 + $0x21] sm:$0xff]  ;;  %1278 = vst.msk [vmem:[#allocation2 + $0x52] sm:$0xff] %vm1270_vm6, %v1189_v47  ;;  %v1341_v55 = vld [vmem:[#allocation2 + $0x49] sm:$0xff] }
 0x241   : > { %v1528_v50 = vmax.f32 %v1464_v26, %v1496_v31  ;;  %v1527_v53 = vmax.f32 %v1463_v34, %v1495_v35  ;;  %v1370_v56 = vld [vmem:[#allocation2 + $0x22] sm:$0xff]  ;;  %v1466_v32 = vmax.f32 %v1306_v36, %v1338_v49  ;;  %v1373_v20 = vld [vmem:[#allocation2 + $0x4a] sm:$0xff] }
 0x242   : > { %v1431_v57 = vld [vmem:[#allocation2 + $0x4] sm:$0xff]  ;;  %v1401_v46 = vld [vmem:[#allocation2 + $0x1b] sm:$0xff] }
 0x243   : > { %v1402_v60 = vld [vmem:[#allocation2 + $0x23] sm:$0xff]  ;;  %v7157_v61 = vmax.f32 %v1528_v50, %v1432_v43  ;;  %v7159_v62 = vmax.f32 %v1527_v53, %v1431_v57  ;;  %v1497_v11 = vmax.f32 %v1369_v45, %v1401_v46  ;;  %v1203_v40 = vpop.permute.xlu0 %1202  ;;  %v1193_v5 = vpop.permute.xlu1 %1192  ;;  %v1308_v13 = vld [vmem:[#allocation2 + $0x38] sm:$0xff] }
 0x244   : > { %v1498_v54 = vmax.f32 %v1370_v56, %v1402_v60  ;;  %v1434_v3 = vld [vmem:[#allocation2 + $0x24] sm:$0xff]  ;;  %1285 = vst.msk [vmem:[#allocation2 + $0xaa] sm:$0xff] %vm1270_vm6, %v1203_v40  ;;  %v1340_v51 = vld [vmem:[#allocation2 + $0x39] sm:$0xff]  ;;  %1280 = vst.msk [vmem:[#allocation2 + $0x6a] sm:$0xff] %vm1270_vm6, %v1193_v5 }
 0x245   : > { %1625 = vrot.lane.b32.xlu1 %v7157_v61, %s6440_s14  ;;  %1623 = vrot.lane.b32.xlu0 %v7159_v62, %s6440_s14  ;;  %v1529_v12 = vmax.f32 %v1465_v52, %v1497_v11  ;;  %v1372_v58 = vld [vmem:[#allocation2 + $0x3a] sm:$0xff]  ;;  %v1468_v48 = vmax.f32 %v1308_v13, %v1340_v51  ;;  %v1309_v28 = vld [vmem:[#allocation2 + $0x48] sm:$0xff] }
 0x246   : > { %v1530_v7 = vmax.f32 %v1466_v32, %v1498_v54  ;;  %v1433_v9 = vld [vmem:[#allocation2 + $0x1c] sm:$0xff]  ;;  %v1403_v6 = vld [vmem:[#allocation2 + $0x33] sm:$0xff]  ;;  %v1469_v34 = vmax.f32 %v1309_v28, %v1341_v55 }
 0x247   : > { %v1404_v14 = vld [vmem:[#allocation2 + $0x3b] sm:$0xff]  ;;  %v7169_v18 = vmax.f32 %v1529_v12, %v1433_v9  ;;  %v1499_v16 = vmax.f32 %v1371_v4, %v1403_v6  ;;  %v1207_v19 = vpop.permute.xlu0 %1206  ;;  %v1197_v21 = vpop.permute.xlu1 %1196  ;;  %v1310_v23 = vld [vmem:[#allocation2 + $0x50] sm:$0xff] }
 0x248   : > { %v7167_v17 = vmax.f32 %v1530_v7, %v1434_v3  ;;  %v1500_v2 = vmax.f32 %v1372_v58, %v1404_v14  ;;  %v1436_v44 = vld [vmem:[#allocation2 + $0x3c] sm:$0xff]  ;;  %1287 = vst.msk [vmem:[#allocation2 + $0xc2] sm:$0xff] %vm1270_vm6, %v1207_v19  ;;  %v1342_v24 = vld [vmem:[#allocation2 + $0x51] sm:$0xff]  ;;  %1282 = vst.msk [vmem:[#allocation2 + $0x82] sm:$0xff] %vm1270_vm6, %v1197_v21 }
 0x249   : > { %1627 = vrot.lane.b32.xlu0 %v7169_v18, %s6440_s14  ;;  %v1531_v10 = vmax.f32 %v1467_v15, %v1499_v16  ;;  %v1374_v25 = vld [vmem:[#allocation2 + $0x52] sm:$0xff]  ;;  %v1470_v29 = vmax.f32 %v1310_v23, %v1342_v24  ;;  %v1311_v43 = vld [vmem:[#allocation2 + $0x60] sm:$0xff] }
 0x24a   : > { %1629 = vrot.lane.b32.xlu1 %v7167_v17, %s6440_s14  ;;  %v1532_v22 = vmax.f32 %v1468_v48, %v1500_v2  ;;  %v1435_v26 = vld [vmem:[#allocation2 + $0x34] sm:$0xff]  ;;  %v1405_v31 = vld [vmem:[#allocation2 + $0x4b] sm:$0xff]  ;;  %v1343_v45 = vld [vmem:[#allocation2 + $0x61] sm:$0xff] }
 0x24b   : > { %v1406_v27 = vld [vmem:[#allocation2 + $0x53] sm:$0xff]  ;;  %v7179_v38 = vmax.f32 %v1531_v10, %v1435_v26  ;;  %v1501_v42 = vmax.f32 %v1373_v20, %v1405_v31  ;;  %v1211_v47 = vpop.permute.xlu0 %1210  ;;  %v1375_v53 = vld [vmem:[#allocation2 + $0x62] sm:$0xff]  ;;  %v1201_v36 = vpop.permute.xlu1 %1200  ;;  %v1376_v32 = vld [vmem:[#allocation2 + $0x6a] sm:$0xff]  ;;  %v1471_v63 = vmax.f32 %v1311_v43, %v1343_v45 }
 0x24c   : > { %v7177_v35 = vmax.f32 %v1532_v22, %v1436_v44  ;;  %v1502_v41 = vmax.f32 %v1374_v25, %v1406_v27  ;;  %v1438_v50 = vld [vmem:[#allocation2 + $0x54] sm:$0xff]  ;;  %1289 = vst.msk [vmem:[#allocation2 + $0xda] sm:$0xff] %vm1270_vm6, %v1211_v47  ;;  %v1312_v57 = vld [vmem:[#allocation2 + $0x68] sm:$0xff]  ;;  %1284 = vst.msk [vmem:[#allocation2 + $0x9a] sm:$0xff] %vm1270_vm6, %v1201_v36 }
 0x24d   : > { %1631 = vrot.lane.b32.xlu0 %v7179_v38, %s6440_s14  ;;  %v1533_v56 = vmax.f32 %v1469_v34, %v1501_v42  ;;  %v1344_v60 = vld [vmem:[#allocation2 + $0x69] sm:$0xff]  ;;  %v1313_v5 = vld [vmem:[#allocation2 + $0x78] sm:$0xff] }
 0x24e   : > { %1633 = vrot.lane.b32.xlu1 %v7177_v35, %s6440_s14  ;;  %v1534_v49 = vmax.f32 %v1470_v29, %v1502_v41  ;;  %v1437_v46 = vld [vmem:[#allocation2 + $0x4c] sm:$0xff]  ;;  %v1472_v54 = vmax.f32 %v1312_v57, %v1344_v60  ;;  %v1407_v11 = vld [vmem:[#allocation2 + $0x63] sm:$0xff]  ;;  %v1345_v7 = vld [vmem:[#allocation2 + $0x79] sm:$0xff] }
 0x24f   : > { %v1408_v52 = vld [vmem:[#allocation2 + $0x6b] sm:$0xff]  ;;  %v7189_v40 = vmax.f32 %v1533_v56, %v1437_v46  ;;  %v1503_v4 = vmax.f32 %v1375_v53, %v1407_v11  ;;  %v1215_v12 = vpop.permute.xlu0 %1214  ;;  %v1377_v51 = vld [vmem:[#allocation2 + $0x7a] sm:$0xff]  ;;  %v1205_v58 = vpop.permute.xlu1 %1204  ;;  %v1378_v15 = vld [vmem:[#allocation2 + $0x82] sm:$0xff]  ;;  %v1473_v19 = vmax.f32 %v1313_v5, %v1345_v7 }
 0x250   : > { %v7187_v1 = vmax.f32 %v1534_v49, %v1438_v50  ;;  %v1504_v3 = vmax.f32 %v1376_v32, %v1408_v52  ;;  %v1440_v13 = vld [vmem:[#allocation2 + $0x6c] sm:$0xff]  ;;  %1291 = vst.msk [vmem:[#allocation2 + $0xf2] sm:$0xff] %vm1270_vm6, %v1215_v12  ;;  %v1314_v48 = vld [vmem:[#allocation2 + $0x80] sm:$0xff]  ;;  %1286 = vst.msk [vmem:[#allocation2 + $0xb2] sm:$0xff] %vm1270_vm6, %v1205_v58 }
 0x251   : > { %1635 = vrot.lane.b32.xlu0 %v7189_v40, %s6440_s14  ;;  %v1535_v14 = vmax.f32 %v1471_v63, %v1503_v4  ;;  %v1346_v6 = vld [vmem:[#allocation2 + $0x81] sm:$0xff]  ;;  %v1315_v10 = vld [vmem:[#allocation2 + $0x90] sm:$0xff] }
 0x252   : > { %1637 = vrot.lane.b32.xlu1 %v7187_v1, %s6440_s14  ;;  %v1536_v9 = vmax.f32 %v1472_v54, %v1504_v3  ;;  %v1439_v2 = vld [vmem:[#allocation2 + $0x64] sm:$0xff]  ;;  %v1474_v28 = vmax.f32 %v1314_v48, %v1346_v6  ;;  %v1409_v55 = vld [vmem:[#allocation2 + $0x7b] sm:$0xff]  ;;  %v1347_v23 = vld [vmem:[#allocation2 + $0x91] sm:$0xff] }
 0x253   : > { %v1410_v16 = vld [vmem:[#allocation2 + $0x83] sm:$0xff]  ;;  %v7199_v20 = vmax.f32 %v1535_v14, %v1439_v2  ;;  %v1505_v22 = vmax.f32 %v1377_v51, %v1409_v55  ;;  %v1219_v24 = vpop.permute.xlu0 %1218  ;;  %v1379_v26 = vld [vmem:[#allocation2 + $0x92] sm:$0xff]  ;;  %v1209_v27 = vpop.permute.xlu1 %1208  ;;  %v1380_v42 = vld [vmem:[#allocation2 + $0x9a] sm:$0xff]  ;;  %v1475_v53 = vmax.f32 %v1315_v10, %v1347_v23 }
 0x254   : > { %v7197_v44 = vmax.f32 %v1536_v9, %v1440_v13  ;;  %v1506_v21 = vmax.f32 %v1378_v15, %v1410_v16  ;;  %v1442_v25 = vld [vmem:[#allocation2 + $0x84] sm:$0xff]  ;;  %1293 = vst.msk [vmem:[#allocation2 + $0x10a] sm:$0xff] %vm1270_vm6, %v1219_v24  ;;  %v1316_v34 = vld [vmem:[#allocation2 + $0x98] sm:$0xff]  ;;  %1288 = vst.msk [vmem:[#allocation2 + $0xca] sm:$0xff] %vm1270_vm6, %v1209_v27 }
 0x255   : > { %1639 = vrot.lane.b32.xlu0 %v7199_v20, %s6440_s14  ;;  %v1537_v31 = vmax.f32 %v1473_v19, %v1505_v22  ;;  %v1348_v41 = vld [vmem:[#allocation2 + $0x99] sm:$0xff]  ;;  %v1317_v60 = vld [vmem:[#allocation2 + $0xa8] sm:$0xff] }
 0x256   : > { %1641 = vrot.lane.b32.xlu1 %v7197_v44, %s6440_s14  ;;  %v1538_v29 = vmax.f32 %v1474_v28, %v1506_v21  ;;  %v1441_v43 = vld [vmem:[#allocation2 + $0x7c] sm:$0xff]  ;;  %v1476_v47 = vmax.f32 %v1316_v34, %v1348_v41  ;;  %v1411_v50 = vld [vmem:[#allocation2 + $0x93] sm:$0xff]  ;;  %v1349_v32 = vld [vmem:[#allocation2 + $0xa9] sm:$0xff] }
 0x257   : > { %v1412_v45 = vld [vmem:[#allocation2 + $0x9b] sm:$0xff]  ;;  %v7209_v49 = vmax.f32 %v1537_v31, %v1441_v43  ;;  %v1507_v57 = vmax.f32 %v1379_v26, %v1411_v50  ;;  %v1223_v46 = vpop.permute.xlu0 %1222  ;;  %v1381_v54 = vld [vmem:[#allocation2 + $0xaa] sm:$0xff]  ;;  %v1213_v11 = vpop.permute.xlu1 %1212  ;;  %v1382_v7 = vld [vmem:[#allocation2 + $0xb2] sm:$0xff]  ;;  %v1477_v9 = vmax.f32 %v1317_v60, %v1349_v32 }
 0x258   : > { %v7207_v36 = vmax.f32 %v1538_v29, %v1442_v25  ;;  %v1508_v56 = vmax.f32 %v1380_v42, %v1412_v45  ;;  %v1444_v52 = vld [vmem:[#allocation2 + $0x9c] sm:$0xff]  ;;  %1295 = vst.msk [vmem:[#allocation2 + $0x122] sm:$0xff] %vm1270_vm6, %v1223_v46  ;;  %v1318_v4 = vld [vmem:[#allocation2 + $0xb0] sm:$0xff]  ;;  %1290 = vst.msk [vmem:[#allocation2 + $0xe2] sm:$0xff] %vm1270_vm6, %v1213_v11 }
 0x259   : > { %1643 = vrot.lane.b32.xlu0 %v7209_v49, %s6440_s14  ;;  %v1539_v3 = vmax.f32 %v1475_v53, %v1507_v57  ;;  %v1350_v5 = vld [vmem:[#allocation2 + $0xb1] sm:$0xff]  ;;  %v1319_v53 = vld [vmem:[#allocation2 + $0xc0] sm:$0xff] }
 0x25a   : > { %1645 = vrot.lane.b32.xlu1 %v7207_v36, %s6440_s14  ;;  %v1540_v63 = vmax.f32 %v1476_v47, %v1508_v56  ;;  %v1443_v12 = vld [vmem:[#allocation2 + $0x94] sm:$0xff]  ;;  %v1478_v51 = vmax.f32 %v1318_v4, %v1350_v5  ;;  %v1413_v58 = vld [vmem:[#allocation2 + $0xab] sm:$0xff]  ;;  %v1351_v56 = vld [vmem:[#allocation2 + $0xc1] sm:$0xff] }
 0x25b   : > { %v1414_v13 = vld [vmem:[#allocation2 + $0xb3] sm:$0xff]  ;;  %v7219_v48 = vmax.f32 %v1539_v3, %v1443_v12  ;;  %v1509_v15 = vmax.f32 %v1381_v54, %v1413_v58  ;;  %v1227_v2 = vpop.permute.xlu0 %1226  ;;  %v1217_v16 = vpop.permute.xlu1 %1216  ;;  %v1320_v34 = vld [vmem:[#allocation2 + $0xc8] sm:$0xff] }
 0x25c   : > { %v7217_v14 = vmax.f32 %v1540_v63, %v1444_v52  ;;  %v1510_v6 = vmax.f32 %v1382_v7, %v1414_v13  ;;  %1297 = vst.msk [vmem:[#allocation2 + $0x13a] sm:$0xff] %vm1270_vm6, %v1227_v2  ;;  %1292 = vst.msk [vmem:[#allocation2 + $0xfa] sm:$0xff] %vm1270_vm6, %v1217_v16  ;;  %v1446_v19 = vld [vmem:[#allocation2 + $0xb4] sm:$0xff]  ;;  %v1445_v21 = vld [vmem:[#allocation2 + $0xac] sm:$0xff]  ;;  %v1479_v63 = vmax.f32 %v1319_v53, %v1351_v56 }
 0x25d   : > { %1647 = vrot.lane.b32.xlu0 %v7219_v48, %s6440_s14  ;;  %v1541_v55 = vmax.f32 %v1477_v9, %v1509_v15  ;;  %v1352_v41 = vld [vmem:[#allocation2 + $0xc9] sm:$0xff]  ;;  %v1321_v3 = vld [vmem:[#allocation2 + $0xd8] sm:$0xff] }
 0x25e   : > { %1649 = vrot.lane.b32.xlu1 %v7217_v14, %s6440_s14  ;;  %v1542_v28 = vmax.f32 %v1478_v51, %v1510_v6  ;;  %v1384_v42 = vld [vmem:[#allocation2 + $0xca] sm:$0xff]  ;;  %v1480_v47 = vmax.f32 %v1320_v34, %v1352_v41  ;;  %v1383_v57 = vld [vmem:[#allocation2 + $0xc2] sm:$0xff]  ;;  %v1353_v4 = vld [vmem:[#allocation2 + $0xd9] sm:$0xff] }
 0x25f   : > { %v7229_v10 = vmax.f32 %v1541_v55, %v1445_v21  ;;  %v1231_v23 = vpop.permute.xlu0 %1230  ;;  %v1221_v24 = vpop.permute.xlu1 %1220  ;;  %v1416_v43 = vld [vmem:[#allocation2 + $0xcb] sm:$0xff]  ;;  %v1415_v45 = vld [vmem:[#allocation2 + $0xc3] sm:$0xff]  ;;  %v1417_v11 = vld [vmem:[#allocation2 + $0xdb] sm:$0xff] }
 0x260   : > { %v7227_v22 = vmax.f32 %v1542_v28, %v1446_v19  ;;  %1299 = vst.msk [vmem:[#allocation2 + $0x152] sm:$0xff] %vm1270_vm6, %v1231_v23  ;;  %1294 = vst.msk [vmem:[#allocation2 + $0x112] sm:$0xff] %vm1270_vm6, %v1221_v24  ;;  %v1512_v50 = vmax.f32 %v1384_v42, %v1416_v43  ;;  %v1511_v60 = vmax.f32 %v1383_v57, %v1415_v45  ;;  %v1322_v32 = vld [vmem:[#allocation2 + $0xe0] sm:$0xff]  ;;  %v1323_v55 = vld [vmem:[#allocation2 + $0xf0] sm:$0xff] }
 0x261   : > { %1651 = vrot.lane.b32.xlu0 %v7229_v10, %s6440_s14  ;;  %v1354_v46 = vld [vmem:[#allocation2 + $0xe1] sm:$0xff]  ;;  %v1481_v28 = vmax.f32 %v1321_v3, %v1353_v4  ;;  %v1355_v19 = vld [vmem:[#allocation2 + $0xf1] sm:$0xff]  ;;  %v1357_v57 = vld [vmem:[#allocation2 + $0x109] sm:$0xff] }
 0x262   : > { %1653 = vrot.lane.b32.xlu1 %v7227_v22, %s6440_s14  ;;  %v1386_v52 = vld [vmem:[#allocation2 + $0xe2] sm:$0xff]  ;;  %v1544_v5 = vmax.f32 %v1480_v47, %v1512_v50  ;;  %v1385_v7 = vld [vmem:[#allocation2 + $0xda] sm:$0xff]  ;;  %v1543_v51 = vmax.f32 %v1479_v63, %v1511_v60  ;;  %v1482_v58 = vmax.f32 %v1322_v32, %v1354_v46  ;;  %v1387_v21 = vld [vmem:[#allocation2 + $0xf2] sm:$0xff]  ;;  %v1483_v50 = vmax.f32 %v1323_v55, %v1355_v19 }
 0x263   : > { %v1235_v25 = vpop.permute.xlu0 %1234  ;;  %v1225_v26 = vpop.permute.xlu1 %1224  ;;  %v1418_v54 = vld [vmem:[#allocation2 + $0xe3] sm:$0xff]  ;;  %v1324_v12 = vld [vmem:[#allocation2 + $0xf8] sm:$0xff]  ;;  %v1513_v6 = vmax.f32 %v1385_v7, %v1417_v11  ;;  %v1448_v23 = vld [vmem:[#allocation2 + $0xcc] sm:$0xff] }
 0x264   : > { %1301 = vst.msk [vmem:[#allocation2 + $0x16a] sm:$0xff] %vm1270_vm6, %v1235_v25  ;;  %1296 = vst.msk [vmem:[#allocation2 + $0x12a] sm:$0xff] %vm1270_vm6, %v1225_v26  ;;  %v1356_v13 = vld [vmem:[#allocation2 + $0xf9] sm:$0xff]  ;;  %v1514_v9 = vmax.f32 %v1386_v52, %v1418_v54  ;;  %v1447_v24 = vld [vmem:[#allocation2 + $0xc4] sm:$0xff] }
 0x265   : > { %1911 = vrot.lane.b32.xlu0 %v7159_v62, %s6441_s29  ;;  %v1388_v15 = vld [vmem:[#allocation2 + $0xfa] sm:$0xff]  ;;  %v1484_v25 = vmax.f32 %v1324_v12, %v1356_v13  ;;  %v7276_v34 = vmax.f32 %v1543_v51, %v1447_v24  ;;  %v1545_v42 = vmax.f32 %v1481_v28, %v1513_v6  ;;  %v1325_v56 = vld [vmem:[#allocation2 + $0x108] sm:$0xff] }
 0x266   : > { %1913 = vrot.lane.b32.xlu1 %v7157_v61, %s6441_s29  ;;  %v1420_v2 = vld [vmem:[#allocation2 + $0xfb] sm:$0xff]  ;;  %v1419_v16 = vld [vmem:[#allocation2 + $0xf3] sm:$0xff]  ;;  %v1546_v41 = vmax.f32 %v1482_v58, %v1514_v9  ;;  %v1450_v60 = vld [vmem:[#allocation2 + $0xe4] sm:$0xff] }
 0x267   : > { %v1229_v27 = vpop.permute.xlu1 %1228  ;;  %v1516_v26 = vmax.f32 %v1388_v15, %v1420_v2  ;;  %v1358_v43 = vld [vmem:[#allocation2 + $0x111] sm:$0xff]  ;;  %v1449_v32 = vld [vmem:[#allocation2 + $0xdc] sm:$0xff]  ;;  %v1485_v2 = vmax.f32 %v1325_v56, %v1357_v57 }
 0x268   : > { %1298 = vst.msk [vmem:[#allocation2 + $0x142] sm:$0xff] %vm1270_vm6, %v1229_v27  ;;  %v1515_v27 = vmax.f32 %v1387_v21, %v1419_v16  ;;  %v1390_v45 = vld [vmem:[#allocation2 + $0x112] sm:$0xff]  ;;  %v1389_v63 = vld [vmem:[#allocation2 + $0x10a] sm:$0xff]  ;;  %v7282_v3 = vmax.f32 %v1546_v41, %v1450_v60  ;;  %v7284_v4 = vmax.f32 %v1545_v42, %v1449_v32  ;;  %v1327_v58 = vld [vmem:[#allocation2 + $0x120] sm:$0xff] }
 0x269   : > { %1915 = vrot.lane.b32.xlu0 %v7169_v18, %s6441_s29  ;;  %v1422_v47 = vld [vmem:[#allocation2 + $0x113] sm:$0xff]  ;;  %v1421_v53 = vld [vmem:[#allocation2 + $0x10b] sm:$0xff]  ;;  %v1548_v46 = vmax.f32 %v1484_v25, %v1516_v26  ;;  %v1452_v6 = vld [vmem:[#allocation2 + $0xfc] sm:$0xff] }
 0x26a   : > { %1917 = vrot.lane.b32.xlu1 %v7167_v17, %s6441_s29  ;;  %v1547_v52 = vmax.f32 %v1483_v50, %v1515_v27  ;;  %v1518_v11 = vmax.f32 %v1390_v45, %v1422_v47  ;;  %v1451_v15 = vld [vmem:[#allocation2 + $0xf4] sm:$0xff]  ;;  %v1359_v16 = vld [vmem:[#allocation2 + $0x121] sm:$0xff]  ;;  %v1453_v57 = vld [vmem:[#allocation2 + $0x10c] sm:$0xff] }
 0x26b   : > { %v1233_v29 = vpop.permute.xlu1 %1232  ;;  %v1328_v7 = vld [vmem:[#allocation2 + $0x128] sm:$0xff]  ;;  %v7290_v28 = vmax.f32 %v1548_v46, %v1452_v6  ;;  %v1487_v45 = vmax.f32 %v1327_v58, %v1359_v16  ;;  %v1329_v47 = vld [vmem:[#allocation2 + $0x138] sm:$0xff] }
 0x26c   : > { %1300 = vst.msk [vmem:[#allocation2 + $0x15a] sm:$0xff] %vm1270_vm6, %v1233_v29  ;;  %v1326_v29 = vld [vmem:[#allocation2 + $0x110] sm:$0xff]  ;;  %v1423_v9 = vld [vmem:[#allocation2 + $0x123] sm:$0xff]  ;;  %v7292_v55 = vmax.f32 %v1547_v52, %v1451_v15  ;;  %v1361_v50 = vld [vmem:[#allocation2 + $0x139] sm:$0xff] }
 0x26d   : > { %1919 = vrot.lane.b32.xlu0 %v7179_v38, %s6441_s29  ;;  %v1486_v54 = vmax.f32 %v1326_v29, %v1358_v43  ;;  %v1360_v12 = vld [vmem:[#allocation2 + $0x129] sm:$0xff]  ;;  %v1454_v56 = vld [vmem:[#allocation2 + $0x114] sm:$0xff] }
 0x26e   : > { %1921 = vrot.lane.b32.xlu1 %v7177_v35, %s6441_s29  ;;  %v1392_v13 = vld [vmem:[#allocation2 + $0x12a] sm:$0xff]  ;;  %v1391_v21 = vld [vmem:[#allocation2 + $0x122] sm:$0xff]  ;;  %v1488_v26 = vmax.f32 %v1328_v7, %v1360_v12 }
 0x26f   : > { %v1237_v31 = vpop.permute.xlu1 %1236  ;;  %v1424_v51 = vld [vmem:[#allocation2 + $0x12b] sm:$0xff]  ;;  %v1550_v19 = vmax.f32 %v1486_v54, %v1518_v11  ;;  %v1362_v24 = vld [vmem:[#allocation2 + $0x141] sm:$0xff]  ;;  %v1519_v29 = vmax.f32 %v1391_v21, %v1423_v9 }
 0x270   : > { %1302 = vst.msk [vmem:[#allocation2 + $0x172] sm:$0xff] %vm1270_vm6, %v1237_v31  ;;  %v7274_v31 = vmax.f32 %v1544_v5, %v1448_v23  ;;  %v1517_v5 = vmax.f32 %v1389_v63, %v1421_v53  ;;  %v1330_v23 = vld [vmem:[#allocation2 + $0x140] sm:$0xff]  ;;  %v1520_v27 = vmax.f32 %v1392_v13, %v1424_v51  ;;  %v1489_v51 = vmax.f32 %v1329_v47, %v1361_v50  ;;  %v1331_v9 = vld [vmem:[#allocation2 + $0x150] sm:$0xff] }
 0x271   : > { %1923 = vrot.lane.b32.xlu0 %v7189_v40, %s6441_s29  ;;  %v1394_v41 = vld [vmem:[#allocation2 + $0x142] sm:$0xff]  ;;  %v1393_v53 = vld [vmem:[#allocation2 + $0x13a] sm:$0xff]  ;;  %v1490_v60 = vmax.f32 %v1330_v23, %v1362_v24  ;;  %v7298_v54 = vmax.f32 %v1550_v19, %v1454_v56  ;;  %v1363_v6 = vld [vmem:[#allocation2 + $0x151] sm:$0xff] }
 0x272   : > { %1925 = vrot.lane.b32.xlu1 %v7187_v1, %s6441_s29  ;;  %v1549_v25 = vmax.f32 %v1485_v2, %v1517_v5  ;;  %v1426_v42 = vld [vmem:[#allocation2 + $0x143] sm:$0xff]  ;;  %v1425_v43 = vld [vmem:[#allocation2 + $0x13b] sm:$0xff]  ;;  %v1552_v63 = vmax.f32 %v1488_v26, %v1520_v27  ;;  %v1551_v5 = vmax.f32 %v1487_v45, %v1519_v29  ;;  %v1456_v15 = vld [vmem:[#allocation2 + $0x12c] sm:$0xff] }
 0x273   : > { %v1522_v32 = vmax.f32 %v1394_v41, %v1426_v42  ;;  %v1521_v46 = vmax.f32 %v1393_v53, %v1425_v43  ;;  %v1332_v52 = vld [vmem:[#allocation2 + $0x158] sm:$0xff]  ;;  %v1455_v2 = vld [vmem:[#allocation2 + $0x124] sm:$0xff]  ;;  %v1491_v53 = vmax.f32 %v1331_v9, %v1363_v6 }
 0x274   : > { %v7300_v11 = vmax.f32 %v1549_v25, %v1453_v57  ;;  %v1364_v7 = vld [vmem:[#allocation2 + $0x159] sm:$0xff]  ;;  %v7306_v25 = vmax.f32 %v1552_v63, %v1456_v15  ;;  %v7308_v26 = vmax.f32 %v1551_v5, %v1455_v2  ;;  %v1458_v47 = vld [vmem:[#allocation2 + $0x144] sm:$0xff] }
 0x275   : > { %1927 = vrot.lane.b32.xlu0 %v7199_v20, %s6441_s29  ;;  %v1396_v12 = vld [vmem:[#allocation2 + $0x15a] sm:$0xff]  ;;  %v1554_v16 = vmax.f32 %v1490_v60, %v1522_v32  ;;  %v1553_v19 = vmax.f32 %v1489_v51, %v1521_v46  ;;  %v1492_v21 = vmax.f32 %v1332_v52, %v1364_v7  ;;  %v1395_v24 = vld [vmem:[#allocation2 + $0x152] sm:$0xff]  ;;  %v1333_v32 = vld [vmem:[#allocation2 + $0x168] sm:$0xff] }
 0x276   : > { %1929 = vrot.lane.b32.xlu1 %v7197_v44, %s6441_s29  ;;  %v1428_v13 = vld [vmem:[#allocation2 + $0x15b] sm:$0xff]  ;;  %v1427_v58 = vld [vmem:[#allocation2 + $0x153] sm:$0xff]  ;;  %v1365_v46 = vld [vmem:[#allocation2 + $0x169] sm:$0xff] }
 0x277   : > { %v1524_v23 = vmax.f32 %v1396_v12, %v1428_v13  ;;  %v1523_v27 = vmax.f32 %v1395_v24, %v1427_v58  ;;  %v1334_v29 = vld [vmem:[#allocation2 + $0x170] sm:$0xff]  ;;  %v1457_v50 = vld [vmem:[#allocation2 + $0x13c] sm:$0xff]  ;;  %v7314_v56 = vmax.f32 %v1554_v16, %v1458_v47  ;;  %v1493_v13 = vmax.f32 %v1333_v32, %v1365_v46 }
 0x278   : > { %v1366_v41 = vld [vmem:[#allocation2 + $0x171] sm:$0xff]  ;;  %v7316_v57 = vmax.f32 %v1553_v19, %v1457_v50  ;;  %v1460_v51 = vld [vmem:[#allocation2 + $0x15c] sm:$0xff] }
 0x279   : > { %1931 = vrot.lane.b32.xlu0 %v7209_v49, %s6441_s29  ;;  %v1398_v42 = vld [vmem:[#allocation2 + $0x172] sm:$0xff]  ;;  %v1556_v60 = vmax.f32 %v1492_v21, %v1524_v23  ;;  %v1397_v52 = vld [vmem:[#allocation2 + $0x16a] sm:$0xff]  ;;  %v1555_v63 = vmax.f32 %v1491_v53, %v1523_v27  ;;  %v1494_v5 = vmax.f32 %v1334_v29, %v1366_v41 }
 0x27a   : > { %1933 = vrot.lane.b32.xlu1 %v7207_v36, %s6441_s29  ;;  %v1430_v43 = vld [vmem:[#allocation2 + $0x173] sm:$0xff]  ;;  %v1429_v45 = vld [vmem:[#allocation2 + $0x16b] sm:$0xff] }
 0x27b   : > { %v1526_v7 = vmax.f32 %v1398_v42, %v1430_v43  ;;  %v1525_v12 = vmax.f32 %v1397_v52, %v1429_v45  ;;  %v1459_v58 = vld [vmem:[#allocation2 + $0x154] sm:$0xff]  ;;  %v7322_v9 = vmax.f32 %v1556_v60, %v1460_v51  ;;  %v1461_v19 = vld [vmem:[#allocation2 + $0x16c] sm:$0xff] }
 0x27c   : > { %v7324_v6 = vmax.f32 %v1555_v63, %v1459_v58  ;;  %v1462_v16 = vld [vmem:[#allocation2 + $0x174] sm:$0xff] }
 0x27d   : > { %1935 = vrot.lane.b32.xlu0 %v7219_v48, %s6441_s29  ;;  %v1558_v15 = vmax.f32 %v1494_v5, %v1526_v7  ;;  %v1557_v2 = vmax.f32 %v1493_v13, %v1525_v12 }
 0x27e   : > { %1937 = vrot.lane.b32.xlu1 %v7217_v14, %s6441_s29 }
 0x27f   : > { %v7330_v21 = vmax.f32 %v1558_v15, %v1462_v16  ;;  %v7332_v23 = vmax.f32 %v1557_v2, %v1461_v19 }
 0x281   : > { %1939 = vrot.lane.b32.xlu0 %v7229_v10, %s6441_s29 }
 0x282   : > { %1941 = vrot.lane.b32.xlu1 %v7227_v22, %s6441_s29 }
 0x285   : > { %1655 = vrot.lane.b32.xlu0 %v7276_v34, %s6440_s14 }
 0x286   : > { %1657 = vrot.lane.b32.xlu1 %v7274_v31, %s6440_s14 }
 0x289   : > { %1659 = vrot.lane.b32.xlu0 %v7284_v4, %s6440_s14 }
 0x28a   : > { %1661 = vrot.lane.b32.xlu1 %v7282_v3, %s6440_s14 }
 0x28d   : > { %1663 = vrot.lane.b32.xlu0 %v7292_v55, %s6440_s14 }
 0x28e   : > { %1665 = vrot.lane.b32.xlu1 %v7290_v28, %s6440_s14 }
 0x291   : > { %1667 = vrot.lane.b32.xlu0 %v7300_v11, %s6440_s14 }
 0x292   : > { %1669 = vrot.lane.b32.xlu1 %v7298_v54, %s6440_s14 }
 0x295   : > { %1671 = vrot.lane.b32.xlu0 %v7308_v26, %s6440_s14 }
 0x296   : > { %1673 = vrot.lane.b32.xlu1 %v7306_v25, %s6440_s14 }
 0x299   : > { %1675 = vrot.lane.b32.xlu0 %v7316_v57, %s6440_s14 }
 0x29a   : > { %1677 = vrot.lane.b32.xlu1 %v7314_v56, %s6440_s14 }
 0x29d   : > { %1679 = vrot.lane.b32.xlu0 %v7324_v6, %s6440_s14 }
 0x29e   : > { %1681 = vrot.lane.b32.xlu1 %v7322_v9, %s6440_s14 }
 0x2a1   : > { %1683 = vrot.lane.b32.xlu0 %v7332_v23, %s6440_s14 }
 0x2a2   : > { %1685 = vrot.lane.b32.xlu1 %v7330_v21, %s6440_s14 }
 0x2a5   : > { %1943 = vrot.lane.b32.xlu0 %v7276_v34, %s6441_s29 }
 0x2a6   : > { %1945 = vrot.lane.b32.xlu1 %v7274_v31, %s6441_s29 }
 0x2a9   : > { %1947 = vrot.lane.b32.xlu0 %v7284_v4, %s6441_s29 }
 0x2aa   : > { %1949 = vrot.lane.b32.xlu1 %v7282_v3, %s6441_s29 }
 0x2ad   : > { %1951 = vrot.lane.b32.xlu0 %v7292_v55, %s6441_s29 }
 0x2ae   : > { %1953 = vrot.lane.b32.xlu1 %v7290_v28, %s6441_s29 }
 0x2b1   : > { %1955 = vrot.lane.b32.xlu0 %v7300_v11, %s6441_s29 }
 0x2b2   : > { %1957 = vrot.lane.b32.xlu1 %v7298_v54, %s6441_s29 }
 0x2b5   : > { %1959 = vrot.lane.b32.xlu0 %v7308_v26, %s6441_s29 }
 0x2b6   : > { %1961 = vrot.lane.b32.xlu1 %v7306_v25, %s6441_s29 }
 0x2b7   : > { %v1626_v24 = vpop.permute.xlu1 %1625  ;;  %v1624_v27 = vpop.permute.xlu0 %1623 }
 0x2b8   : > { %v7371_v45 = vmax.f32 %v7157_v61, %v1626_v24  ;;  %v7374_v47 = vmax.f32 %v7159_v62, %v1624_v27 }
 0x2b9   : > { %1963 = vrot.lane.b32.xlu0 %v7316_v57, %s6441_s29 }
 0x2ba   : > { %1965 = vrot.lane.b32.xlu1 %v7314_v56, %s6441_s29 }
 0x2bb   : > { %v1628_v41 = vpop.permute.xlu0 %1627 }
 0x2bc   : > { %v1630_v29 = vpop.permute.xlu1 %1629  ;;  %v7384_v32 = vmax.f32 %v7169_v18, %v1628_v41 }
 0x2bd   : > { %1967 = vrot.lane.b32.xlu0 %v7324_v6, %s6441_s29  ;;  %v7381_v60 = vmax.f32 %v7167_v17, %v1630_v29 }
 0x2be   : > { %1969 = vrot.lane.b32.xlu1 %v7322_v9, %s6441_s29 }
 0x2bf   : > { %v1632_v43 = vpop.permute.xlu0 %1631 }
 0x2c0   : > { %v1634_v42 = vpop.permute.xlu1 %1633  ;;  %v7394_v52 = vmax.f32 %v7179_v38, %v1632_v43 }
 0x2c1   : > { %1971 = vrot.lane.b32.xlu0 %v7332_v23, %s6441_s29  ;;  %v7391_v62 = vmax.f32 %v7177_v35, %v1634_v42 }
 0x2c2   : > { %1973 = vrot.lane.b32.xlu1 %v7330_v21, %s6441_s29 }
 0x2c3   : > { %v1636_v53 = vpop.permute.xlu0 %1635 }
 0x2c4   : > { %v1638_v50 = vpop.permute.xlu1 %1637  ;;  %v7404_v5 = vmax.f32 %v7189_v40, %v1636_v53 }
 0x2c5   : > { %1783 = vrot.lane.b32.xlu0 %v7374_v47, %s6442_s15  ;;  %v7401_v18 = vmax.f32 %v7187_v1, %v1638_v50 }
 0x2c6   : > { %1785 = vrot.lane.b32.xlu1 %v7371_v45, %s6442_s15 }
 0x2c7   : > { %v1640_v46 = vpop.permute.xlu0 %1639 }
 0x2c8   : > { %v1642_v61 = vpop.permute.xlu1 %1641  ;;  %v7414_v12 = vmax.f32 %v7199_v20, %v1640_v46 }
 0x2c9   : > { %1787 = vrot.lane.b32.xlu0 %v7384_v32, %s6442_s15  ;;  %v7411_v38 = vmax.f32 %v7197_v44, %v1642_v61 }
 0x2ca   : > { %1789 = vrot.lane.b32.xlu1 %v7381_v60, %s6442_s15 }
 0x2cb   : > { %v1644_v17 = vpop.permute.xlu0 %1643 }
 0x2cc   : > { %v1646_v63 = vpop.permute.xlu1 %1645  ;;  %v7424_v51 = vmax.f32 %v7209_v49, %v1644_v17 }
 0x2cd   : > { %1791 = vrot.lane.b32.xlu0 %v7394_v52, %s6442_s15  ;;  %v7421_v40 = vmax.f32 %v7207_v36, %v1646_v63 }
 0x2ce   : > { %1793 = vrot.lane.b32.xlu1 %v7391_v62, %s6442_s15 }
 0x2cf   : > { %v1648_v35 = vpop.permute.xlu0 %1647 }
 0x2d0   : > { %v1650_v7 = vpop.permute.xlu1 %1649  ;;  %v7438_v15 = vmax.f32 %v7219_v48, %v1648_v35 }
 0x2d1   : > { %1795 = vrot.lane.b32.xlu0 %v7404_v5, %s6442_s15  ;;  %v7435_v20 = vmax.f32 %v7217_v14, %v1650_v7 }
 0x2d2   : > { %1797 = vrot.lane.b32.xlu1 %v7401_v18, %s6442_s15 }
 0x2d3   : > { %v1652_v1 = vpop.permute.xlu0 %1651 }
 0x2d4   : > { %v1654_v13 = vpop.permute.xlu1 %1653  ;;  %v7452_v16 = vmax.f32 %v7229_v10, %v1652_v1 }
 0x2d5   : > { %1799 = vrot.lane.b32.xlu0 %v7414_v12, %s6442_s15  ;;  %v7449_v2 = vmax.f32 %v7227_v22, %v1654_v13 }
 0x2d6   : > { %1801 = vrot.lane.b32.xlu1 %v7411_v38, %s6442_s15 }
 0x2d7   : > { %v7428_v44 = vpop.permute.xlu0 %1911 }
 0x2d8   : > { %v7426_v58 = vpop.permute.xlu1 %1913 }
 0x2d9   : > { %1803 = vrot.lane.b32.xlu0 %v7424_v51, %s6442_s15 }
 0x2da   : > { %1805 = vrot.lane.b32.xlu1 %v7421_v40, %s6442_s15 }
 0x2db   : > { %v7442_v49 = vpop.permute.xlu0 %1915 }
 0x2dc   : > { %v7440_v36 = vpop.permute.xlu1 %1917 }
 0x2dd   : > { %1807 = vrot.lane.b32.xlu0 %v7438_v15, %s6442_s15 }
 0x2de   : > { %1809 = vrot.lane.b32.xlu1 %v7435_v20, %s6442_s15 }
 0x2df   : > { %v7456_v48 = vpop.permute.xlu0 %1919 }
 0x2e0   : > { %v7454_v14 = vpop.permute.xlu1 %1921 }
 0x2e1   : > { %1811 = vrot.lane.b32.xlu0 %v7452_v16, %s6442_s15 }
 0x2e2   : > { %1813 = vrot.lane.b32.xlu1 %v7449_v2, %s6442_s15 }
 0x2e3   : > { %v7464_v24 = vpop.permute.xlu0 %1923 }
 0x2e4   : > { %v7462_v19 = vpop.permute.xlu1 %1925 }
 0x2e7   : > { %v7468_v22 = vpop.permute.xlu0 %1927 }
 0x2e8   : > { %v7466_v27 = vpop.permute.xlu1 %1929 }
 0x2eb   : > { %v7472_v29 = vpop.permute.xlu0 %1931 }
 0x2ec   : > { %v7470_v10 = vpop.permute.xlu1 %1933 }
 0x2ef   : > { %v7476_v42 = vpop.permute.xlu0 %1935 }
 0x2f0   : > { %v7474_v41 = vpop.permute.xlu1 %1937 }
 0x2f3   : > { %v7480_v50 = vpop.permute.xlu0 %1939 }
 0x2f4   : > { %v7478_v43 = vpop.permute.xlu1 %1941 }
 0x2f7   : > { %v1656_v61 = vpop.permute.xlu0 %1655 }
 0x2f8   : > { %v1658_v53 = vpop.permute.xlu1 %1657  ;;  %v7486_v63 = vmax.f32 %v7276_v34, %v1656_v61 }
 0x2f9   : > { %v7483_v46 = vmax.f32 %v7274_v31, %v1658_v53 }
 0x2fa   : > { %1815 = vrot.lane.b32.xlu0 %v7486_v63, %s6442_s15 }
 0x2fb   : > { %1817 = vrot.lane.b32.xlu1 %v7483_v46, %s6442_s15  ;;  %v1660_v7 = vpop.permute.xlu0 %1659 }
 0x2fc   : > { %v1662_v17 = vpop.permute.xlu1 %1661  ;;  %v7496_v13 = vmax.f32 %v7284_v4, %v1660_v7 }
 0x2fd   : > { %v7493_v35 = vmax.f32 %v7282_v3, %v1662_v17 }
 0x2fe   : > { %1819 = vrot.lane.b32.xlu0 %v7496_v13, %s6442_s15 }
 0x2ff   : > { %1821 = vrot.lane.b32.xlu1 %v7493_v35, %s6442_s15  ;;  %v1664_v34 = vpop.permute.xlu0 %1663 }
 0x300   : > { %v1666_v31 = vpop.permute.xlu1 %1665  ;;  %v7506_v53 = vmax.f32 %v7292_v55, %v1664_v34 }
 0x301   : > { %v7503_v1 = vmax.f32 %v7290_v28, %v1666_v31 }
 0x302   : > { %1823 = vrot.lane.b32.xlu0 %v7506_v53, %s6442_s15 }
 0x303   : > { %1825 = vrot.lane.b32.xlu1 %v7503_v1, %s6442_s15  ;;  %v1668_v4 = vpop.permute.xlu0 %1667 }
 0x304   : > { %v1670_v3 = vpop.permute.xlu1 %1669  ;;  %v7516_v17 = vmax.f32 %v7300_v11, %v1668_v4 }
 0x305   : > { %v7513_v61 = vmax.f32 %v7298_v54, %v1670_v3 }
 0x306   : > { %1827 = vrot.lane.b32.xlu0 %v7516_v17, %s6442_s15 }
 0x307   : > { %1829 = vrot.lane.b32.xlu1 %v7513_v61, %s6442_s15  ;;  %v1672_v55 = vpop.permute.xlu0 %1671 }
 0x308   : > { %v1674_v28 = vpop.permute.xlu1 %1673  ;;  %v7526_v31 = vmax.f32 %v7308_v26, %v1672_v55 }
 0x309   : > { %v7523_v7 = vmax.f32 %v7306_v25, %v1674_v28 }
 0x30a   : > { %1831 = vrot.lane.b32.xlu0 %v7526_v31, %s6442_s15 }
 0x30b   : > { %1833 = vrot.lane.b32.xlu1 %v7523_v7, %s6442_s15  ;;  %v1676_v11 = vpop.permute.xlu0 %1675 }
 0x30c   : > { %v1678_v54 = vpop.permute.xlu1 %1677  ;;  %v7536_v3 = vmax.f32 %v7316_v57, %v1676_v11 }
 0x30d   : > { %v7533_v34 = vmax.f32 %v7314_v56, %v1678_v54 }
 0x30e   : > { %10098 = vst [vmem:[#allocation14_spill] sm:$0xff] %v7536_v3  ;;  %1835 = vrot.lane.b32.xlu0 %v7536_v3, %s6442_s15 }
 0x30f   : > { %10097 = vst [vmem:[#allocation13_spill] sm:$0xff] %v7533_v34  ;;  %1837 = vrot.lane.b32.xlu1 %v7533_v34, %s6442_s15  ;;  %v1680_v26 = vpop.permute.xlu0 %1679 }
 0x310   : > { %v1682_v25 = vpop.permute.xlu1 %1681  ;;  %v7546_v28 = vmax.f32 %v7324_v6, %v1680_v26 }
 0x311   : > { %v7543_v4 = vmax.f32 %v7322_v9, %v1682_v25 }
 0x312   : > { %10100 = vst [vmem:[#allocation16_spill] sm:$0xff] %v7546_v28  ;;  %1839 = vrot.lane.b32.xlu0 %v7546_v28, %s6442_s15 }
 0x313   : > { %10099 = vst [vmem:[#allocation15_spill] sm:$0xff] %v7543_v4  ;;  %1841 = vrot.lane.b32.xlu1 %v7543_v4, %s6442_s15  ;;  %v1684_v57 = vpop.permute.xlu0 %1683 }
 0x314   : > { %v1686_v56 = vpop.permute.xlu1 %1685  ;;  %v7556_v54 = vmax.f32 %v7332_v23, %v1684_v57 }
 0x315   : > { %v7553_v55 = vmax.f32 %v7330_v21, %v1686_v56 }
 0x316   : > { %10102 = vst [vmem:[#allocation18_spill] sm:$0xff] %v7556_v54  ;;  %1843 = vrot.lane.b32.xlu0 %v7556_v54, %s6442_s15 }
 0x317   : > { %10101 = vst [vmem:[#allocation17_spill] sm:$0xff] %v7553_v55  ;;  %1845 = vrot.lane.b32.xlu1 %v7553_v55, %s6442_s15  ;;  %v7564_v6 = vpop.permute.xlu0 %1943 }
 0x318   : > { %v7562_v9 = vpop.permute.xlu1 %1945 }
 0x31b   : > { %v7568_v25 = vpop.permute.xlu0 %1947 }
 0x31c   : > { %v7566_v11 = vpop.permute.xlu1 %1949 }
 0x31f   : > { %v7572_v21 = vpop.permute.xlu0 %1951 }
 0x320   : > { %v7570_v26 = vpop.permute.xlu1 %1953 }
 0x323   : > { %v7576_v56 = vpop.permute.xlu0 %1955 }
 0x324   : > { %v7574_v23 = vpop.permute.xlu1 %1957 }
 0x327   : > { %v7580_v0 = vpop.permute.xlu0 %1959 }
 0x328   : > { %v7578_v57 = vpop.permute.xlu1 %1961  ;;  %10104 = vst [vmem:[#allocation20_spill] sm:$0xff] %v7580_v0 }
 0x329   : > { %10103 = vst [vmem:[#allocation19_spill] sm:$0xff] %v7578_v57 }
 0x32b   : > { %v7584_v33 = vpop.permute.xlu0 %1963 }
 0x32c   : > { %v7582_v30 = vpop.permute.xlu1 %1965  ;;  %10106 = vst [vmem:[#allocation22_spill] sm:$0xff] %v7584_v33 }
 0x32d   : > { %10105 = vst [vmem:[#allocation21_spill] sm:$0xff] %v7582_v30 }
 0x32f   : > { %v7588_v39 = vpop.permute.xlu0 %1967 }
 0x330   : > { %v7586_v37 = vpop.permute.xlu1 %1969  ;;  %10108 = vst [vmem:[#allocation24_spill] sm:$0xff] %v7588_v39 }
 0x331   : > { %10107 = vst [vmem:[#allocation23_spill] sm:$0xff] %v7586_v37 }
 0x333   : > { %v7592_v55 = vpop.permute.xlu0 %1971 }
 0x334   : > { %v7590_v54 = vpop.permute.xlu1 %1973  ;;  %10109 = vst [vmem:[#allocation25_spill] sm:$0xff] %v7592_v55 }
 0x337   : > { %v1784_v4 = vpop.permute.xlu0 %1783 }
 0x338   : > { %v1786_v28 = vpop.permute.xlu1 %1785  ;;  %v1879_v34 = vmax.f32 %v7374_v47, %v1784_v4 }
 0x339   : > { %v1880_v3 = vmax.f32 %v7371_v45, %v1786_v28 }
 0x33a   : > { %v2007_v30 = vmax.f32 %v1879_v34, %v7428_v44 }
 0x33b   : > { %v2008_v0 = vmax.f32 %v1880_v3, %v7426_v58  ;;  %v1788_v33 = vpop.permute.xlu0 %1787 }
 0x33c   : > { %v1790_v57 = vpop.permute.xlu1 %1789  ;;  %v1881_v39 = vmax.f32 %v7384_v32, %v1788_v33  ;;  %2761 = vrot.lane.b32.xlu0 %v2007_v30, %s6439_s12 }
 0x33d   : > { %v1882_v37 = vmax.f32 %v7381_v60, %v1790_v57  ;;  %2763 = vrot.lane.b32.xlu1 %v2008_v0, %s6439_s12 }
 0x33e   : > { %v2009_v45 = vmax.f32 %v1881_v39, %v7442_v49 }
 0x33f   : > { %v2010_v55 = vmax.f32 %v1882_v37, %v7440_v36  ;;  %v1792_v47 = vpop.permute.xlu0 %1791 }
 0x340   : > { %v1794_v28 = vpop.permute.xlu1 %1793  ;;  %v1883_v44 = vmax.f32 %v7394_v52, %v1792_v47  ;;  %2765 = vrot.lane.b32.xlu0 %v2009_v45, %s6439_s12 }
 0x341   : > { %v1884_v58 = vmax.f32 %v7391_v62, %v1794_v28  ;;  %2767 = vrot.lane.b32.xlu1 %v2010_v55, %s6439_s12 }
 0x342   : > { %v2011_v60 = vmax.f32 %v1883_v44, %v7456_v48 }
 0x343   : > { %v2012_v33 = vmax.f32 %v1884_v58, %v7454_v14  ;;  %v1796_v34 = vpop.permute.xlu0 %1795 }
 0x344   : > { %v1798_v32 = vpop.permute.xlu1 %1797  ;;  %v2039_v36 = vcombine.low %v2007_v30, %v2011_v60  ;;  %v2040_v39 = vcombine.high %v2007_v30, %v2011_v60  ;;  %v1885_v52 = vmax.f32 %v7404_v5, %v1796_v34  ;;  %2769 = vrot.lane.b32.xlu0 %v2011_v60, %s6439_s12 }
 0x345   : > { %v2311_v3 = vcombine.low %v2008_v0, %v2012_v33  ;;  %v2312_v37 = vcombine.high %v2008_v0, %v2012_v33  ;;  %2771 = vrot.lane.b32.xlu1 %v2012_v33, %s6439_s12  ;;  %v1886_v62 = vmax.f32 %v7401_v18, %v1798_v32 }
 0x346   : > { %v2013_v14 = vmax.f32 %v1885_v52, %v7464_v24  ;;  %v7623_v5 = vrot.slane %v2039_v36, %v6864_v59 }
 0x347   : > { %v2014_v49 = vmax.f32 %v1886_v62, %v7462_v19  ;;  %v1800_v48 = vpop.permute.xlu0 %1799  ;;  %v7620_v18 = vrot.slane %v2311_v3, %v6864_v59 }
 0x348   : > { %v1802_v4 = vpop.permute.xlu1 %1801  ;;  %v1887_v0 = vmax.f32 %v7414_v12, %v1800_v48  ;;  %v2055_v47 = vcombine.low %v2009_v45, %v2013_v14  ;;  %v2056_v58 = vcombine.high %v2009_v45, %v2013_v14  ;;  %2773 = vrot.lane.b32.xlu0 %v2013_v14, %s6439_s12 }
 0x349   : > { %v1888_v57 = vmax.f32 %v7411_v38, %v1802_v4  ;;  %v2327_v28 = vcombine.low %v2010_v55, %v2014_v49  ;;  %v2328_v30 = vcombine.high %v2010_v55, %v2014_v49  ;;  %2775 = vrot.lane.b32.xlu1 %v2014_v49, %s6439_s12 }
 0x34a   : > { %v2015_v24 = vmax.f32 %v1887_v0, %v7468_v22  ;;  %v7635_v55 = vrot.slane %v2055_v47, %v6864_v59  ;;  %v7638_v45 = vrot.slane %v2056_v58, %v6864_v59  ;;  %v7644_v22 = vrot.slane %v2040_v39, %v6864_v59 }
 0x34b   : > { %v2016_v19 = vmax.f32 %v1888_v57, %v7466_v27  ;;  %v7629_v38 = vrot.slane %v2327_v28, %v6864_v59  ;;  %v7632_v12 = vrot.slane %v2328_v30, %v6864_v59  ;;  %v1804_v33 = vpop.permute.xlu0 %1803  ;;  %v7641_v27 = vrot.slane %v2312_v37, %v6864_v59 }
 0x34c   : > { %v1806_v44 = vpop.permute.xlu1 %1805  ;;  %v1889_v32 = vmax.f32 %v7424_v51, %v1804_v33  ;;  %v2104_v34 = vcombine.high %v7623_v5, %v7635_v55  ;;  %v2103_v37 = vcombine.low %v7623_v5, %v7635_v55  ;;  %2777 = vrot.lane.b32.xlu0 %v2015_v24, %s6439_s12  ;;  %v2119_v62 = vcombine.low %v7644_v22, %v7638_v45 }
 0x34d   : > { %v1890_v60 = vmax.f32 %v7421_v40, %v1806_v44  ;;  %2779 = vrot.lane.b32.xlu1 %v2016_v19, %s6439_s12  ;;  %v2375_v3 = vcombine.low %v7620_v18, %v7629_v38  ;;  %v2376_v36 = vcombine.high %v7620_v18, %v7629_v38  ;;  %v2391_v51 = vcombine.low %v7641_v27, %v7632_v12 }
 0x34e   : > { %v2017_v40 = vmax.f32 %v1889_v32, %v7472_v29  ;;  %v2120_v29 = vcombine.high %v7644_v22, %v7638_v45  ;;  %v7695_v22 = vrot.slane %v2104_v34, %v6874_v8  ;;  %v7709_v34 = vrot.slane %v2103_v37, %v6874_v8 }
 0x34f   : > { %v2018_v39 = vmax.f32 %v1890_v60, %v7470_v10  ;;  %v1808_v49 = vpop.permute.xlu0 %1807  ;;  %v2392_v10 = vcombine.high %v7641_v27, %v7632_v12  ;;  %v7698_v32 = vrot.slane %v2375_v3, %v6874_v8  ;;  %v7730_v37 = vrot.slane %v2119_v62, %v6874_v8 }
 0x350   : > { %v1810_v52 = vpop.permute.xlu1 %1809  ;;  %v1891_v4 = vmax.f32 %v7438_v15, %v1808_v49  ;;  %2781 = vrot.lane.b32.xlu0 %v2017_v40, %s6439_s12  ;;  %10110 = vst [vmem:[#allocation26_spill] sm:$0xff] %v7695_v22  ;;  %10114 = vst [vmem:[#allocation30_spill] sm:$0xff] %v7709_v34 }
 0x351   : > { %v1892_v14 = vmax.f32 %v7435_v20, %v1810_v52  ;;  %2783 = vrot.lane.b32.xlu1 %v2018_v39, %s6439_s12  ;;  %10111 = vst [vmem:[#allocation27_spill] sm:$0xff] %v7698_v32  ;;  %10121 = vst [vmem:[#allocation37_spill] sm:$0xff] %v7730_v37 }
 0x352   : > { %v2019_v57 = vmax.f32 %v1891_v4, %v7476_v42 }
 0x353   : > { %v2020_v48 = vmax.f32 %v1892_v14, %v7474_v41  ;;  %v1812_v28 = vpop.permute.xlu0 %1811 }
 0x354   : > { %v1814_v0 = vpop.permute.xlu1 %1813  ;;  %v2072_v20 = vcombine.high %v2015_v24, %v2019_v57  ;;  %v1893_v47 = vmax.f32 %v7452_v16, %v1812_v28  ;;  %v2071_v5 = vcombine.low %v2015_v24, %v2019_v57  ;;  %2785 = vrot.lane.b32.xlu0 %v2019_v57, %s6439_s12 }
 0x355   : > { %v2344_v30 = vcombine.high %v2016_v19, %v2020_v48  ;;  %v1894_v15 = vmax.f32 %v7449_v2, %v1814_v0  ;;  %2787 = vrot.lane.b32.xlu1 %v2020_v48, %s6439_s12  ;;  %v2343_v58 = vcombine.low %v2016_v19, %v2020_v48 }
 0x356   : > { %v2021_v42 = vmax.f32 %v1893_v47, %v7480_v50  ;;  %v2079_v16 = vrot.slane %v2071_v5, %v6864_v59  ;;  %v2086_v27 = vrot.slane %v2072_v20, %v6864_v59  ;;  %v7733_v47 = vrot.slane %v2392_v10, %v6874_v8 }
 0x357   : > { %v2022_v41 = vmax.f32 %v1894_v15, %v7478_v43  ;;  %v7682_v2 = vrot.slane %v2343_v58, %v6864_v59  ;;  %v2358_v33 = vrot.slane %v2344_v30, %v6864_v59  ;;  %v7727_v15 = vrot.slane %v2391_v51, %v6874_v8 }
 0x358   : > { %v2087_v45 = vcombine.low %v2017_v40, %v2021_v42  ;;  %v2088_v44 = vcombine.high %v2017_v40, %v2021_v42  ;;  %2789 = vrot.lane.b32.xlu0 %v2021_v42, %s6439_s12  ;;  %10122 = vst [vmem:[#allocation38_spill] sm:$0xff] %v7733_v47  ;;  %v7742_v42 = vrot.slane %v2120_v29, %v6874_v8 }
 0x359   : > { %v2359_v12 = vcombine.low %v2018_v39, %v2022_v41  ;;  %v2360_v55 = vcombine.high %v2018_v39, %v2022_v41  ;;  %2791 = vrot.lane.b32.xlu1 %v2022_v41, %s6439_s12  ;;  %10120 = vst [vmem:[#allocation36_spill] sm:$0xff] %v7727_v15 }
 0x35a   : > { %v2095_v50 = vrot.slane %v2087_v45, %v6864_v59  ;;  %v2102_v24 = vrot.slane %v2088_v44, %v6864_v59  ;;  %10123 = vst [vmem:[#allocation39_spill] sm:$0xff] %v7742_v42  ;;  %v10135_v44 = vld [vmem:[#allocation18_spill] sm:$0xff] }
 0x35b   : > { %v7687_v19 = vrot.slane %v2359_v12, %v6864_v59  ;;  %v2374_v43 = vrot.slane %v2360_v55, %v6864_v59 }
 0x35c   : > { %v2136_v60 = vcombine.high %v2079_v16, %v2095_v50  ;;  %v2135_v40 = vcombine.low %v2079_v16, %v2095_v50  ;;  %v2151_v49 = vcombine.low %v2086_v27, %v2102_v24  ;;  %v2152_v4 = vcombine.high %v2086_v27, %v2102_v24 }
 0x35d   : > { %v2407_v39 = vcombine.low %v7682_v2, %v7687_v19  ;;  %v2423_v52 = vcombine.low %v2358_v33, %v2374_v43  ;;  %v2424_v14 = vcombine.high %v2358_v33, %v2374_v43 }
 0x35e   : > { %v7703_v48 = vrot.slane %v2136_v60, %v6874_v8  ;;  %v7712_v3 = vrot.slane %v2135_v40, %v6874_v8  ;;  %v7718_v28 = vrot.slane %v2151_v49, %v6874_v8  ;;  %v7724_v20 = vrot.slane %v2152_v4, %v6874_v8 }
 0x35f   : > { %v7706_v57 = vrot.slane %v2407_v39, %v6874_v8  ;;  %v7715_v0 = vrot.slane %v2423_v52, %v6874_v8  ;;  %v7721_v30 = vrot.slane %v2424_v14, %v6874_v8 }
 0x360   : > { %10112 = vst [vmem:[#allocation28_spill] sm:$0xff] %v7703_v48  ;;  %10115 = vst [vmem:[#allocation31_spill] sm:$0xff] %v7712_v3  ;;  %v2169_v18 = vcombine.low %v7695_v22, %v7703_v48 }
 0x361   : > { %10113 = vst [vmem:[#allocation29_spill] sm:$0xff] %v7706_v57  ;;  %10116 = vst [vmem:[#allocation32_spill] sm:$0xff] %v7715_v0 }
 0x362   : > { %10117 = vst [vmem:[#allocation33_spill] sm:$0xff] %v7718_v28  ;;  %10118 = vst [vmem:[#allocation34_spill] sm:$0xff] %v7721_v30 }
 0x363   : > { %10119 = vst [vmem:[#allocation35_spill] sm:$0xff] %v7724_v20 }
 0x36c   : > { %v1816_v43 = vpop.permute.xlu0 %1815 }
 0x36d   : > { %v1818_v16 = vpop.permute.xlu1 %1817  ;;  %v1895_v24 = vmax.f32 %v7486_v63, %v1816_v43 }
 0x36e   : > { %v1896_v50 = vmax.f32 %v7483_v46, %v1818_v16 }
 0x36f   : > { %v7766_v27 = vmax.f32 %v1895_v24, %v7564_v6 }
 0x370   : > { %v7763_v33 = vmax.f32 %v1896_v50, %v7562_v9  ;;  %v1820_v39 = vpop.permute.xlu0 %1819 }
 0x371   : > { %v1822_v60 = vpop.permute.xlu1 %1821  ;;  %v1897_v52 = vmax.f32 %v7496_v13, %v1820_v39  ;;  %2793 = vrot.lane.b32.xlu0 %v7766_v27, %s6439_s12  ;;  %v10125_v39 = vld [vmem:[#allocation20_spill] sm:$0xff] }
 0x372   : > { %v1898_v40 = vmax.f32 %v7493_v35, %v1822_v60  ;;  %2795 = vrot.lane.b32.xlu1 %v7763_v33, %s6439_s12 }
 0x373   : > { %v7778_v63 = vmax.f32 %v1897_v52, %v7568_v25  ;;  %v10126_v52 = vld [vmem:[#allocation13_spill] sm:$0xff] }
 0x374   : > { %v7775_v46 = vmax.f32 %v1898_v40, %v7566_v11  ;;  %v1824_v6 = vpop.permute.xlu0 %1823 }
 0x375   : > { %v1826_v9 = vpop.permute.xlu1 %1825  ;;  %v1899_v35 = vmax.f32 %v7506_v53, %v1824_v6  ;;  %2797 = vrot.lane.b32.xlu0 %v7778_v63, %s6439_s12  ;;  %v10127_v6 = vld [vmem:[#allocation14_spill] sm:$0xff] }
 0x376   : > { %v1900_v49 = vmax.f32 %v7503_v1, %v1826_v9  ;;  %2799 = vrot.lane.b32.xlu1 %v7775_v46, %s6439_s12 }
 0x377   : > { %v7790_v11 = vmax.f32 %v1899_v35, %v7572_v21 }
 0x378   : > { %v7787_v13 = vmax.f32 %v1900_v49, %v7570_v26  ;;  %v1828_v14 = vpop.permute.xlu0 %1827 }
 0x379   : > { %v1830_v25 = vpop.permute.xlu1 %1829  ;;  %v1901_v53 = vmax.f32 %v7516_v17, %v1828_v14  ;;  %2801 = vrot.lane.b32.xlu0 %v7790_v11, %s6439_s12  ;;  %v10128_v14 = vld [vmem:[#allocation21_spill] sm:$0xff] }
 0x37a   : > { %2803 = vrot.lane.b32.xlu1 %v7787_v13, %s6439_s12  ;;  %v1902_v1 = vmax.f32 %v7513_v61, %v1830_v25  ;;  %v10124_v61 = vld [vmem:[#allocation19_spill] sm:$0xff] }
 0x37b   : > { %v2029_v26 = vmax.f32 %v1901_v53, %v7576_v56  ;;  %v10129_v53 = vld [vmem:[#allocation22_spill] sm:$0xff] }
 0x37c   : > { %v2030_v4 = vmax.f32 %v1902_v1, %v7574_v23  ;;  %v1832_v43 = vpop.permute.xlu0 %1831  ;;  %v2448_v23 = vcombine.high %v7763_v33, %v7787_v13 }
 0x37d   : > { %v1834_v16 = vpop.permute.xlu1 %1833  ;;  %v1903_v50 = vmax.f32 %v7526_v31, %v1832_v43  ;;  %v2192_v60 = vcombine.high %v7778_v63, %v2029_v26  ;;  %2805 = vrot.lane.b32.xlu0 %v2029_v26, %s6439_s12 }
 0x37e   : > { %v1904_v21 = vmax.f32 %v7523_v7, %v1834_v16  ;;  %v2464_v24 = vcombine.high %v7775_v46, %v2030_v4  ;;  %2807 = vrot.lane.b32.xlu1 %v2030_v4, %s6439_s12  ;;  %v2176_v7 = vcombine.high %v7766_v27, %v7790_v11  ;;  %v7831_v43 = vrot.slane %v2448_v23, %v6864_v59 }
 0x37f   : > { %v7809_v40 = vmax.f32 %v1903_v50, %v10125_v39  ;;  %v7822_v25 = vrot.slane %v2192_v60, %v6864_v59  ;;  %v10130_v60 = vld [vmem:[#allocation15_spill] sm:$0xff]  ;;  %v10131_v39 = vld [vmem:[#allocation16_spill] sm:$0xff] }
 0x380   : > { %v7806_v17 = vmax.f32 %v1904_v21, %v10124_v61  ;;  %v1836_v56 = vpop.permute.xlu0 %1835  ;;  %v7819_v35 = vrot.slane %v2464_v24, %v6864_v59  ;;  %v7834_v21 = vrot.slane %v2176_v7, %v6864_v59 }
 0x381   : > { %v1838_v31 = vpop.permute.xlu1 %1837  ;;  %v1905_v49 = vmax.f32 %v10127_v6, %v1836_v56  ;;  %2809 = vrot.lane.b32.xlu0 %v7809_v40, %s6439_s12  ;;  %v10133_v6 = vld [vmem:[#allocation24_spill] sm:$0xff] }
 0x382   : > { %v1906_v9 = vmax.f32 %v10126_v52, %v1838_v31  ;;  %2811 = vrot.lane.b32.xlu1 %v7806_v17, %s6439_s12  ;;  %v2528_v56 = vcombine.high %v7831_v43, %v7819_v35  ;;  %v2256_v52 = vcombine.high %v7834_v21, %v7822_v25 }
 0x383   : > { %v2033_v16 = vmax.f32 %v1905_v49, %v10129_v53  ;;  %v2408_v53 = vcombine.high %v7682_v2, %v7687_v19  ;;  %v2175_v2 = vcombine.low %v7766_v27, %v7790_v11 }
 0x384   : > { %v2034_v1 = vmax.f32 %v1906_v9, %v10128_v14  ;;  %v1840_v24 = vpop.permute.xlu0 %1839  ;;  %v10132_v9 = vld [vmem:[#allocation23_spill] sm:$0xff] }
 0x385   : > { %v1842_v50 = vpop.permute.xlu1 %1841  ;;  %v1907_v31 = vmax.f32 %v10131_v39, %v1840_v24  ;;  %2813 = vrot.lane.b32.xlu0 %v2033_v16, %s6439_s12  ;;  %v2191_v24 = vcombine.low %v7778_v63, %v2029_v26  ;;  %v10136_v63 = vld [vmem:[#allocation25_spill] sm:$0xff]  ;;  %v2422_v38 = vrot.slane %v2408_v53, %v6874_v8  ;;  %v2440_v53 = vcombine.high %v7698_v32, %v7706_v57 }
 0x386   : > { %v1908_v61 = vmax.f32 %v10130_v60, %v1842_v50  ;;  %2815 = vrot.lane.b32.xlu1 %v2034_v1, %s6439_s12  ;;  %v2463_v50 = vcombine.low %v7775_v46, %v2030_v4  ;;  %v10134_v60 = vld [vmem:[#allocation17_spill] sm:$0xff] }
 0x387   : > { %v2035_v49 = vmax.f32 %v1907_v31, %v10133_v6  ;;  %v2447_v31 = vcombine.low %v7763_v33, %v7787_v13  ;;  %v7873_v33 = vrot.slane %v2191_v24, %v6864_v59  ;;  %v2183_v6 = vrot.slane %v2175_v2, %v6864_v59 }
 0x388   : > { %v2036_v23 = vmax.f32 %v1908_v61, %v10132_v9  ;;  %v1844_v14 = vpop.permute.xlu0 %1843  ;;  %v7857_v61 = vrot.slane %v2376_v36, %v6874_v8  ;;  %v2471_v36 = vrot.slane %v2463_v50, %v6864_v59 }
 0x389   : > { %v1846_v7 = vpop.permute.xlu1 %1845  ;;  %v1909_v29 = vmax.f32 %v10135_v44, %v1844_v14  ;;  %v2207_v46 = vcombine.low %v7809_v40, %v2035_v49  ;;  %2817 = vrot.lane.b32.xlu0 %v2035_v49, %s6439_s12  ;;  %v2208_v13 = vcombine.high %v7809_v40, %v2035_v49 }
 0x38a   : > { %v1910_v39 = vmax.f32 %v10134_v60, %v1846_v7  ;;  %2819 = vrot.lane.b32.xlu1 %v2036_v23, %s6439_s12  ;;  %v2479_v19 = vcombine.low %v7806_v17, %v2036_v23  ;;  %v2480_v27 = vcombine.high %v7806_v17, %v2036_v23  ;;  %v2239_v60 = vcombine.low %v2183_v6, %v7873_v33 }
 0x38b   : > { %v2037_v4 = vmax.f32 %v1909_v29, %v10136_v63  ;;  %v2455_v29 = vrot.slane %v2447_v31, %v6864_v59  ;;  %v2215_v14 = vrot.slane %v2207_v46, %v6864_v59  ;;  %v2222_v49 = vrot.slane %v2208_v13, %v6864_v59 }
 0x38c   : > { %v2038_v44 = vmax.f32 %v1910_v39, %v7590_v54  ;;  %v2487_v7 = vrot.slane %v2479_v19, %v6864_v59  ;;  %v2494_v23 = vrot.slane %v2480_v27, %v6864_v59  ;;  %v2255_v31 = vcombine.low %v7834_v21, %v7822_v25 }
 0x38d   : > { %v2223_v9 = vcombine.low %v2033_v16, %v2037_v4  ;;  %v2224_v54 = vcombine.high %v2033_v16, %v2037_v4  ;;  %2821 = vrot.lane.b32.xlu0 %v2037_v4, %s6439_s12  ;;  %v2511_v50 = vcombine.low %v2455_v29, %v2471_v36  ;;  %v2442_v63 = vcombine.high %v7857_v61, %v2422_v38 }
 0x38e   : > { %v2495_v11 = vcombine.low %v2034_v1, %v2038_v44  ;;  %v2496_v26 = vcombine.high %v2034_v1, %v2038_v44  ;;  %2823 = vrot.lane.b32.xlu1 %v2038_v44, %s6439_s12  ;;  %v2168_v4 = vcombine.high %v7709_v34, %v7712_v3  ;;  %v2441_v13 = vcombine.low %v7857_v61, %v2422_v38 }
 0x38f   : > { %v2231_v1 = vrot.slane %v2223_v9, %v6864_v59  ;;  %v2238_v16 = vrot.slane %v2224_v54, %v6864_v59  ;;  %v7917_v54 = vrot.slane %v2511_v50, %v6874_v8  ;;  %v7923_v61 = vrot.slane %v2255_v31, %v6874_v8 }
 0x390   : > { %v2503_v17 = vrot.slane %v2495_v11, %v6864_v59  ;;  %v2510_v40 = vrot.slane %v2496_v26, %v6864_v59 }
 0x391   : > { %v2271_v39 = vcombine.low %v2215_v14, %v2231_v1  ;;  %2641 = vrot.lane.b32.xlu0 %v2440_v53, %s6435_s28  ;;  %v2287_v19 = vcombine.low %v2222_v49, %v2238_v16  ;;  %v2288_v44 = vcombine.high %v2222_v49, %v2238_v16  ;;  %10142 = vst [vmem:[#allocation22_spill] sm:$0xff] %v7917_v54  ;;  %10144 = vst [vmem:[#allocation16_spill] sm:$0xff] %v7923_v61 }
 0x392   : > { %2593 = vrot.lane.b32.xlu1 %v2169_v18, %s6434_s26  ;;  %v2543_v24 = vcombine.low %v2487_v7, %v2503_v17  ;;  %v2544_v2 = vcombine.high %v2487_v7, %v2503_v17  ;;  %v2560_v46 = vcombine.high %v2494_v23, %v2510_v40  ;;  %v2512_v7 = vcombine.high %v2455_v29, %v2471_v36 }
 0x393   : > { %v7903_v27 = vrot.slane %v2271_v39, %v6874_v8  ;;  %v7907_v11 = vrot.slane %v2287_v19, %v6874_v8  ;;  %v7913_v9 = vrot.slane %v2288_v44, %v6874_v8  ;;  %v7920_v17 = vrot.slane %v2239_v60, %v6874_v8 }
 0x394   : > { %v7900_v18 = vrot.slane %v2543_v24, %v6874_v8  ;;  %v7910_v26 = vrot.slane %v2560_v46, %v6874_v8  ;;  %v2558_v38 = vrot.slane %v2544_v2, %v6874_v8  ;;  %v2272_v16 = vcombine.high %v2215_v14, %v2231_v1 }
 0x395   : > { %10138 = vst [vmem:[#allocation20_spill] sm:$0xff] %v7903_v27  ;;  %10139 = vst [vmem:[#allocation13_spill] sm:$0xff] %v7907_v11  ;;  %2585 = vrot.lane.b32.xlu0 %v2168_v4, %s6435_s28  ;;  %v7931_v49 = vrot.slane %v2528_v56, %v6874_v8  ;;  %v7937_v36 = vrot.slane %v2256_v52, %v6874_v8  ;;  %v2526_v50 = vrot.slane %v2512_v7, %v6874_v8 }
 0x396   : > { %10137 = vst [vmem:[#allocation19_spill] sm:$0xff] %v7900_v18  ;;  %10140 = vst [vmem:[#allocation14_spill] sm:$0xff] %v7910_v26  ;;  %2657 = vrot.lane.b32.xlu1 %v2442_v63, %s6433_s25  ;;  %v2576_v29 = vcombine.high %v7917_v54, %v7900_v18  ;;  %v2240_v24 = vcombine.high %v2183_v6, %v7873_v33  ;;  %v2286_v39 = vrot.slane %v2272_v16, %v6874_v8 }
 0x397   : > { %10141 = vst [vmem:[#allocation21_spill] sm:$0xff] %v7913_v9  ;;  %10143 = vst [vmem:[#allocation15_spill] sm:$0xff] %v7920_v17  ;;  %v2577_v60 = vcombine.low %v2526_v50, %v2558_v38  ;;  %v2304_v31 = vcombine.high %v7920_v17, %v7903_v27  ;;  %v2559_v2 = vcombine.low %v2494_v23, %v2510_v40 }
 0x398   : > { %10145 = vst [vmem:[#allocation23_spill] sm:$0xff] %v7931_v49  ;;  %10146 = vst [vmem:[#allocation24_spill] sm:$0xff] %v7937_v36  ;;  %v2254_v19 = vrot.slane %v2240_v24, %v6874_v8  ;;  %v2527_v46 = vcombine.low %v7831_v43, %v7819_v35  ;;  %v2307_v33 = vcombine.low %v7923_v61, %v7907_v11 }
 0x399   : > { %2649 = vrot.lane.b32.xlu0 %v2441_v13, %s6434_s26  ;;  %v2567_v6 = vrot.slane %v2559_v2, %v6874_v8  ;;  %v2578_v23 = vcombine.high %v2526_v50, %v2558_v38 }
 0x39a   : > { %2643 = vrot.lane.b32.xlu1 %v2576_v29, %s6435_s28  ;;  %v2305_v44 = vcombine.low %v2254_v19, %v2286_v39  ;;  %v2535_v40 = vrot.slane %v2527_v46, %v6874_v8  ;;  %v2306_v4 = vcombine.high %v2254_v19, %v2286_v39 }
 0x39c   : > { %v2580_v63 = vcombine.high %v2535_v40, %v2567_v6  ;;  %v2579_v35 = vcombine.low %v2535_v40, %v2567_v6 }
 0x39d   : > { %2587 = vrot.lane.b32.xlu0 %v2304_v31, %s6435_s28 }
 0x39e   : > { %2651 = vrot.lane.b32.xlu1 %v2577_v60, %s6434_s26 }
 0x3a1   : > { %2611 = vrot.lane.b32.xlu0 %v2307_v33, %s6432_s17 }
 0x3a2   : > { %2595 = vrot.lane.b32.xlu1 %v2305_v44, %s6434_s26 }
 0x3a5   : > { %2675 = vrot.lane.b32.xlu0 %v2580_v63, %s6431_s13 }
 0x3a6   : > { %2659 = vrot.lane.b32.xlu1 %v2578_v23, %s6433_s25 }
 0x3aa   : > { %2603 = vrot.lane.b32.xlu1 %v2306_v4, %s6433_s25 }
 0x3ae   : > { %2667 = vrot.lane.b32.xlu1 %v2579_v35, %s6432_s17  ;;  %v2762_v13 = vpop.permute.xlu0 %2761 }
 0x3af   : > { %v2764_v43 = vpop.permute.xlu1 %2763  ;;  %2857 = vst.msk [vmem:[#allocation2 + $0x2] sm:$0xff] %vm1270_vm6, %v2762_v13 }
 0x3b0   : > { %2858 = vst.msk [vmem:[#allocation2 + $0xa] sm:$0xff] %vm1270_vm6, %v2764_v43 }
 0x3b2   : > { %v2766_v16 = vpop.permute.xlu0 %2765 }
 0x3b3   : > { %v2768_v7 = vpop.permute.xlu1 %2767  ;;  %2859 = vst.msk [vmem:[#allocation2 + $0x1a] sm:$0xff] %vm1270_vm6, %v2766_v16 }
 0x3b4   : > { %2860 = vst.msk [vmem:[#allocation2 + $0x22] sm:$0xff] %vm1270_vm6, %v2768_v7 }
 0x3b6   : > { %v2770_v60 = vpop.permute.xlu0 %2769  ;;  %v2889_v2 = vld [vmem:[#allocation2] sm:$0xff] }
 0x3b7   : > { %v2772_v38 = vpop.permute.xlu1 %2771  ;;  %v2890_v29 = vld [vmem:[#allocation2 + $0x8] sm:$0xff]  ;;  %2861 = vst.msk [vmem:[#allocation2 + $0x32] sm:$0xff] %vm1270_vm6, %v2770_v60 }
 0x3b8   : > { %v2922_v50 = vld [vmem:[#allocation2 + $0x9] sm:$0xff]  ;;  %2862 = vst.msk [vmem:[#allocation2 + $0x3a] sm:$0xff] %vm1270_vm6, %v2772_v38  ;;  %v2921_v46 = vld [vmem:[#allocation2 + $0x1] sm:$0xff] }
 0x3b9   : > { %v2954_v24 = vld [vmem:[#allocation2 + $0xa] sm:$0xff]  ;;  %v3050_v31 = vmax.f32 %v2890_v29, %v2922_v50  ;;  %v2953_v44 = vld [vmem:[#allocation2 + $0x2] sm:$0xff]  ;;  %v3049_v40 = vmax.f32 %v2889_v2, %v2921_v46 }
 0x3ba   : > { %v2986_v39 = vld [vmem:[#allocation2 + $0xb] sm:$0xff]  ;;  %v2985_v33 = vld [vmem:[#allocation2 + $0x3] sm:$0xff]  ;;  %v2891_v29 = vld [vmem:[#allocation2 + $0x18] sm:$0xff]  ;;  %v2774_v50 = vpop.permute.xlu0 %2773 }
 0x3bb   : > { %v3082_v19 = vmax.f32 %v2954_v24, %v2986_v39  ;;  %v3018_v6 = vld [vmem:[#allocation2 + $0xc] sm:$0xff]  ;;  %v3081_v23 = vmax.f32 %v2953_v44, %v2985_v33  ;;  %v2892_v4 = vld [vmem:[#allocation2 + $0x20] sm:$0xff]  ;;  %v2776_v13 = vpop.permute.xlu1 %2775  ;;  %2863 = vst.msk [vmem:[#allocation2 + $0x4a] sm:$0xff] %vm1270_vm6, %v2774_v50 }
 0x3bc   : > { %v2924_v35 = vld [vmem:[#allocation2 + $0x21] sm:$0xff]  ;;  %2864 = vst.msk [vmem:[#allocation2 + $0x52] sm:$0xff] %vm1270_vm6, %v2776_v13  ;;  %v2923_v39 = vld [vmem:[#allocation2 + $0x19] sm:$0xff] }
 0x3bd   : > { %v3114_v63 = vmax.f32 %v3050_v31, %v3082_v19  ;;  %v2956_v43 = vld [vmem:[#allocation2 + $0x22] sm:$0xff]  ;;  %v3113_v16 = vmax.f32 %v3049_v40, %v3081_v23  ;;  %v3052_v52 = vmax.f32 %v2892_v4, %v2924_v35  ;;  %v2955_v45 = vld [vmem:[#allocation2 + $0x1a] sm:$0xff]  ;;  %v3051_v46 = vmax.f32 %v2891_v29, %v2923_v39 }
 0x3be   : > { %v3017_v7 = vld [vmem:[#allocation2 + $0x4] sm:$0xff]  ;;  %v2987_v2 = vld [vmem:[#allocation2 + $0x1b] sm:$0xff]  ;;  %v2925_v29 = vld [vmem:[#allocation2 + $0x31] sm:$0xff] }
 0x3bf   : > { %v2988_v38 = vld [vmem:[#allocation2 + $0x23] sm:$0xff]  ;;  %v7984_v24 = vmax.f32 %v3114_v63, %v3018_v6  ;;  %v7987_v31 = vmax.f32 %v3113_v16, %v3017_v7  ;;  %v3083_v44 = vmax.f32 %v2955_v45, %v2987_v2  ;;  %v2958_v23 = vld [vmem:[#allocation2 + $0x3a] sm:$0xff]  ;;  %v2780_v6 = vpop.permute.xlu1 %2779  ;;  %v2893_v7 = vld [vmem:[#allocation2 + $0x30] sm:$0xff]  ;;  %v2778_v16 = vpop.permute.xlu0 %2777 }
 0x3c0   : > { %v3084_v60 = vmax.f32 %v2956_v43, %v2988_v38  ;;  %v3020_v19 = vld [vmem:[#allocation2 + $0x24] sm:$0xff]  ;;  %v3019_v40 = vld [vmem:[#allocation2 + $0x1c] sm:$0xff]  ;;  %2866 = vst.msk [vmem:[#allocation2 + $0x6a] sm:$0xff] %vm1270_vm6, %v2780_v6  ;;  %v2989_v50 = vld [vmem:[#allocation2 + $0x33] sm:$0xff]  ;;  %v3053_v39 = vmax.f32 %v2893_v7, %v2925_v29 }
 0x3c1   : > { %3211 = vrot.lane.b32.xlu1 %v7984_v24, %s6440_s14  ;;  %v2990_v4 = vld [vmem:[#allocation2 + $0x3b] sm:$0xff]  ;;  %3209 = vrot.lane.b32.xlu0 %v7987_v31, %s6440_s14  ;;  %v3115_v63 = vmax.f32 %v3051_v46, %v3083_v44  ;;  %2865 = vst.msk [vmem:[#allocation2 + $0x62] sm:$0xff] %vm1270_vm6, %v2778_v16 }
 0x3c2   : > { %v3116_v33 = vmax.f32 %v3052_v52, %v3084_v60  ;;  %v2894_v35 = vld [vmem:[#allocation2 + $0x38] sm:$0xff]  ;;  %v3086_v13 = vmax.f32 %v2958_v23, %v2990_v4  ;;  %v2895_v16 = vld [vmem:[#allocation2 + $0x48] sm:$0xff] }
 0x3c3   : > { %v2926_v43 = vld [vmem:[#allocation2 + $0x39] sm:$0xff]  ;;  %v7997_v60 = vmax.f32 %v3115_v63, %v3019_v40  ;;  %v2896_v63 = vld [vmem:[#allocation2 + $0x50] sm:$0xff] }
 0x3c4   : > { %v7994_v45 = vmax.f32 %v3116_v33, %v3020_v19  ;;  %v3054_v38 = vmax.f32 %v2894_v35, %v2926_v43  ;;  %v2957_v52 = vld [vmem:[#allocation2 + $0x32] sm:$0xff]  ;;  %v3022_v46 = vld [vmem:[#allocation2 + $0x3c] sm:$0xff]  ;;  %v2784_v19 = vpop.permute.xlu1 %2783  ;;  %v2782_v35 = vpop.permute.xlu0 %2781  ;;  %v2927_v29 = vld [vmem:[#allocation2 + $0x49] sm:$0xff] }
 0x3c5   : > { %v3085_v2 = vmax.f32 %v2957_v52, %v2989_v50  ;;  %3213 = vrot.lane.b32.xlu0 %v7997_v60, %s6440_s14  ;;  %v3021_v33 = vld [vmem:[#allocation2 + $0x34] sm:$0xff]  ;;  %2868 = vst.msk [vmem:[#allocation2 + $0x82] sm:$0xff] %vm1270_vm6, %v2784_v19  ;;  %2867 = vst.msk [vmem:[#allocation2 + $0x7a] sm:$0xff] %vm1270_vm6, %v2782_v35  ;;  %v2959_v52 = vld [vmem:[#allocation2 + $0x4a] sm:$0xff] }
 0x3c6   : > { %3215 = vrot.lane.b32.xlu1 %v7994_v45, %s6440_s14  ;;  %v3118_v44 = vmax.f32 %v3054_v38, %v3086_v13  ;;  %v2960_v4 = vld [vmem:[#allocation2 + $0x52] sm:$0xff] }
 0x3c7   : > { %v3117_v23 = vmax.f32 %v3053_v39, %v3085_v2  ;;  %v2992_v6 = vld [vmem:[#allocation2 + $0x53] sm:$0xff]  ;;  %v2991_v50 = vld [vmem:[#allocation2 + $0x4b] sm:$0xff]  ;;  %v3055_v2 = vmax.f32 %v2895_v16, %v2927_v29 }
 0x3c8   : > { %v8004_v40 = vmax.f32 %v3118_v44, %v3022_v46  ;;  %v2928_v43 = vld [vmem:[#allocation2 + $0x51] sm:$0xff]  ;;  %v3088_v7 = vmax.f32 %v2960_v4, %v2992_v6  ;;  %v3087_v19 = vmax.f32 %v2959_v52, %v2991_v50  ;;  %v2788_v46 = vpop.permute.xlu1 %2787  ;;  %v2897_v12 = vld [vmem:[#allocation2 + $0x60] sm:$0xff] }
 0x3c9   : > { %v8007_v13 = vmax.f32 %v3117_v23, %v3021_v33  ;;  %v3056_v38 = vmax.f32 %v2896_v63, %v2928_v43  ;;  %v3024_v39 = vld [vmem:[#allocation2 + $0x54] sm:$0xff]  ;;  %v3023_v4 = vld [vmem:[#allocation2 + $0x4c] sm:$0xff]  ;;  %2870 = vst.msk [vmem:[#allocation2 + $0x9a] sm:$0xff] %vm1270_vm6, %v2788_v46  ;;  %v2786_v33 = vpop.permute.xlu0 %2785  ;;  %v2929_v52 = vld [vmem:[#allocation2 + $0x61] sm:$0xff] }
 0x3ca   : > { %3219 = vrot.lane.b32.xlu1 %v8004_v40, %s6440_s14  ;;  %v2962_v6 = vld [vmem:[#allocation2 + $0x6a] sm:$0xff]  ;;  %v3119_v23 = vmax.f32 %v3055_v2, %v3087_v19  ;;  %2869 = vst.msk [vmem:[#allocation2 + $0x92] sm:$0xff] %vm1270_vm6, %v2786_v33  ;;  %v2961_v50 = vld [vmem:[#allocation2 + $0x62] sm:$0xff]  ;;  %v3057_v58 = vmax.f32 %v2897_v12, %v2929_v52 }
 0x3cb   : > { %3217 = vrot.lane.b32.xlu0 %v8007_v13, %s6440_s14  ;;  %v3120_v44 = vmax.f32 %v3056_v38, %v3088_v7  ;;  %v2994_v35 = vld [vmem:[#allocation2 + $0x6b] sm:$0xff]  ;;  %v2993_v53 = vld [vmem:[#allocation2 + $0x63] sm:$0xff] }
 0x3cc   : > { %v2898_v63 = vld [vmem:[#allocation2 + $0x68] sm:$0xff]  ;;  %v3090_v55 = vmax.f32 %v2962_v6, %v2994_v35  ;;  %v8017_v7 = vmax.f32 %v3119_v23, %v3023_v4  ;;  %v3089_v5 = vmax.f32 %v2961_v50, %v2993_v53  ;;  %v2792_v2 = vpop.permute.xlu1 %2791  ;;  %v2900_v4 = vld [vmem:[#allocation2 + $0x80] sm:$0xff]  ;;  %v2899_v12 = vld [vmem:[#allocation2 + $0x78] sm:$0xff] }
 0x3cd   : > { %v2930_v43 = vld [vmem:[#allocation2 + $0x69] sm:$0xff]  ;;  %v8015_v16 = vmax.f32 %v3120_v44, %v3024_v39  ;;  %2872 = vst.msk [vmem:[#allocation2 + $0xb2] sm:$0xff] %vm1270_vm6, %v2792_v2  ;;  %v2790_v39 = vpop.permute.xlu0 %2789  ;;  %v2932_v33 = vld [vmem:[#allocation2 + $0x81] sm:$0xff] }
 0x3ce   : > { %v3058_v29 = vmax.f32 %v2898_v63, %v2930_v43  ;;  %v3026_v38 = vld [vmem:[#allocation2 + $0x6c] sm:$0xff]  ;;  %v3025_v46 = vld [vmem:[#allocation2 + $0x64] sm:$0xff]  ;;  %v3121_v44 = vmax.f32 %v3057_v58, %v3089_v5  ;;  %2871 = vst.msk [vmem:[#allocation2 + $0xaa] sm:$0xff] %vm1270_vm6, %v2790_v39  ;;  %v3060_v63 = vmax.f32 %v2900_v4, %v2932_v33  ;;  %v2963_v43 = vld [vmem:[#allocation2 + $0x7a] sm:$0xff] }
 0x3cf   : > { %3223 = vrot.lane.b32.xlu1 %v8015_v16, %s6440_s14  ;;  %v2964_v6 = vld [vmem:[#allocation2 + $0x82] sm:$0xff]  ;;  %3221 = vrot.lane.b32.xlu0 %v8017_v7, %s6440_s14 }
 0x3d0   : > { %v3122_v19 = vmax.f32 %v3058_v29, %v3090_v55  ;;  %v2996_v35 = vld [vmem:[#allocation2 + $0x83] sm:$0xff]  ;;  %v2931_v55 = vld [vmem:[#allocation2 + $0x79] sm:$0xff]  ;;  %v8027_v52 = vmax.f32 %v3121_v44, %v3025_v46 }
 0x3d1   : > { %v3092_v23 = vmax.f32 %v2964_v6, %v2996_v35  ;;  %v2995_v29 = vld [vmem:[#allocation2 + $0x7b] sm:$0xff]  ;;  %v3028_v50 = vld [vmem:[#allocation2 + $0x84] sm:$0xff]  ;;  %v3059_v14 = vmax.f32 %v2899_v12, %v2931_v55  ;;  %v2901_v4 = vld [vmem:[#allocation2 + $0x90] sm:$0xff] }
 0x3d2   : > { %v8025_v53 = vmax.f32 %v3122_v19, %v3026_v38  ;;  %v3091_v21 = vmax.f32 %v2963_v43, %v2995_v29  ;;  %v3027_v5 = vld [vmem:[#allocation2 + $0x7c] sm:$0xff]  ;;  %v2933_v33 = vld [vmem:[#allocation2 + $0x91] sm:$0xff] }
 0x3d3   : > { %v3124_v58 = vmax.f32 %v3060_v63, %v3092_v23  ;;  %v2966_v2 = vld [vmem:[#allocation2 + $0x9a] sm:$0xff]  ;;  %3225 = vrot.lane.b32.xlu0 %v8027_v52, %s6440_s14  ;;  %v2965_v12 = vld [vmem:[#allocation2 + $0x92] sm:$0xff]  ;;  %v3061_v63 = vmax.f32 %v2901_v4, %v2933_v33 }
 0x3d4   : > { %3227 = vrot.lane.b32.xlu1 %v8025_v53, %s6440_s14  ;;  %v2998_v6 = vld [vmem:[#allocation2 + $0x9b] sm:$0xff]  ;;  %v3123_v38 = vmax.f32 %v3059_v14, %v3091_v21  ;;  %v2997_v55 = vld [vmem:[#allocation2 + $0x93] sm:$0xff] }
 0x3d5   : > { %v2902_v19 = vld [vmem:[#allocation2 + $0x98] sm:$0xff]  ;;  %v3094_v39 = vmax.f32 %v2966_v2, %v2998_v6  ;;  %v8033_v46 = vmax.f32 %v3124_v58, %v3028_v50  ;;  %v3093_v29 = vmax.f32 %v2965_v12, %v2997_v55  ;;  %v2904_v58 = vld [vmem:[#allocation2 + $0xb0] sm:$0xff] }
 0x3d6   : > { %v2934_v35 = vld [vmem:[#allocation2 + $0x99] sm:$0xff]  ;;  %v8035_v43 = vmax.f32 %v3123_v38, %v3027_v5  ;;  %v2936_v2 = vld [vmem:[#allocation2 + $0xb1] sm:$0xff] }
 0x3d7   : > { %v3062_v44 = vmax.f32 %v2902_v19, %v2934_v35  ;;  %v3030_v23 = vld [vmem:[#allocation2 + $0x9c] sm:$0xff]  ;;  %v3029_v14 = vld [vmem:[#allocation2 + $0x94] sm:$0xff]  ;;  %v3125_v50 = vmax.f32 %v3061_v63, %v3093_v29  ;;  %v2903_v19 = vld [vmem:[#allocation2 + $0xa8] sm:$0xff]  ;;  %v3064_v38 = vmax.f32 %v2904_v58, %v2936_v2 }
 0x3d8   : > { %3231 = vrot.lane.b32.xlu1 %v8033_v46, %s6440_s14  ;;  %v2968_v21 = vld [vmem:[#allocation2 + $0xb2] sm:$0xff]  ;;  %3229 = vrot.lane.b32.xlu0 %v8035_v43, %s6440_s14  ;;  %v2935_v35 = vld [vmem:[#allocation2 + $0xa9] sm:$0xff] }
 0x3d9   : > { %v3126_v25 = vmax.f32 %v3062_v44, %v3094_v39  ;;  %v3000_v10 = vld [vmem:[#allocation2 + $0xb3] sm:$0xff]  ;;  %v2967_v4 = vld [vmem:[#allocation2 + $0xaa] sm:$0xff]  ;;  %v8043_v12 = vmax.f32 %v3125_v50, %v3029_v14  ;;  %v3063_v39 = vmax.f32 %v2903_v19, %v2935_v35 }
 0x3da   : > { %v3096_v6 = vmax.f32 %v2968_v21, %v3000_v10  ;;  %v2999_v33 = vld [vmem:[#allocation2 + $0xab] sm:$0xff]  ;;  %v3032_v63 = vld [vmem:[#allocation2 + $0xb4] sm:$0xff] }
 0x3db   : > { %v8041_v5 = vmax.f32 %v3126_v25, %v3030_v23  ;;  %v3095_v44 = vmax.f32 %v2967_v4, %v2999_v33  ;;  %v3031_v25 = vld [vmem:[#allocation2 + $0xac] sm:$0xff] }
 0x3dc   : > { %v3128_v55 = vmax.f32 %v3064_v38, %v3096_v6  ;;  %3233 = vrot.lane.b32.xlu0 %v8043_v12, %s6440_s14 }
 0x3dd   : > { %3235 = vrot.lane.b32.xlu1 %v8041_v5, %s6440_s14  ;;  %v3127_v10 = vmax.f32 %v3063_v39, %v3095_v44 }
 0x3de   : > { %v8049_v29 = vmax.f32 %v3128_v55, %v3032_v63 }
 0x3df   : > { %v8051_v23 = vmax.f32 %v3127_v10, %v3031_v25 }
 0x3e1   : > { %3239 = vrot.lane.b32.xlu1 %v8049_v29, %s6440_s14  ;;  %3237 = vrot.lane.b32.xlu0 %v8051_v23, %s6440_s14 }
 0x3e3   : > { %v2794_v21 = vpop.permute.xlu0 %2793 }
 0x3e4   : > { %v2796_v14 = vpop.permute.xlu1 %2795  ;;  %2873 = vst.msk [vmem:[#allocation2 + $0xc2] sm:$0xff] %vm1270_vm6, %v2794_v21 }
 0x3e5   : > { %3499 = vrot.lane.b32.xlu1 %v7984_v24, %s6441_s29  ;;  %3497 = vrot.lane.b32.xlu0 %v7987_v31, %s6441_s29  ;;  %2874 = vst.msk [vmem:[#allocation2 + $0xca] sm:$0xff] %vm1270_vm6, %v2796_v14 }
 0x3e7   : > { %v2798_v58 = vpop.permute.xlu0 %2797 }
 0x3e8   : > { %v2800_v50 = vpop.permute.xlu1 %2799  ;;  %2875 = vst.msk [vmem:[#allocation2 + $0xda] sm:$0xff] %vm1270_vm6, %v2798_v58 }
 0x3e9   : > { %3503 = vrot.lane.b32.xlu1 %v7994_v45, %s6441_s29  ;;  %3501 = vrot.lane.b32.xlu0 %v7997_v60, %s6441_s29  ;;  %2876 = vst.msk [vmem:[#allocation2 + $0xe2] sm:$0xff] %vm1270_vm6, %v2800_v50 }
 0x3eb   : > { %v2802_v6 = vpop.permute.xlu0 %2801  ;;  %v2905_v44 = vld [vmem:[#allocation2 + $0xc0] sm:$0xff] }
 0x3ec   : > { %v2804_v2 = vpop.permute.xlu1 %2803  ;;  %2877 = vst.msk [vmem:[#allocation2 + $0xf2] sm:$0xff] %vm1270_vm6, %v2802_v6  ;;  %v2906_v35 = vld [vmem:[#allocation2 + $0xc8] sm:$0xff] }
 0x3ed   : > { %3507 = vrot.lane.b32.xlu1 %v8004_v40, %s6441_s29  ;;  %3505 = vrot.lane.b32.xlu0 %v8007_v13, %s6441_s29  ;;  %2878 = vst.msk [vmem:[#allocation2 + $0xfa] sm:$0xff] %vm1270_vm6, %v2804_v2  ;;  %v2938_v4 = vld [vmem:[#allocation2 + $0xc9] sm:$0xff]  ;;  %v2937_v55 = vld [vmem:[#allocation2 + $0xc1] sm:$0xff] }
 0x3ee   : > { %v2970_v33 = vld [vmem:[#allocation2 + $0xca] sm:$0xff]  ;;  %v2969_v63 = vld [vmem:[#allocation2 + $0xc2] sm:$0xff]  ;;  %v3066_v21 = vmax.f32 %v2906_v35, %v2938_v4  ;;  %v3065_v6 = vmax.f32 %v2905_v44, %v2937_v55 }
 0x3ef   : > { %v2806_v38 = vpop.permute.xlu0 %2805  ;;  %v3002_v39 = vld [vmem:[#allocation2 + $0xcb] sm:$0xff]  ;;  %v3001_v10 = vld [vmem:[#allocation2 + $0xc3] sm:$0xff]  ;;  %v2907_v51 = vld [vmem:[#allocation2 + $0xd8] sm:$0xff] }
 0x3f0   : > { %v2808_v19 = vpop.permute.xlu1 %2807  ;;  %2879 = vst.msk [vmem:[#allocation2 + $0x10a] sm:$0xff] %vm1270_vm6, %v2806_v38  ;;  %v3098_v50 = vmax.f32 %v2970_v33, %v3002_v39  ;;  %v2908_v58 = vld [vmem:[#allocation2 + $0xe0] sm:$0xff] }
 0x3f1   : > { %3511 = vrot.lane.b32.xlu1 %v8015_v16, %s6441_s29  ;;  %3509 = vrot.lane.b32.xlu0 %v8017_v7, %s6441_s29  ;;  %2880 = vst.msk [vmem:[#allocation2 + $0x112] sm:$0xff] %vm1270_vm6, %v2808_v19  ;;  %v2940_v2 = vld [vmem:[#allocation2 + $0xe1] sm:$0xff]  ;;  %v3097_v19 = vmax.f32 %v2969_v63, %v3001_v10  ;;  %v2939_v56 = vld [vmem:[#allocation2 + $0xd9] sm:$0xff] }
 0x3f2   : > { %v2972_v38 = vld [vmem:[#allocation2 + $0xe2] sm:$0xff]  ;;  %v2971_v41 = vld [vmem:[#allocation2 + $0xda] sm:$0xff]  ;;  %v3130_v33 = vmax.f32 %v3066_v21, %v3098_v50  ;;  %v3068_v39 = vmax.f32 %v2908_v58, %v2940_v2  ;;  %v3034_v21 = vld [vmem:[#allocation2 + $0xcc] sm:$0xff] }
 0x3f3   : > { %v2810_v14 = vpop.permute.xlu0 %2809  ;;  %v3004_v62 = vld [vmem:[#allocation2 + $0xe3] sm:$0xff]  ;;  %v3003_v1 = vld [vmem:[#allocation2 + $0xdb] sm:$0xff]  ;;  %v3129_v10 = vmax.f32 %v3065_v6, %v3097_v19  ;;  %v2909_v30 = vld [vmem:[#allocation2 + $0xf0] sm:$0xff] }
 0x3f4   : > { %v2812_v25 = vpop.permute.xlu1 %2811  ;;  %2881 = vst.msk [vmem:[#allocation2 + $0x122] sm:$0xff] %vm1270_vm6, %v2810_v14  ;;  %v3100_v44 = vmax.f32 %v2972_v38, %v3004_v62  ;;  %v2974_v55 = vld [vmem:[#allocation2 + $0xfa] sm:$0xff]  ;;  %v3099_v14 = vmax.f32 %v2971_v41, %v3003_v1  ;;  %v2941_v47 = vld [vmem:[#allocation2 + $0xf1] sm:$0xff]  ;;  %v8102_v58 = vmax.f32 %v3130_v33, %v3034_v21  ;;  %v3033_v41 = vld [vmem:[#allocation2 + $0xc4] sm:$0xff] }
 0x3f5   : > { %3515 = vrot.lane.b32.xlu1 %v8025_v53, %s6441_s29  ;;  %3513 = vrot.lane.b32.xlu0 %v8027_v52, %s6441_s29  ;;  %2882 = vst.msk [vmem:[#allocation2 + $0x12a] sm:$0xff] %vm1270_vm6, %v2812_v25  ;;  %v3006_v63 = vld [vmem:[#allocation2 + $0xfb] sm:$0xff]  ;;  %v3067_v25 = vmax.f32 %v2907_v51, %v2939_v56  ;;  %v2973_v18 = vld [vmem:[#allocation2 + $0xf2] sm:$0xff]  ;;  %v8105_v19 = vmax.f32 %v3129_v10, %v3033_v41 }
 0x3f6   : > { %v2910_v20 = vld [vmem:[#allocation2 + $0xf8] sm:$0xff]  ;;  %v3132_v51 = vmax.f32 %v3068_v39, %v3100_v44  ;;  %v3102_v56 = vmax.f32 %v2974_v55, %v3006_v63 }
 0x3f7   : > { %v2814_v4 = vpop.permute.xlu0 %2813  ;;  %v2942_v42 = vld [vmem:[#allocation2 + $0xf9] sm:$0xff]  ;;  %v3131_v38 = vmax.f32 %v3067_v25, %v3099_v14  ;;  %v2911_v3 = vld [vmem:[#allocation2 + $0x108] sm:$0xff] }
 0x3f8   : > { %v2816_v35 = vpop.permute.xlu1 %2815  ;;  %2883 = vst.msk [vmem:[#allocation2 + $0x13a] sm:$0xff] %vm1270_vm6, %v2814_v4  ;;  %v3070_v1 = vmax.f32 %v2910_v20, %v2942_v42  ;;  %v2976_v2 = vld [vmem:[#allocation2 + $0x112] sm:$0xff]  ;;  %v3069_v4 = vmax.f32 %v2909_v30, %v2941_v47  ;;  %v2943_v33 = vld [vmem:[#allocation2 + $0x109] sm:$0xff]  ;;  %v3035_v30 = vld [vmem:[#allocation2 + $0xdc] sm:$0xff] }
 0x3f9   : > { %3519 = vrot.lane.b32.xlu1 %v8033_v46, %s6441_s29  ;;  %3517 = vrot.lane.b32.xlu0 %v8035_v43, %s6441_s29  ;;  %2884 = vst.msk [vmem:[#allocation2 + $0x142] sm:$0xff] %vm1270_vm6, %v2816_v35  ;;  %v3005_v35 = vld [vmem:[#allocation2 + $0xf3] sm:$0xff]  ;;  %v3007_v39 = vld [vmem:[#allocation2 + $0x10b] sm:$0xff]  ;;  %v8115_v14 = vmax.f32 %v3131_v38, %v3035_v30  ;;  %v3071_v21 = vmax.f32 %v2911_v3, %v2943_v33 }
 0x3fa   : > { %v3008_v6 = vld [vmem:[#allocation2 + $0x113] sm:$0xff]  ;;  %v3101_v54 = vmax.f32 %v2973_v18, %v3005_v35  ;;  %v3036_v42 = vld [vmem:[#allocation2 + $0xe4] sm:$0xff]  ;;  %v3134_v47 = vmax.f32 %v3070_v1, %v3102_v56 }
 0x3fb   : > { %v2818_v50 = vpop.permute.xlu0 %2817  ;;  %v2912_v57 = vld [vmem:[#allocation2 + $0x110] sm:$0xff]  ;;  %v8112_v55 = vmax.f32 %v3132_v51, %v3036_v42  ;;  %v3104_v63 = vmax.f32 %v2976_v2, %v3008_v6  ;;  %v2913_v27 = vld [vmem:[#allocation2 + $0x120] sm:$0xff] }
 0x3fc   : > { %v2820_v62 = vpop.permute.xlu1 %2819  ;;  %2885 = vst.msk [vmem:[#allocation2 + $0x152] sm:$0xff] %vm1270_vm6, %v2818_v50  ;;  %v2944_v32 = vld [vmem:[#allocation2 + $0x111] sm:$0xff]  ;;  %v3133_v35 = vmax.f32 %v3069_v4, %v3101_v54  ;;  %v2914_v41 = vld [vmem:[#allocation2 + $0x128] sm:$0xff] }
 0x3fd   : > { %3523 = vrot.lane.b32.xlu1 %v8041_v5, %s6441_s29  ;;  %3521 = vrot.lane.b32.xlu0 %v8043_v12, %s6441_s29  ;;  %2886 = vst.msk [vmem:[#allocation2 + $0x15a] sm:$0xff] %vm1270_vm6, %v2820_v62  ;;  %v2975_v62 = vld [vmem:[#allocation2 + $0x10a] sm:$0xff]  ;;  %v3072_v18 = vmax.f32 %v2912_v57, %v2944_v32  ;;  %v2945_v51 = vld [vmem:[#allocation2 + $0x121] sm:$0xff]  ;;  %v3037_v54 = vld [vmem:[#allocation2 + $0xf4] sm:$0xff] }
 0x3fe   : > { %v2978_v10 = vld [vmem:[#allocation2 + $0x12a] sm:$0xff]  ;;  %v3103_v50 = vmax.f32 %v2975_v62, %v3007_v39  ;;  %v3038_v57 = vld [vmem:[#allocation2 + $0xfc] sm:$0xff]  ;;  %v8125_v33 = vmax.f32 %v3133_v35, %v3037_v54  ;;  %v3073_v39 = vmax.f32 %v2913_v27, %v2945_v51 }
 0x3ff   : > { %v2822_v44 = vpop.permute.xlu0 %2821  ;;  %v3010_v25 = vld [vmem:[#allocation2 + $0x12b] sm:$0xff]  ;;  %v3009_v1 = vld [vmem:[#allocation2 + $0x123] sm:$0xff]  ;;  %v8123_v56 = vmax.f32 %v3134_v47, %v3038_v57  ;;  %v3136_v3 = vmax.f32 %v3072_v18, %v3104_v63  ;;  %v2915_v17 = vld [vmem:[#allocation2 + $0x138] sm:$0xff] }
 0x400   : > { %v2824_v20 = vpop.permute.xlu1 %2823  ;;  %2887 = vst.msk [vmem:[#allocation2 + $0x16a] sm:$0xff] %vm1270_vm6, %v2822_v44  ;;  %v2946_v34 = vld [vmem:[#allocation2 + $0x129] sm:$0xff]  ;;  %v3106_v6 = vmax.f32 %v2978_v10, %v3010_v25  ;;  %v3135_v62 = vmax.f32 %v3071_v21, %v3103_v50  ;;  %v2916_v44 = vld [vmem:[#allocation2 + $0x140] sm:$0xff]  ;;  %v3040_v18 = vld [vmem:[#allocation2 + $0x114] sm:$0xff] }
 0x401   : > { %3527 = vrot.lane.b32.xlu1 %v8049_v29, %s6441_s29  ;;  %3525 = vrot.lane.b32.xlu0 %v8051_v23, %s6441_s29  ;;  %2888 = vst.msk [vmem:[#allocation2 + $0x172] sm:$0xff] %vm1270_vm6, %v2824_v20  ;;  %v2977_v20 = vld [vmem:[#allocation2 + $0x122] sm:$0xff]  ;;  %v3074_v2 = vmax.f32 %v2914_v41, %v2946_v34  ;;  %v2979_v47 = vld [vmem:[#allocation2 + $0x13a] sm:$0xff]  ;;  %v8133_v63 = vmax.f32 %v3136_v3, %v3040_v18  ;;  %v3039_v10 = vld [vmem:[#allocation2 + $0x10c] sm:$0xff] }
 0x402   : > { %v2980_v38 = vld [vmem:[#allocation2 + $0x142] sm:$0xff]  ;;  %v3105_v42 = vmax.f32 %v2977_v20, %v3009_v1  ;;  %v8135_v41 = vmax.f32 %v3135_v62, %v3039_v10 }
 0x403   : > { %v3012_v4 = vld [vmem:[#allocation2 + $0x143] sm:$0xff]  ;;  %v3011_v57 = vld [vmem:[#allocation2 + $0x13b] sm:$0xff]  ;;  %v3138_v27 = vmax.f32 %v3074_v2, %v3106_v6  ;;  %v2917_v36 = vld [vmem:[#allocation2 + $0x150] sm:$0xff]  ;;  %v8147_v0 = vpop.permute.xlu0 %2641 }
 0x404   : > { %v8121_v32 = vpop.permute.xlu1 %2593  ;;  %v2948_v30 = vld [vmem:[#allocation2 + $0x141] sm:$0xff]  ;;  %v3108_v35 = vmax.f32 %v2980_v38, %v3012_v4  ;;  %v3137_v51 = vmax.f32 %v3073_v39, %v3105_v42  ;;  %v3107_v1 = vmax.f32 %v2979_v47, %v3011_v57  ;;  %v2918_v54 = vld [vmem:[#allocation2 + $0x158] sm:$0xff]  ;;  %v3042_v2 = vld [vmem:[#allocation2 + $0x12c] sm:$0xff]  ;;  %10150 = vst [vmem:[#allocation40_spill] sm:$0xff] %v8147_v0 }
 0x405   : > { %3243 = vrot.lane.b32.xlu1 %v8102_v58, %s6440_s14  ;;  %3241 = vrot.lane.b32.xlu0 %v8105_v19, %s6440_s14  ;;  %10147 = vst [vmem:[#allocation17_spill] sm:$0xff] %v8121_v32  ;;  %v2947_v32 = vld [vmem:[#allocation2 + $0x139] sm:$0xff]  ;;  %v3076_v25 = vmax.f32 %v2916_v44, %v2948_v30  ;;  %v8141_v6 = vmax.f32 %v3138_v27, %v3042_v2  ;;  %v3041_v38 = vld [vmem:[#allocation2 + $0x124] sm:$0xff] }
 0x406   : > { %v2982_v21 = vld [vmem:[#allocation2 + $0x15a] sm:$0xff]  ;;  %v3075_v20 = vmax.f32 %v2915_v17, %v2947_v32  ;;  %v2981_v3 = vld [vmem:[#allocation2 + $0x152] sm:$0xff]  ;;  %v8145_v44 = vmax.f32 %v3137_v51, %v3041_v38 }
 0x407   : > { %v3014_v50 = vld [vmem:[#allocation2 + $0x15b] sm:$0xff]  ;;  %v3013_v18 = vld [vmem:[#allocation2 + $0x153] sm:$0xff]  ;;  %v3140_v4 = vmax.f32 %v3076_v25, %v3108_v35  ;;  %v2919_v37 = vld [vmem:[#allocation2 + $0x168] sm:$0xff]  ;;  %v8163_v38 = vpop.permute.xlu0 %2585 }
 0x408   : > { %v8131_v34 = vpop.permute.xlu1 %2657  ;;  %v2950_v9 = vld [vmem:[#allocation2 + $0x159] sm:$0xff]  ;;  %v3110_v17 = vmax.f32 %v2982_v21, %v3014_v50  ;;  %v3139_v30 = vmax.f32 %v3075_v20, %v3107_v1  ;;  %v3109_v57 = vmax.f32 %v2981_v3, %v3013_v18  ;;  %v2920_v10 = vld [vmem:[#allocation2 + $0x170] sm:$0xff]  ;;  %v3044_v35 = vld [vmem:[#allocation2 + $0x144] sm:$0xff]  ;;  %10152 = vst [vmem:[#allocation42_spill] sm:$0xff] %v8163_v38 }
 0x409   : > { %3247 = vrot.lane.b32.xlu1 %v8112_v55, %s6440_s14  ;;  %3245 = vrot.lane.b32.xlu0 %v8115_v14, %s6440_s14  ;;  %10148 = vst [vmem:[#allocation18_spill] sm:$0xff] %v8131_v34  ;;  %v2949_v34 = vld [vmem:[#allocation2 + $0x151] sm:$0xff]  ;;  %v3078_v62 = vmax.f32 %v2918_v54, %v2950_v9  ;;  %v2951_v27 = vld [vmem:[#allocation2 + $0x169] sm:$0xff]  ;;  %v8153_v21 = vmax.f32 %v3140_v4, %v3044_v35  ;;  %v3043_v50 = vld [vmem:[#allocation2 + $0x13c] sm:$0xff] }
 0x40a   : > { %v2984_v32 = vld [vmem:[#allocation2 + $0x172] sm:$0xff]  ;;  %v3077_v47 = vmax.f32 %v2917_v36, %v2949_v34  ;;  %v2983_v9 = vld [vmem:[#allocation2 + $0x16a] sm:$0xff]  ;;  %v8155_v20 = vmax.f32 %v3139_v30, %v3043_v50  ;;  %v3079_v54 = vmax.f32 %v2919_v37, %v2951_v27  ;;  %v3046_v2 = vld [vmem:[#allocation2 + $0x15c] sm:$0xff] }
 0x40b   : > { %v3016_v39 = vld [vmem:[#allocation2 + $0x173] sm:$0xff]  ;;  %v3015_v25 = vld [vmem:[#allocation2 + $0x16b] sm:$0xff]  ;;  %v3142_v36 = vmax.f32 %v3078_v62, %v3110_v17 }
 0x40c   : > { %v8143_v42 = vpop.permute.xlu1 %2643  ;;  %v2952_v28 = vld [vmem:[#allocation2 + $0x171] sm:$0xff]  ;;  %v3112_v51 = vmax.f32 %v2984_v32, %v3016_v39  ;;  %v3141_v1 = vmax.f32 %v3077_v47, %v3109_v57  ;;  %v3111_v3 = vmax.f32 %v2983_v9, %v3015_v25 }
 0x40d   : > { %3251 = vrot.lane.b32.xlu1 %v8123_v56, %s6440_s14  ;;  %3249 = vrot.lane.b32.xlu0 %v8125_v33, %s6440_s14  ;;  %10149 = vst [vmem:[#allocation25_spill] sm:$0xff] %v8143_v42  ;;  %v3080_v34 = vmax.f32 %v2920_v10, %v2952_v28  ;;  %v8165_v4 = vmax.f32 %v3142_v36, %v3046_v2  ;;  %v3045_v28 = vld [vmem:[#allocation2 + $0x154] sm:$0xff]  ;;  %v3047_v30 = vld [vmem:[#allocation2 + $0x16c] sm:$0xff]  ;;  %v8179_v10 = vpop.permute.xlu0 %2649 }
 0x40e   : > { %v8167_v17 = vmax.f32 %v3141_v1, %v3045_v28  ;;  %v3143_v32 = vmax.f32 %v3079_v54, %v3111_v3  ;;  %v3048_v37 = vld [vmem:[#allocation2 + $0x174] sm:$0xff]  ;;  %10154 = vst [vmem:[#allocation44_spill] sm:$0xff] %v8179_v10 }
 0x40f   : > { %v3144_v62 = vmax.f32 %v3080_v34, %v3112_v51 }
 0x410   : > { %v8159_v18 = vpop.permute.xlu1 %2651  ;;  %v8177_v57 = vmax.f32 %v3143_v32, %v3047_v30 }
 0x411   : > { %3255 = vrot.lane.b32.xlu1 %v8133_v63, %s6440_s14  ;;  %3253 = vrot.lane.b32.xlu0 %v8135_v41, %s6440_s14  ;;  %10151 = vst [vmem:[#allocation41_spill] sm:$0xff] %v8159_v18  ;;  %v8173_v39 = vmax.f32 %v3144_v62, %v3048_v37  ;;  %v8191_v9 = vpop.permute.xlu0 %2587 }
 0x412   : > { %10156 = vst [vmem:[#allocation46_spill] sm:$0xff] %v8191_v9 }
 0x414   : > { %v8175_v47 = vpop.permute.xlu1 %2595 }
 0x415   : > { %3259 = vrot.lane.b32.xlu1 %v8141_v6, %s6440_s14  ;;  %3257 = vrot.lane.b32.xlu0 %v8145_v44, %s6440_s14  ;;  %10153 = vst [vmem:[#allocation43_spill] sm:$0xff] %v8175_v47  ;;  %v8199_v35 = vpop.permute.xlu0 %2611 }
 0x416   : > { %10158 = vst [vmem:[#allocation48_spill] sm:$0xff] %v8199_v35 }
 0x418   : > { %v8187_v27 = vpop.permute.xlu1 %2659 }
 0x419   : > { %3263 = vrot.lane.b32.xlu1 %v8153_v21, %s6440_s14  ;;  %3261 = vrot.lane.b32.xlu0 %v8155_v20, %s6440_s14  ;;  %10155 = vst [vmem:[#allocation45_spill] sm:$0xff] %v8187_v27  ;;  %v8211_v36 = vpop.permute.xlu0 %2675 }
 0x41a   : > { %10160 = vst [vmem:[#allocation50_spill] sm:$0xff] %v8211_v36 }
 0x41c   : > { %v8197_v25 = vpop.permute.xlu1 %2603 }
 0x41d   : > { %3267 = vrot.lane.b32.xlu1 %v8165_v4, %s6440_s14  ;;  %3265 = vrot.lane.b32.xlu0 %v8167_v17, %s6440_s14  ;;  %10157 = vst [vmem:[#allocation47_spill] sm:$0xff] %v8197_v25 }
 0x420   : > { %v8207_v50 = vpop.permute.xlu1 %2667 }
 0x421   : > { %3271 = vrot.lane.b32.xlu1 %v8173_v39, %s6440_s14  ;;  %3269 = vrot.lane.b32.xlu0 %v8177_v57, %s6440_s14  ;;  %10159 = vst [vmem:[#allocation49_spill] sm:$0xff] %v8207_v50 }
 0x425   : > { %3531 = vrot.lane.b32.xlu1 %v8102_v58, %s6441_s29  ;;  %3529 = vrot.lane.b32.xlu0 %v8105_v19, %s6441_s29 }
 0x429   : > { %3535 = vrot.lane.b32.xlu1 %v8112_v55, %s6441_s29  ;;  %3533 = vrot.lane.b32.xlu0 %v8115_v14, %s6441_s29 }
 0x42d   : > { %3539 = vrot.lane.b32.xlu1 %v8123_v56, %s6441_s29  ;;  %3537 = vrot.lane.b32.xlu0 %v8125_v33, %s6441_s29 }
 0x431   : > { %3543 = vrot.lane.b32.xlu1 %v8133_v63, %s6441_s29  ;;  %3541 = vrot.lane.b32.xlu0 %v8135_v41, %s6441_s29 }
 0x433   : > { %v3212_v34 = vpop.permute.xlu1 %3211  ;;  %v3210_v51 = vpop.permute.xlu0 %3209 }
 0x434   : > { %v8230_v28 = vmax.f32 %v7984_v24, %v3212_v34  ;;  %v8233_v32 = vmax.f32 %v7987_v31, %v3210_v51 }
 0x435   : > { %3547 = vrot.lane.b32.xlu1 %v8141_v6, %s6441_s29  ;;  %3545 = vrot.lane.b32.xlu0 %v8145_v44, %s6441_s29 }
 0x437   : > { %v3214_v54 = vpop.permute.xlu0 %3213 }
 0x438   : > { %v3216_v1 = vpop.permute.xlu1 %3215  ;;  %v8243_v35 = vmax.f32 %v7997_v60, %v3214_v54 }
 0x439   : > { %3551 = vrot.lane.b32.xlu1 %v8153_v21, %s6441_s29  ;;  %3549 = vrot.lane.b32.xlu0 %v8155_v20, %s6441_s29  ;;  %v8240_v30 = vmax.f32 %v7994_v45, %v3216_v1 }
 0x43c   : > { %v3220_v3 = vpop.permute.xlu1 %3219 }
 0x43d   : > { %3555 = vrot.lane.b32.xlu1 %v8165_v4, %s6441_s29  ;;  %3553 = vrot.lane.b32.xlu0 %v8167_v17, %s6441_s29  ;;  %v3218_v2 = vpop.permute.xlu0 %3217  ;;  %v8250_v31 = vmax.f32 %v8004_v40, %v3220_v3 }
 0x43e   : > { %v8253_v51 = vmax.f32 %v8007_v13, %v3218_v2 }
 0x441   : > { %3559 = vrot.lane.b32.xlu1 %v8173_v39, %s6441_s29  ;;  %3557 = vrot.lane.b32.xlu0 %v8177_v57, %s6441_s29  ;;  %v3224_v62 = vpop.permute.xlu1 %3223  ;;  %v3222_v37 = vpop.permute.xlu0 %3221 }
 0x442   : > { %v8260_v60 = vmax.f32 %v8015_v16, %v3224_v62  ;;  %v8263_v54 = vmax.f32 %v8017_v7, %v3222_v37 }
 0x445   : > { %3371 = vrot.lane.b32.xlu1 %v8230_v28, %s6442_s15  ;;  %3369 = vrot.lane.b32.xlu0 %v8233_v32, %s6442_s15  ;;  %v3226_v24 = vpop.permute.xlu0 %3225 }
 0x446   : > { %v3228_v36 = vpop.permute.xlu1 %3227  ;;  %v8273_v2 = vmax.f32 %v8027_v52, %v3226_v24 }
 0x447   : > { %v8270_v13 = vmax.f32 %v8025_v53, %v3228_v36 }
 0x449   : > { %3375 = vrot.lane.b32.xlu1 %v8240_v30, %s6442_s15  ;;  %3373 = vrot.lane.b32.xlu0 %v8243_v35, %s6442_s15 }
 0x44a   : > { %v3232_v34 = vpop.permute.xlu1 %3231  ;;  %v3230_v45 = vpop.permute.xlu0 %3229 }
 0x44b   : > { %v8280_v7 = vmax.f32 %v8033_v46, %v3232_v34  ;;  %v8285_v37 = vmax.f32 %v8035_v43, %v3230_v45 }
 0x44d   : > { %3379 = vrot.lane.b32.xlu1 %v8250_v31, %s6442_s15  ;;  %3377 = vrot.lane.b32.xlu0 %v8253_v51, %s6442_s15 }
 0x44e   : > { %v3234_v40 = vpop.permute.xlu0 %3233 }
 0x44f   : > { %v3236_v1 = vpop.permute.xlu1 %3235  ;;  %v8299_v46 = vmax.f32 %v8043_v12, %v3234_v40 }
 0x450   : > { %v8294_v52 = vmax.f32 %v8041_v5, %v3236_v1 }
 0x451   : > { %3383 = vrot.lane.b32.xlu1 %v8260_v60, %s6442_s15  ;;  %3381 = vrot.lane.b32.xlu0 %v8263_v54, %s6442_s15 }
 0x453   : > { %v3240_v3 = vpop.permute.xlu1 %3239  ;;  %v3238_v16 = vpop.permute.xlu0 %3237 }
 0x454   : > { %v8308_v43 = vmax.f32 %v8049_v29, %v3240_v3  ;;  %v8313_v5 = vmax.f32 %v8051_v23, %v3238_v16 }
 0x455   : > { %3387 = vrot.lane.b32.xlu1 %v8270_v13, %s6442_s15  ;;  %3385 = vrot.lane.b32.xlu0 %v8273_v2, %s6442_s15 }
 0x457   : > { %v8282_v62 = vpop.permute.xlu1 %3499  ;;  %v8287_v53 = vpop.permute.xlu0 %3497 }
 0x459   : > { %3391 = vrot.lane.b32.xlu1 %v8280_v7, %s6442_s15  ;;  %3389 = vrot.lane.b32.xlu0 %v8285_v37, %s6442_s15 }
 0x45b   : > { %v8296_v36 = vpop.permute.xlu1 %3503  ;;  %v8301_v24 = vpop.permute.xlu0 %3501 }
 0x45d   : > { %3395 = vrot.lane.b32.xlu1 %v8294_v52, %s6442_s15  ;;  %3393 = vrot.lane.b32.xlu0 %v8299_v46, %s6442_s15 }
 0x45f   : > { %v8310_v34 = vpop.permute.xlu1 %3507  ;;  %v8315_v45 = vpop.permute.xlu0 %3505 }
 0x461   : > { %3399 = vrot.lane.b32.xlu1 %v8308_v43, %s6442_s15  ;;  %3397 = vrot.lane.b32.xlu0 %v8313_v5, %s6442_s15 }
 0x463   : > { %v8321_v12 = vpop.permute.xlu1 %3511  ;;  %v8323_v1 = vpop.permute.xlu0 %3509 }
 0x467   : > { %v8325_v40 = vpop.permute.xlu1 %3515  ;;  %v8327_v29 = vpop.permute.xlu0 %3513 }
 0x46b   : > { %v8329_v3 = vpop.permute.xlu1 %3519  ;;  %v8331_v23 = vpop.permute.xlu0 %3517 }
 0x46f   : > { %v8333_v16 = vpop.permute.xlu1 %3523  ;;  %v8335_v50 = vpop.permute.xlu0 %3521 }
 0x473   : > { %v8337_v27 = vpop.permute.xlu1 %3527  ;;  %v8339_v18 = vpop.permute.xlu0 %3525 }
 0x477   : > { %v3244_v10 = vpop.permute.xlu1 %3243  ;;  %v3242_v42 = vpop.permute.xlu0 %3241 }
 0x478   : > { %v8342_v25 = vmax.f32 %v8102_v58, %v3244_v10  ;;  %v8345_v0 = vmax.f32 %v8105_v19, %v3242_v42 }
 0x47a   : > { %3403 = vrot.lane.b32.xlu1 %v8342_v25, %s6442_s15  ;;  %3401 = vrot.lane.b32.xlu0 %v8345_v0, %s6442_s15 }
 0x47b   : > { %v3248_v47 = vpop.permute.xlu1 %3247  ;;  %v3246_v9 = vpop.permute.xlu0 %3245 }
 0x47c   : > { %v8352_v38 = vmax.f32 %v8112_v55, %v3248_v47  ;;  %v8355_v15 = vmax.f32 %v8115_v14, %v3246_v9 }
 0x47e   : > { %3407 = vrot.lane.b32.xlu1 %v8352_v38, %s6442_s15  ;;  %3405 = vrot.lane.b32.xlu0 %v8355_v15, %s6442_s15 }
 0x47f   : > { %v3252_v58 = vpop.permute.xlu1 %3251  ;;  %v3250_v42 = vpop.permute.xlu0 %3249 }
 0x480   : > { %v8362_v19 = vmax.f32 %v8123_v56, %v3252_v58  ;;  %v8365_v10 = vmax.f32 %v8125_v33, %v3250_v42 }
 0x482   : > { %3411 = vrot.lane.b32.xlu1 %v8362_v19, %s6442_s15  ;;  %3409 = vrot.lane.b32.xlu0 %v8365_v10, %s6442_s15 }
 0x483   : > { %v3256_v55 = vpop.permute.xlu1 %3255  ;;  %v3254_v47 = vpop.permute.xlu0 %3253 }
 0x484   : > { %v8372_v14 = vmax.f32 %v8133_v63, %v3256_v55  ;;  %v8375_v9 = vmax.f32 %v8135_v41, %v3254_v47 }
 0x486   : > { %3415 = vrot.lane.b32.xlu1 %v8372_v14, %s6442_s15  ;;  %3413 = vrot.lane.b32.xlu0 %v8375_v9, %s6442_s15 }
 0x487   : > { %v3260_v56 = vpop.permute.xlu1 %3259  ;;  %v3258_v58 = vpop.permute.xlu0 %3257 }
 0x488   : > { %v8382_v33 = vmax.f32 %v8141_v6, %v3260_v56  ;;  %v8385_v42 = vmax.f32 %v8145_v44, %v3258_v58 }
 0x48a   : > { %3419 = vrot.lane.b32.xlu1 %v8382_v33, %s6442_s15  ;;  %3417 = vrot.lane.b32.xlu0 %v8385_v42, %s6442_s15 }
 0x48b   : > { %v3264_v63 = vpop.permute.xlu1 %3263  ;;  %v3262_v55 = vpop.permute.xlu0 %3261 }
 0x48c   : > { %v8392_v41 = vmax.f32 %v8153_v21, %v3264_v63  ;;  %v8395_v47 = vmax.f32 %v8155_v20, %v3262_v55 }
 0x48e   : > { %10161 = vst [vmem:[#allocation51_spill] sm:$0xff] %v8392_v41  ;;  %10162 = vst [vmem:[#allocation52_spill] sm:$0xff] %v8395_v47  ;;  %3423 = vrot.lane.b32.xlu1 %v8392_v41, %s6442_s15  ;;  %3421 = vrot.lane.b32.xlu0 %v8395_v47, %s6442_s15 }
 0x48f   : > { %v3268_v6 = vpop.permute.xlu1 %3267  ;;  %v3266_v56 = vpop.permute.xlu0 %3265 }
 0x490   : > { %v8402_v44 = vmax.f32 %v8165_v4, %v3268_v6  ;;  %v8405_v58 = vmax.f32 %v8167_v17, %v3266_v56 }
 0x492   : > { %10163 = vst [vmem:[#allocation53_spill] sm:$0xff] %v8402_v44  ;;  %10164 = vst [vmem:[#allocation54_spill] sm:$0xff] %v8405_v58  ;;  %3427 = vrot.lane.b32.xlu1 %v8402_v44, %s6442_s15  ;;  %3425 = vrot.lane.b32.xlu0 %v8405_v58, %s6442_s15 }
 0x493   : > { %v3272_v21 = vpop.permute.xlu1 %3271  ;;  %v3270_v63 = vpop.permute.xlu0 %3269 }
 0x494   : > { %v8412_v20 = vmax.f32 %v8173_v39, %v3272_v21  ;;  %v8415_v55 = vmax.f32 %v8177_v57, %v3270_v63 }
 0x496   : > { %10165 = vst [vmem:[#allocation55_spill] sm:$0xff] %v8412_v20  ;;  %10166 = vst [vmem:[#allocation56_spill] sm:$0xff] %v8415_v55  ;;  %3431 = vrot.lane.b32.xlu1 %v8412_v20, %s6442_s15  ;;  %3429 = vrot.lane.b32.xlu0 %v8415_v55, %s6442_s15 }
 0x497   : > { %v8421_v4 = vpop.permute.xlu1 %3531  ;;  %v8423_v17 = vpop.permute.xlu0 %3529 }
 0x49b   : > { %v8425_v6 = vpop.permute.xlu1 %3535  ;;  %v8427_v56 = vpop.permute.xlu0 %3533 }
 0x49f   : > { %v8429_v39 = vpop.permute.xlu1 %3539  ;;  %v8431_v21 = vpop.permute.xlu0 %3537 }
 0x4a3   : > { %v8433_v57 = vpop.permute.xlu1 %3543  ;;  %v8435_v63 = vpop.permute.xlu0 %3541 }
 0x4a7   : > { %v8437_v26 = vpop.permute.xlu1 %3547  ;;  %v8439_v49 = vpop.permute.xlu0 %3545 }
 0x4a8   : > { %10167 = vst [vmem:[#allocation57_spill] sm:$0xff] %v8437_v26  ;;  %10168 = vst [vmem:[#allocation58_spill] sm:$0xff] %v8439_v49 }
 0x4ab   : > { %v8441_v48 = vpop.permute.xlu1 %3551  ;;  %v8443_v22 = vpop.permute.xlu0 %3549 }
 0x4ac   : > { %10169 = vst [vmem:[#allocation59_spill] sm:$0xff] %v8441_v48  ;;  %10170 = vst [vmem:[#allocation60_spill] sm:$0xff] %v8443_v22 }
 0x4af   : > { %v8445_v11 = vpop.permute.xlu1 %3555  ;;  %v8447_v61 = vpop.permute.xlu0 %3553 }
 0x4b0   : > { %10171 = vst [vmem:[#allocation61_spill] sm:$0xff] %v8445_v11 }
 0x4b3   : > { %v8449_v55 = vpop.permute.xlu1 %3559  ;;  %v8451_v20 = vpop.permute.xlu0 %3557 }
 0x4b4   : > { %10172 = vst [vmem:[#allocation62_spill] sm:$0xff] %v8449_v55  ;;  %10173 = vst [vmem:[#allocation63_spill] sm:$0xff] %v8451_v20 }
 0x4b7   : > { %v3372_v58 = vpop.permute.xlu1 %3371  ;;  %v3370_v47 = vpop.permute.xlu0 %3369 }
 0x4b8   : > { %v3466_v44 = vmax.f32 %v8230_v28, %v3372_v58  ;;  %v3465_v41 = vmax.f32 %v8233_v32, %v3370_v47 }
 0x4ba   : > { %v3594_v49 = vmax.f32 %v3466_v44, %v8282_v62  ;;  %v3593_v48 = vmax.f32 %v3465_v41, %v8287_v53 }
 0x4bb   : > { %v3376_v26 = vpop.permute.xlu1 %3375  ;;  %v3374_v11 = vpop.permute.xlu0 %3373 }
 0x4bc   : > { %v3468_v22 = vmax.f32 %v8240_v30, %v3376_v26  ;;  %4343 = vrot.lane.b32.xlu1 %v3594_v49, %s6439_s12  ;;  %v3467_v55 = vmax.f32 %v8243_v35, %v3374_v11  ;;  %4341 = vrot.lane.b32.xlu0 %v3593_v48, %s6439_s12 }
 0x4be   : > { %v3596_v20 = vmax.f32 %v3468_v22, %v8296_v36  ;;  %v3595_v28 = vmax.f32 %v3467_v55, %v8301_v24 }
 0x4bf   : > { %v3380_v58 = vpop.permute.xlu1 %3379  ;;  %v3378_v62 = vpop.permute.xlu0 %3377 }
 0x4c0   : > { %v3470_v32 = vmax.f32 %v8250_v31, %v3380_v58  ;;  %4347 = vrot.lane.b32.xlu1 %v3596_v20, %s6439_s12  ;;  %v3469_v53 = vmax.f32 %v8253_v51, %v3378_v62  ;;  %4345 = vrot.lane.b32.xlu0 %v3595_v28, %s6439_s12 }
 0x4c2   : > { %v3598_v26 = vmax.f32 %v3470_v32, %v8310_v34  ;;  %v3597_v11 = vmax.f32 %v3469_v53, %v8315_v45 }
 0x4c3   : > { %v3384_v35 = vpop.permute.xlu1 %3383  ;;  %v3382_v36 = vpop.permute.xlu0 %3381 }
 0x4c4   : > { %v3897_v30 = vcombine.low %v3594_v49, %v3598_v26  ;;  %v3898_v41 = vcombine.high %v3594_v49, %v3598_v26  ;;  %v3472_v22 = vmax.f32 %v8260_v60, %v3384_v35  ;;  %4351 = vrot.lane.b32.xlu1 %v3598_v26, %s6439_s12  ;;  %v3625_v31 = vcombine.low %v3593_v48, %v3597_v11 }
 0x4c5   : > { %v3626_v24 = vcombine.high %v3593_v48, %v3597_v11  ;;  %v3471_v47 = vmax.f32 %v8263_v54, %v3382_v36  ;;  %4349 = vrot.lane.b32.xlu0 %v3597_v11, %s6439_s12 }
 0x4c6   : > { %v3600_v51 = vmax.f32 %v3472_v22, %v8321_v12  ;;  %v8476_v45 = vrot.slane %v3897_v30, %v6864_v59  ;;  %v8481_v48 = vrot.slane %v3898_v41, %v6864_v59 }
 0x4c7   : > { %v3599_v34 = vmax.f32 %v3471_v47, %v8323_v1  ;;  %v3388_v44 = vpop.permute.xlu1 %3387  ;;  %v3386_v58 = vpop.permute.xlu0 %3385  ;;  %v3633_v1 = vrot.slane %v3625_v31, %v6864_v59  ;;  %v8494_v53 = vrot.slane %v3626_v24, %v6864_v59 }
 0x4c8   : > { %v3913_v49 = vcombine.low %v3596_v20, %v3600_v51  ;;  %v3914_v55 = vcombine.high %v3596_v20, %v3600_v51  ;;  %v3474_v60 = vmax.f32 %v8270_v13, %v3388_v44  ;;  %4355 = vrot.lane.b32.xlu1 %v3600_v51, %s6439_s12  ;;  %v3473_v12 = vmax.f32 %v8273_v2, %v3386_v58 }
 0x4c9   : > { %v3641_v54 = vcombine.low %v3595_v28, %v3599_v34  ;;  %v3642_v32 = vcombine.high %v3595_v28, %v3599_v34  ;;  %4353 = vrot.lane.b32.xlu0 %v3599_v34, %s6439_s12 }
 0x4ca   : > { %v8487_v62 = vrot.slane %v3913_v49, %v6864_v59  ;;  %v8490_v20 = vrot.slane %v3914_v55, %v6864_v59  ;;  %v3602_v13 = vmax.f32 %v3474_v60, %v8325_v40  ;;  %v3601_v2 = vmax.f32 %v3473_v12, %v8327_v29 }
 0x4cb   : > { %v3649_v26 = vrot.slane %v3641_v54, %v6864_v59  ;;  %v8498_v28 = vrot.slane %v3642_v32, %v6864_v59  ;;  %v3392_v11 = vpop.permute.xlu1 %3391  ;;  %v3390_v30 = vpop.permute.xlu0 %3389 }
 0x4cc   : > { %v3476_v35 = vmax.f32 %v8280_v7, %v3392_v11  ;;  %4359 = vrot.lane.b32.xlu1 %v3602_v13, %s6439_s12  ;;  %v3961_v41 = vcombine.low %v8476_v45, %v8487_v62  ;;  %v3962_v40 = vcombine.high %v8476_v45, %v8487_v62  ;;  %v3977_v22 = vcombine.low %v8481_v48, %v8490_v20 }
 0x4cd   : > { %v3475_v36 = vmax.f32 %v8285_v37, %v3390_v30  ;;  %4357 = vrot.lane.b32.xlu0 %v3601_v2, %s6439_s12  ;;  %v3689_v29 = vcombine.low %v3633_v1, %v3649_v26  ;;  %v3690_v31 = vcombine.high %v3633_v1, %v3649_v26  ;;  %v3705_v7 = vcombine.low %v8494_v53, %v8498_v28 }
 0x4ce   : > { %v3604_v24 = vmax.f32 %v3476_v35, %v8329_v3  ;;  %v3978_v37 = vcombine.high %v8481_v48, %v8490_v20  ;;  %v3706_v49 = vcombine.high %v8494_v53, %v8498_v28 }
 0x4cf   : > { %v3603_v47 = vmax.f32 %v3475_v36, %v8331_v23  ;;  %v3396_v51 = vpop.permute.xlu1 %3395  ;;  %v3394_v44 = vpop.permute.xlu0 %3393  ;;  %v8534_v26 = vrot.slane %v3689_v29, %v6874_v8  ;;  %v8554_v36 = vrot.slane %v3690_v31, %v6874_v8 }
 0x4d0   : > { %v3478_v34 = vmax.f32 %v8294_v52, %v3396_v51  ;;  %4363 = vrot.lane.b32.xlu1 %v3604_v24, %s6439_s12  ;;  %v3477_v55 = vmax.f32 %v8299_v46, %v3394_v44 }
 0x4d1   : > { %4361 = vrot.lane.b32.xlu0 %v3603_v47, %s6439_s12  ;;  %10174 = vst [vmem:[#allocation64_spill] sm:$0xff] %v8534_v26 }
 0x4d2   : > { %v3606_v3 = vmax.f32 %v3478_v34, %v8333_v16  ;;  %v3605_v23 = vmax.f32 %v3477_v55, %v8335_v50 }
 0x4d3   : > { %v3400_v60 = vpop.permute.xlu1 %3399  ;;  %v3398_v54 = vpop.permute.xlu0 %3397 }
 0x4d4   : > { %v3930_v58 = vcombine.high %v3602_v13, %v3606_v3  ;;  %v3480_v52 = vmax.f32 %v8308_v43, %v3400_v60  ;;  %4367 = vrot.lane.b32.xlu1 %v3606_v3, %s6439_s12  ;;  %v3658_v32 = vcombine.high %v3601_v2, %v3605_v23  ;;  %v3479_v48 = vmax.f32 %v8313_v5, %v3398_v54 }
 0x4d5   : > { %4365 = vrot.lane.b32.xlu0 %v3605_v23, %s6439_s12  ;;  %v3929_v12 = vcombine.low %v3602_v13, %v3606_v3  ;;  %v3657_v1 = vcombine.low %v3601_v2, %v3605_v23  ;;  %v8537_v5 = vrot.slane %v3977_v22, %v6874_v8  ;;  %v8563_v23 = vrot.slane %v3705_v7, %v6874_v8 }
 0x4d6   : > { %v3608_v46 = vmax.f32 %v3480_v52, %v8337_v27  ;;  %v3607_v16 = vmax.f32 %v3479_v48, %v8339_v18  ;;  %v3944_v27 = vrot.slane %v3930_v58, %v6864_v59  ;;  %v3672_v11 = vrot.slane %v3658_v32, %v6864_v59 }
 0x4d7   : > { %v8540_v13 = vrot.slane %v3929_v12, %v6864_v59  ;;  %v3665_v2 = vrot.slane %v3657_v1, %v6864_v59  ;;  %v8584_v7 = vrot.slane %v3961_v41, %v6874_v8  ;;  %v8589_v48 = vrot.slane %v3978_v37, %v6874_v8 }
 0x4d8   : > { %v3945_v20 = vcombine.low %v3604_v24, %v3608_v46  ;;  %v3946_v50 = vcombine.high %v3604_v24, %v3608_v46  ;;  %4371 = vrot.lane.b32.xlu1 %v3608_v46, %s6439_s12  ;;  %v3673_v53 = vcombine.low %v3603_v47, %v3607_v16  ;;  %v3674_v43 = vcombine.high %v3603_v47, %v3607_v16 }
 0x4d9   : > { %4369 = vrot.lane.b32.xlu0 %v3607_v16, %s6439_s12  ;;  %10177 = vst [vmem:[#allocation67_spill] sm:$0xff] %v8584_v7  ;;  %v8592_v12 = vrot.slane %v3706_v49, %v6874_v8 }
 0x4da   : > { %v8544_v18 = vrot.slane %v3945_v20, %v6864_v59  ;;  %v3960_v28 = vrot.slane %v3946_v50, %v6864_v59  ;;  %v3681_v35 = vrot.slane %v3673_v53, %v6864_v59  ;;  %v3688_v30 = vrot.slane %v3674_v43, %v6864_v59 }
 0x4dc   : > { %v3993_v22 = vcombine.low %v8540_v13, %v8544_v18  ;;  %v4009_v29 = vcombine.low %v3944_v27, %v3960_v28  ;;  %v4010_v24 = vcombine.high %v3944_v27, %v3960_v28  ;;  %v3721_v47 = vcombine.low %v3665_v2, %v3681_v35 }
 0x4dd   : > { %v3722_v51 = vcombine.high %v3665_v2, %v3681_v35  ;;  %v3737_v34 = vcombine.low %v3672_v11, %v3688_v30  ;;  %v3738_v44 = vcombine.high %v3672_v11, %v3688_v30 }
 0x4de   : > { %v8557_v55 = vrot.slane %v3993_v22, %v6874_v8  ;;  %v8560_v3 = vrot.slane %v4009_v29, %v6874_v8  ;;  %v8566_v60 = vrot.slane %v4010_v24, %v6874_v8  ;;  %v8569_v31 = vrot.slane %v3721_v47, %v6874_v8 }
 0x4df   : > { %v8572_v58 = vrot.slane %v3722_v51, %v6874_v8  ;;  %v8575_v52 = vrot.slane %v3737_v34, %v6874_v8  ;;  %v8578_v54 = vrot.slane %v3738_v44, %v6874_v8 }
 0x4e0   : > { %10175 = vst [vmem:[#allocation65_spill] sm:$0xff] %v8557_v55  ;;  %10176 = vst [vmem:[#allocation66_spill] sm:$0xff] %v8569_v31  ;;  %v4029_v32 = vcombine.low %v8537_v5, %v8560_v3  ;;  %v3754_v46 = vcombine.high %v8534_v26, %v8569_v31  ;;  %v4030_v20 = vcombine.high %v8537_v5, %v8560_v3 }
 0x4e1   : > { %v3755_v1 = vcombine.low %v8554_v36, %v8572_v58  ;;  %v3756_v16 = vcombine.high %v8554_v36, %v8572_v58  ;;  %v3757_v41 = vcombine.low %v8563_v23, %v8575_v52  ;;  %v3758_v37 = vcombine.high %v8563_v23, %v8575_v52 }
 0x4e2   : > { %v4031_v49 = vcombine.low %v8589_v48, %v8566_v60 }
 0x4ec   : > { %v3404_v2 = vpop.permute.xlu1 %3403  ;;  %v3402_v35 = vpop.permute.xlu0 %3401 }
 0x4ed   : > { %v3482_v11 = vmax.f32 %v8342_v25, %v3404_v2  ;;  %v3481_v30 = vmax.f32 %v8345_v0, %v3402_v35 }
 0x4ef   : > { %v8621_v22 = vmax.f32 %v3482_v11, %v8421_v4  ;;  %v8624_v29 = vmax.f32 %v3481_v30, %v8423_v17 }
 0x4f0   : > { %v3408_v24 = vpop.permute.xlu1 %3407  ;;  %v3406_v51 = vpop.permute.xlu0 %3405 }
 0x4f1   : > { %v3484_v47 = vmax.f32 %v8352_v38, %v3408_v24  ;;  %4375 = vrot.lane.b32.xlu1 %v8621_v22, %s6439_s12  ;;  %v3483_v34 = vmax.f32 %v8355_v15, %v3406_v51  ;;  %4373 = vrot.lane.b32.xlu0 %v8624_v29, %s6439_s12  ;;  %v10180_v51 = vld [vmem:[#allocation51_spill] sm:$0xff] }
 0x4f3   : > { %v8633_v0 = vmax.f32 %v3484_v47, %v8425_v6  ;;  %v8636_v25 = vmax.f32 %v3483_v34, %v8427_v56 }
 0x4f4   : > { %v3412_v4 = vpop.permute.xlu1 %3411  ;;  %v3410_v44 = vpop.permute.xlu0 %3409 }
 0x4f5   : > { %v3486_v17 = vmax.f32 %v8362_v19, %v3412_v4  ;;  %4379 = vrot.lane.b32.xlu1 %v8633_v0, %s6439_s12  ;;  %v3485_v38 = vmax.f32 %v8365_v10, %v3410_v44  ;;  %4377 = vrot.lane.b32.xlu0 %v8636_v25, %s6439_s12 }
 0x4f7   : > { %v8645_v15 = vmax.f32 %v3486_v17, %v8429_v39  ;;  %v8648_v6 = vmax.f32 %v3485_v38, %v8431_v21  ;;  %v10183_v38 = vld [vmem:[#allocation60_spill] sm:$0xff] }
 0x4f8   : > { %v3416_v56 = vpop.permute.xlu1 %3415  ;;  %v3414_v11 = vpop.permute.xlu0 %3413 }
 0x4f9   : > { %v3488_v2 = vmax.f32 %v8372_v14, %v3416_v56  ;;  %4383 = vrot.lane.b32.xlu1 %v8645_v15, %s6439_s12  ;;  %v3487_v19 = vmax.f32 %v8375_v9, %v3414_v11  ;;  %4381 = vrot.lane.b32.xlu0 %v8648_v6, %s6439_s12  ;;  %v10178_v9 = vld [vmem:[#allocation57_spill] sm:$0xff] }
 0x4fa   : > { %v10184_v11 = vld [vmem:[#allocation53_spill] sm:$0xff] }
 0x4fb   : > { %v8657_v10 = vmax.f32 %v3488_v2, %v8433_v57  ;;  %v8660_v39 = vmax.f32 %v3487_v19, %v8435_v63  ;;  %v10179_v57 = vld [vmem:[#allocation58_spill] sm:$0xff] }
 0x4fc   : > { %v3420_v21 = vpop.permute.xlu1 %3419  ;;  %v3418_v30 = vpop.permute.xlu0 %3417 }
 0x4fd   : > { %v3490_v35 = vmax.f32 %v8382_v33, %v3420_v21  ;;  %4387 = vrot.lane.b32.xlu1 %v8657_v10, %s6439_s12  ;;  %v3489_v14 = vmax.f32 %v8385_v42, %v3418_v30  ;;  %4385 = vrot.lane.b32.xlu0 %v8660_v39, %s6439_s12  ;;  %v10181_v33 = vld [vmem:[#allocation52_spill] sm:$0xff]  ;;  %v10182_v42 = vld [vmem:[#allocation59_spill] sm:$0xff]  ;;  %v4050_v45 = vcombine.high %v8633_v0, %v8657_v10 }
 0x4ff   : > { %v8669_v24 = vmax.f32 %v3490_v35, %v10178_v9  ;;  %v8672_v47 = vmax.f32 %v3489_v14, %v10179_v57  ;;  %v10185_v35 = vld [vmem:[#allocation54_spill] sm:$0xff]  ;;  %v10186_v14 = vld [vmem:[#allocation61_spill] sm:$0xff]  ;;  %v3777_v57 = vcombine.low %v8636_v25, %v8660_v39 }
 0x500   : > { %v3424_v63 = vpop.permute.xlu1 %3423  ;;  %v3422_v4 = vpop.permute.xlu0 %3421 }
 0x501   : > { %v3492_v34 = vmax.f32 %v10180_v51, %v3424_v63  ;;  %4391 = vrot.lane.b32.xlu1 %v8669_v24, %s6439_s12  ;;  %v3491_v17 = vmax.f32 %v10181_v33, %v3422_v4  ;;  %4389 = vrot.lane.b32.xlu0 %v8672_v47, %s6439_s12  ;;  %v10187_v4 = vld [vmem:[#allocation55_spill] sm:$0xff] }
 0x503   : > { %v8681_v44 = vmax.f32 %v3492_v34, %v10182_v42  ;;  %v8684_v56 = vmax.f32 %v3491_v17, %v10183_v38  ;;  %v4049_v34 = vcombine.low %v8633_v0, %v8657_v10  ;;  %v3761_v42 = vcombine.low %v8624_v29, %v8648_v6  ;;  %v10188_v38 = vld [vmem:[#allocation56_spill] sm:$0xff] }
 0x504   : > { %v3428_v2 = vpop.permute.xlu1 %3427  ;;  %v3426_v21 = vpop.permute.xlu0 %3425 }
 0x505   : > { %v3494_v19 = vmax.f32 %v10184_v11, %v3428_v2  ;;  %4395 = vrot.lane.b32.xlu1 %v8681_v44, %s6439_s12  ;;  %v3493_v30 = vmax.f32 %v10185_v35, %v3426_v21  ;;  %4393 = vrot.lane.b32.xlu0 %v8684_v56, %s6439_s12  ;;  %v3785_v35 = vrot.slane %v3777_v57, %v6864_v59 }
 0x507   : > { %v8693_v9 = vmax.f32 %v3494_v19, %v10186_v14  ;;  %v8698_v63 = vmax.f32 %v3493_v30, %v8447_v61  ;;  %v4033_v61 = vcombine.low %v8621_v22, %v8645_v15  ;;  %v10189_v19 = vld [vmem:[#allocation62_spill] sm:$0xff]  ;;  %v10190_v14 = vld [vmem:[#allocation63_spill] sm:$0xff] }
 0x508   : > { %v3432_v51 = vpop.permute.xlu1 %3431  ;;  %v3430_v17 = vpop.permute.xlu0 %3429 }
 0x509   : > { %v3496_v33 = vmax.f32 %v10187_v4, %v3432_v51  ;;  %4399 = vrot.lane.b32.xlu1 %v8693_v9, %s6439_s12  ;;  %v3495_v2 = vmax.f32 %v10188_v38, %v3430_v17  ;;  %4397 = vrot.lane.b32.xlu0 %v8698_v63, %s6439_s12  ;;  %v4065_v11 = vcombine.low %v8669_v24, %v8693_v9 }
 0x50a   : > { %v3793_v30 = vcombine.low %v8672_v47, %v8698_v63  ;;  %v4057_v4 = vrot.slane %v4049_v34, %v6864_v59  ;;  %v3769_v38 = vrot.slane %v3761_v42, %v6864_v59  ;;  %v4026_v42 = vcombine.high %v8584_v7, %v8557_v55 }
 0x50b   : > { %v3624_v21 = vmax.f32 %v3496_v33, %v10189_v19  ;;  %v3623_v51 = vmax.f32 %v3495_v2, %v10190_v14  ;;  %v4041_v33 = vrot.slane %v4033_v61, %v6864_v59  ;;  %v4073_v57 = vrot.slane %v4065_v11, %v6864_v59 }
 0x50c   : > { %v3994_v2 = vcombine.high %v8540_v13, %v8544_v18  ;;  %v3801_v34 = vrot.slane %v3793_v30, %v6864_v59  ;;  %v3825_v50 = vcombine.low %v3769_v38, %v3785_v35  ;;  %v3826_v18 = vcombine.high %v3769_v38, %v3785_v35 }
 0x50d   : > { %v4081_v17 = vcombine.low %v8681_v44, %v3624_v21  ;;  %4403 = vrot.lane.b32.xlu1 %v3624_v21, %s6439_s12  ;;  %v3809_v53 = vcombine.low %v8684_v56, %v3623_v51  ;;  %4401 = vrot.lane.b32.xlu0 %v3623_v51, %s6439_s12  ;;  %v4097_v28 = vcombine.low %v4041_v33, %v4057_v4 }
 0x50e   : > { %v4008_v11 = vrot.slane %v3994_v2, %v6874_v8  ;;  %v3976_v30 = vrot.slane %v3962_v40, %v6874_v8  ;;  %v4082_v2 = vcombine.high %v8681_v44, %v3624_v21  ;;  %v4098_v40 = vcombine.high %v4041_v33, %v4057_v4 }
 0x50f   : > { %v4089_v19 = vrot.slane %v4081_v17, %v6864_v59  ;;  %v3817_v14 = vrot.slane %v3809_v53, %v6864_v59  ;;  %v8737_v17 = vrot.slane %v3825_v50, %v6874_v8  ;;  %v3840_v44 = vrot.slane %v3826_v18, %v6874_v8 }
 0x510   : > { %v4027_v62 = vcombine.low %v3976_v30, %v4008_v11  ;;  %v4096_v0 = vrot.slane %v4082_v2, %v6864_v59  ;;  %v3810_v10 = vcombine.high %v8684_v56, %v3623_v51  ;;  %v3778_v4 = vcombine.high %v8636_v25, %v8660_v39 }
 0x511   : > { %v4129_v27 = vcombine.low %v4073_v57, %v4089_v19  ;;  %4227 = vrot.lane.b32.xlu0 %v4026_v42, %s6435_s28  ;;  %v3857_v61 = vcombine.low %v3801_v34, %v3817_v14  ;;  %v3858_v43 = vcombine.high %v3801_v34, %v3817_v14  ;;  %10191 = vst [vmem:[#allocation57_spill] sm:$0xff] %v8737_v17 }
 0x512   : > { %v8750_v42 = vrot.slane %v4097_v28, %v6874_v8  ;;  %v4130_v35 = vcombine.high %v4073_v57, %v4089_v19  ;;  %v4066_v28 = vcombine.high %v8669_v24, %v8693_v9  ;;  %v4064_v38 = vrot.slane %v4050_v45, %v6864_v59 }
 0x513   : > { %v8740_v13 = vrot.slane %v3857_v61, %v6874_v8  ;;  %v8743_v53 = vrot.slane %v4129_v27, %v6874_v8  ;;  %v3872_v27 = vrot.slane %v3858_v43, %v6874_v8  ;;  %v4034_v43 = vcombine.high %v8621_v22, %v8645_v15 }
 0x514   : > { %10194 = vst [vmem:[#allocation52_spill] sm:$0xff] %v8750_v42  ;;  %v8776_v9 = vrot.slane %v4130_v35, %v6874_v8  ;;  %v4080_v33 = vrot.slane %v4066_v28, %v6864_v59  ;;  %v3794_v22 = vcombine.high %v8672_v47, %v8698_v63  ;;  %v8786_v15 = vrot.slane %v4098_v40, %v6874_v8 }
 0x515   : > { %10192 = vst [vmem:[#allocation58_spill] sm:$0xff] %v8740_v13  ;;  %10193 = vst [vmem:[#allocation51_spill] sm:$0xff] %v8743_v53  ;;  %4171 = vrot.lane.b32.xlu0 %v3754_v46, %s6435_s28  ;;  %v3890_v50 = vcombine.high %v8737_v17, %v8740_v13  ;;  %v3891_v24 = vcombine.low %v3840_v44, %v3872_v27  ;;  %v3762_v56 = vcombine.high %v8624_v29, %v8648_v6 }
 0x516   : > { %v4048_v51 = vrot.slane %v4034_v43, %v6864_v59  ;;  %v3824_v57 = vrot.slane %v3810_v10, %v6864_v59  ;;  %v4164_v25 = vcombine.high %v8786_v15, %v8776_v9  ;;  %v4145_v39 = vcombine.low %v4080_v33, %v4096_v0 }
 0x517   : > { %4173 = vrot.lane.b32.xlu1 %v3890_v50, %s6435_s28  ;;  %v3792_v47 = vrot.slane %v3778_v4, %v6864_v59  ;;  %v3808_v63 = vrot.slane %v3794_v22, %v6864_v59  ;;  %v4028_v29 = vcombine.high %v3976_v30, %v4008_v11  ;;  %v3776_v19 = vrot.slane %v3762_v56, %v6864_v59 }
 0x518   : > { %v4113_v6 = vcombine.low %v4048_v51, %v4064_v38  ;;  %v3892_v34 = vcombine.high %v3840_v44, %v3872_v27  ;;  %v4153_v14 = vrot.slane %v4145_v39, %v6874_v8  ;;  %v4114_v35 = vcombine.high %v4048_v51, %v4064_v38 }
 0x519   : > { %4235 = vrot.lane.b32.xlu0 %v4027_v62, %s6434_s26  ;;  %v3841_v18 = vcombine.low %v3776_v19, %v3792_v47  ;;  %v3874_v62 = vcombine.high %v3808_v63, %v3824_v57  ;;  %v3842_v44 = vcombine.high %v3776_v19, %v3792_v47 }
 0x51a   : > { %v4121_v61 = vrot.slane %v4113_v6, %v6874_v8  ;;  %v4128_v28 = vrot.slane %v4114_v35, %v6874_v8 }
 0x51b   : > { %4181 = vrot.lane.b32.xlu1 %v3891_v24, %s6434_s26  ;;  %v3849_v2 = vrot.slane %v3841_v18, %v6874_v8 }
 0x51c   : > { %v4165_v11 = vcombine.low %v4121_v61, %v4153_v14  ;;  %v4166_v58 = vcombine.high %v4121_v61, %v4153_v14  ;;  %v4163_v61 = vcombine.low %v8786_v15, %v8776_v9 }
 0x51d   : > { %4179 = vrot.lane.b32.xlu0 %v3755_v1, %s6434_s26  ;;  %v3873_v1 = vcombine.low %v3808_v63, %v3824_v57  ;;  %v4162_v57 = vcombine.high %v8750_v42, %v8743_v53 }
 0x51f   : > { %4245 = vrot.lane.b32.xlu1 %v4164_v25, %s6433_s25  ;;  %v3881_v30 = vrot.slane %v3873_v1, %v6874_v8 }
 0x521   : > { %4243 = vrot.lane.b32.xlu0 %v4028_v29, %s6433_s25  ;;  %v3893_v50 = vcombine.low %v3849_v2, %v3881_v30  ;;  %v3894_v45 = vcombine.high %v3849_v2, %v3881_v30 }
 0x523   : > { %4189 = vrot.lane.b32.xlu1 %v3892_v34, %s6433_s25 }
 0x525   : > { %4187 = vrot.lane.b32.xlu0 %v3756_v16, %s6433_s25  ;;  %v4146_v16 = vcombine.high %v4080_v33, %v4096_v0  ;;  %v3856_v0 = vrot.slane %v3842_v44, %v6874_v8 }
 0x527   : > { %4253 = vrot.lane.b32.xlu1 %v4165_v11, %s6432_s17 }
 0x529   : > { %4251 = vrot.lane.b32.xlu0 %v4029_v32, %s6432_s17 }
 0x52b   : > { %4197 = vrot.lane.b32.xlu1 %v3893_v50, %s6432_s17 }
 0x52d   : > { %4195 = vrot.lane.b32.xlu0 %v3757_v41, %s6432_s17  ;;  %v4160_v41 = vrot.slane %v4146_v16, %v6874_v8 }
 0x52e   : > { %v4344_v36 = vpop.permute.xlu1 %4343  ;;  %v4342_v27 = vpop.permute.xlu0 %4341 }
 0x52f   : > { %4438 = vst.msk [vmem:[#allocation2 + $0xa] sm:$0xff] %vm1270_vm6, %v4344_v36  ;;  %4437 = vst.msk [vmem:[#allocation2 + $0x2] sm:$0xff] %vm1270_vm6, %v4342_v27  ;;  %4261 = vrot.lane.b32.xlu1 %v4166_v58, %s6431_s13  ;;  %v4167_v3 = vcombine.low %v4128_v28, %v4160_v41  ;;  %v4168_v47 = vcombine.high %v4128_v28, %v4160_v41 }
 0x531   : > { %4259 = vrot.lane.b32.xlu0 %v4030_v20, %s6431_s13  ;;  %v3888_v20 = vrot.slane %v3874_v62, %v6874_v8 }
 0x532   : > { %v4348_v32 = vpop.permute.xlu1 %4347  ;;  %v4346_v40 = vpop.permute.xlu0 %4345 }
 0x533   : > { %4440 = vst.msk [vmem:[#allocation2 + $0x22] sm:$0xff] %vm1270_vm6, %v4348_v32  ;;  %4439 = vst.msk [vmem:[#allocation2 + $0x1a] sm:$0xff] %vm1270_vm6, %v4346_v40  ;;  %4205 = vrot.lane.b32.xlu1 %v3894_v45, %s6431_s13  ;;  %v3895_v52 = vcombine.low %v3856_v0, %v3888_v20  ;;  %v3896_v50 = vcombine.high %v3856_v0, %v3888_v20 }
 0x535   : > { %4203 = vrot.lane.b32.xlu0 %v3758_v37, %s6431_s13 }
 0x536   : > { %v4352_v5 = vpop.permute.xlu1 %4351  ;;  %v4534_v10 = vld [vmem:[#allocation2 + $0xa] sm:$0xff] }
 0x537   : > { %4442 = vst.msk [vmem:[#allocation2 + $0x3a] sm:$0xff] %vm1270_vm6, %v4352_v5  ;;  %v4350_v43 = vpop.permute.xlu0 %4349  ;;  %4269 = vrot.lane.b32.xlu1 %v4167_v3, %s6429_s10  ;;  %v4470_v24 = vld [vmem:[#allocation2 + $0x8] sm:$0xff] }
 0x538   : > { %4441 = vst.msk [vmem:[#allocation2 + $0x32] sm:$0xff] %vm1270_vm6, %v4350_v43  ;;  %v4502_v4 = vld [vmem:[#allocation2 + $0x9] sm:$0xff] }
 0x539   : > { %v4566_v38 = vld [vmem:[#allocation2 + $0xb] sm:$0xff]  ;;  %4267 = vrot.lane.b32.xlu0 %v4031_v49, %s6429_s10  ;;  %v4630_v25 = vmax.f32 %v4470_v24, %v4502_v4 }
 0x53a   : > { %v4356_v23 = vpop.permute.xlu1 %4355  ;;  %v4536_v37 = vld [vmem:[#allocation2 + $0x22] sm:$0xff]  ;;  %v4662_v39 = vmax.f32 %v4534_v10, %v4566_v38  ;;  %v4598_v35 = vld [vmem:[#allocation2 + $0xc] sm:$0xff] }
 0x53b   : > { %4444 = vst.msk [vmem:[#allocation2 + $0x52] sm:$0xff] %vm1270_vm6, %v4356_v23  ;;  %v4354_v33 = vpop.permute.xlu0 %4353  ;;  %v4472_v22 = vld [vmem:[#allocation2 + $0x20] sm:$0xff]  ;;  %4213 = vrot.lane.b32.xlu1 %v3895_v52, %s6429_s10 }
 0x53c   : > { %v4504_v56 = vld [vmem:[#allocation2 + $0x21] sm:$0xff]  ;;  %4443 = vst.msk [vmem:[#allocation2 + $0x4a] sm:$0xff] %vm1270_vm6, %v4354_v33  ;;  %v4694_v18 = vmax.f32 %v4630_v25, %v4662_v39 }
 0x53d   : > { %v4568_v51 = vld [vmem:[#allocation2 + $0x23] sm:$0xff]  ;;  %4229 = vrot.lane.b32.xlu0 %v4162_v57, %s6435_s28  ;;  %v4632_v63 = vmax.f32 %v4472_v22, %v4504_v56 }
 0x53e   : > { %v4360_v49 = vpop.permute.xlu1 %4359  ;;  %v4664_v29 = vmax.f32 %v4536_v37, %v4568_v51  ;;  %v4538_v6 = vld [vmem:[#allocation2 + $0x3a] sm:$0xff]  ;;  %v8862_v9 = vmax.f32 %v4694_v18, %v4598_v35  ;;  %v4600_v40 = vld [vmem:[#allocation2 + $0x24] sm:$0xff] }
 0x53f   : > { %v4570_v19 = vld [vmem:[#allocation2 + $0x3b] sm:$0xff]  ;;  %4446 = vst.msk [vmem:[#allocation2 + $0x6a] sm:$0xff] %vm1270_vm6, %v4360_v49  ;;  %v4358_v34 = vpop.permute.xlu0 %4357  ;;  %4277 = vrot.lane.b32.xlu1 %v4168_v47, %s6430_s11  ;;  %v4473_v18 = vld [vmem:[#allocation2 + $0x30] sm:$0xff] }
 0x540   : > { %v4474_v14 = vld [vmem:[#allocation2 + $0x38] sm:$0xff]  ;;  %4445 = vst.msk [vmem:[#allocation2 + $0x62] sm:$0xff] %vm1270_vm6, %v4358_v34  ;;  %v4666_v30 = vmax.f32 %v4538_v6, %v4570_v19  ;;  %v4696_v36 = vmax.f32 %v4632_v63, %v4664_v29  ;;  %v4469_v63 = vld [vmem:[#allocation2] sm:$0xff] }
 0x541   : > { %v4506_v1 = vld [vmem:[#allocation2 + $0x39] sm:$0xff]  ;;  %4237 = vrot.lane.b32.xlu0 %v4163_v61, %s6434_s26  ;;  %v4501_v29 = vld [vmem:[#allocation2 + $0x1] sm:$0xff] }
 0x542   : > { %v4634_v11 = vmax.f32 %v4474_v14, %v4506_v1  ;;  %v4364_v2 = vpop.permute.xlu1 %4363  ;;  %v4540_v58 = vld [vmem:[#allocation2 + $0x52] sm:$0xff]  ;;  %v8866_v44 = vmax.f32 %v4696_v36, %v4600_v40  ;;  %v4602_v0 = vld [vmem:[#allocation2 + $0x3c] sm:$0xff]  ;;  %v4629_v40 = vmax.f32 %v4469_v63, %v4501_v29 }
 0x543   : > { %v4572_v16 = vld [vmem:[#allocation2 + $0x53] sm:$0xff]  ;;  %4448 = vst.msk [vmem:[#allocation2 + $0x82] sm:$0xff] %vm1270_vm6, %v4364_v2  ;;  %v4362_v27 = vpop.permute.xlu0 %4361  ;;  %4221 = vrot.lane.b32.xlu1 %v3896_v50, %s6430_s11  ;;  %v4533_v6 = vld [vmem:[#allocation2 + $0x2] sm:$0xff] }
 0x544   : > { %v4476_v32 = vld [vmem:[#allocation2 + $0x50] sm:$0xff]  ;;  %v4668_v41 = vmax.f32 %v4540_v58, %v4572_v16  ;;  %4447 = vst.msk [vmem:[#allocation2 + $0x7a] sm:$0xff] %vm1270_vm6, %v4362_v27  ;;  %v4698_v15 = vmax.f32 %v4634_v11, %v4666_v30  ;;  %v4565_v14 = vld [vmem:[#allocation2 + $0x3] sm:$0xff]  ;;  %v4471_v1 = vld [vmem:[#allocation2 + $0x18] sm:$0xff] }
 0x545   : > { %v4508_v45 = vld [vmem:[#allocation2 + $0x51] sm:$0xff]  ;;  %4791 = vrot.lane.b32.xlu0 %v8862_v9, %s6440_s14  ;;  %v4503_v61 = vld [vmem:[#allocation2 + $0x19] sm:$0xff] }
 0x546   : > { %v4636_v62 = vmax.f32 %v4476_v32, %v4508_v45  ;;  %v4368_v28 = vpop.permute.xlu1 %4367  ;;  %v4542_v3 = vld [vmem:[#allocation2 + $0x6a] sm:$0xff]  ;;  %v8872_v38 = vmax.f32 %v4698_v15, %v4602_v0  ;;  %v4604_v52 = vld [vmem:[#allocation2 + $0x54] sm:$0xff] }
 0x547   : > { %v4574_v20 = vld [vmem:[#allocation2 + $0x6b] sm:$0xff]  ;;  %4450 = vst.msk [vmem:[#allocation2 + $0x9a] sm:$0xff] %vm1270_vm6, %v4368_v28  ;;  %v4366_v43 = vpop.permute.xlu0 %4365  ;;  %4795 = vrot.lane.b32.xlu1 %v8866_v44, %s6440_s14  ;;  %v4535_v2 = vld [vmem:[#allocation2 + $0x1a] sm:$0xff]  ;;  %v4661_v28 = vmax.f32 %v4533_v6, %v4565_v14  ;;  %v4541_v29 = vld [vmem:[#allocation2 + $0x62] sm:$0xff] }
 0x548   : > { %v4700_v5 = vmax.f32 %v4636_v62, %v4668_v41  ;;  %v4478_v10 = vld [vmem:[#allocation2 + $0x68] sm:$0xff]  ;;  %v4670_v4 = vmax.f32 %v4542_v3, %v4574_v20  ;;  %4449 = vst.msk [vmem:[#allocation2 + $0x92] sm:$0xff] %vm1270_vm6, %v4366_v43  ;;  %v4505_v11 = vld [vmem:[#allocation2 + $0x31] sm:$0xff]  ;;  %v4567_v50 = vld [vmem:[#allocation2 + $0x1b] sm:$0xff] }
 0x549   : > { %v4510_v24 = vld [vmem:[#allocation2 + $0x69] sm:$0xff]  ;;  %4799 = vrot.lane.b32.xlu0 %v8872_v38, %s6440_s14  ;;  %v4537_v30 = vld [vmem:[#allocation2 + $0x32] sm:$0xff]  ;;  %v4633_v0 = vmax.f32 %v4473_v18, %v4505_v11  ;;  %v4509_v63 = vld [vmem:[#allocation2 + $0x61] sm:$0xff] }
 0x54a   : > { %v4638_v23 = vmax.f32 %v4478_v10, %v4510_v24  ;;  %v4372_v37 = vpop.permute.xlu1 %4371  ;;  %v8876_v33 = vmax.f32 %v4700_v5, %v4604_v52  ;;  %v4544_v56 = vld [vmem:[#allocation2 + $0x82] sm:$0xff]  ;;  %v4606_v25 = vld [vmem:[#allocation2 + $0x6c] sm:$0xff]  ;;  %v4631_v5 = vmax.f32 %v4471_v1, %v4503_v61  ;;  %v4663_v24 = vmax.f32 %v4535_v2, %v4567_v50 }
 0x54b   : > { %v4576_v51 = vld [vmem:[#allocation2 + $0x83] sm:$0xff]  ;;  %4452 = vst.msk [vmem:[#allocation2 + $0xb2] sm:$0xff] %vm1270_vm6, %v4372_v37  ;;  %v4370_v57 = vpop.permute.xlu0 %4369  ;;  %v4569_v27 = vld [vmem:[#allocation2 + $0x33] sm:$0xff] }
 0x54c   : > { %v4702_v22 = vmax.f32 %v4638_v23, %v4670_v4  ;;  %v4480_v39 = vld [vmem:[#allocation2 + $0x80] sm:$0xff]  ;;  %v4672_v47 = vmax.f32 %v4544_v56, %v4576_v51  ;;  %4451 = vst.msk [vmem:[#allocation2 + $0xaa] sm:$0xff] %vm1270_vm6, %v4370_v57  ;;  %4803 = vrot.lane.b32.xlu1 %v8876_v33, %s6440_s14  ;;  %v4665_v10 = vmax.f32 %v4537_v30, %v4569_v27  ;;  %v4475_v23 = vld [vmem:[#allocation2 + $0x48] sm:$0xff] }
 0x54d   : > { %v4512_v49 = vld [vmem:[#allocation2 + $0x81] sm:$0xff]  ;;  %v4507_v52 = vld [vmem:[#allocation2 + $0x49] sm:$0xff]  ;;  %v4695_v61 = vmax.f32 %v4631_v5, %v4663_v24 }
 0x54e   : > { %v8882_v19 = vmax.f32 %v4702_v22, %v4606_v25  ;;  %v4640_v34 = vmax.f32 %v4480_v39, %v4512_v49  ;;  %v4546_v58 = vld [vmem:[#allocation2 + $0x9a] sm:$0xff]  ;;  %v4608_v35 = vld [vmem:[#allocation2 + $0x84] sm:$0xff]  ;;  %v4693_v49 = vmax.f32 %v4629_v40, %v4661_v28  ;;  %v4697_v1 = vmax.f32 %v4633_v0, %v4665_v10 }
 0x54f   : > { %v4578_v16 = vld [vmem:[#allocation2 + $0x9b] sm:$0xff]  ;;  %v4539_v37 = vld [vmem:[#allocation2 + $0x4a] sm:$0xff]  ;;  %v4635_v2 = vmax.f32 %v4475_v23, %v4507_v52  ;;  %v4577_v40 = vld [vmem:[#allocation2 + $0x93] sm:$0xff] }
 0x550   : > { %4807 = vrot.lane.b32.xlu0 %v8882_v19, %s6440_s14  ;;  %v4704_v36 = vmax.f32 %v4640_v34, %v4672_v47  ;;  %v4482_v32 = vld [vmem:[#allocation2 + $0x98] sm:$0xff]  ;;  %v4674_v41 = vmax.f32 %v4546_v58, %v4578_v16  ;;  %v4477_v4 = vld [vmem:[#allocation2 + $0x60] sm:$0xff]  ;;  %v4571_v22 = vld [vmem:[#allocation2 + $0x4b] sm:$0xff] }
 0x551   : > { %v4514_v45 = vld [vmem:[#allocation2 + $0x99] sm:$0xff]  ;;  %v4573_v6 = vld [vmem:[#allocation2 + $0x63] sm:$0xff]  ;;  %v4637_v11 = vmax.f32 %v4477_v4, %v4509_v63  ;;  %v4667_v50 = vmax.f32 %v4539_v37, %v4571_v22 }
 0x552   : > { %v8886_v15 = vmax.f32 %v4704_v36, %v4608_v35  ;;  %v4642_v62 = vmax.f32 %v4482_v32, %v4514_v45  ;;  %v4548_v20 = vld [vmem:[#allocation2 + $0xb2] sm:$0xff]  ;;  %v4610_v56 = vld [vmem:[#allocation2 + $0x9c] sm:$0xff]  ;;  %v4597_v34 = vld [vmem:[#allocation2 + $0x4] sm:$0xff]  ;;  %v4669_v30 = vmax.f32 %v4541_v29, %v4573_v6 }
 0x553   : > { %v4580_v43 = vld [vmem:[#allocation2 + $0xb3] sm:$0xff]  ;;  %v8894_v16 = vmax.f32 %v4693_v49, %v4597_v34  ;;  %v4575_v45 = vld [vmem:[#allocation2 + $0x7b] sm:$0xff]  ;;  %v4699_v0 = vmax.f32 %v4635_v2, %v4667_v50  ;;  %v4483_v52 = vld [vmem:[#allocation2 + $0xa8] sm:$0xff] }
 0x554   : > { %4811 = vrot.lane.b32.xlu1 %v8886_v15, %s6440_s14  ;;  %v4706_v3 = vmax.f32 %v4642_v62, %v4674_v41  ;;  %v4484_v51 = vld [vmem:[#allocation2 + $0xb0] sm:$0xff]  ;;  %v4676_v25 = vmax.f32 %v4548_v20, %v4580_v43  ;;  %v4479_v36 = vld [vmem:[#allocation2 + $0x78] sm:$0xff]  ;;  %v4701_v43 = vmax.f32 %v4637_v11, %v4669_v30 }
 0x555   : > { %v4516_v57 = vld [vmem:[#allocation2 + $0xb1] sm:$0xff]  ;;  %v4511_v58 = vld [vmem:[#allocation2 + $0x79] sm:$0xff]  ;;  %v4515_v37 = vld [vmem:[#allocation2 + $0xa9] sm:$0xff] }
 0x556   : > { %v8890_v39 = vmax.f32 %v4706_v3, %v4610_v56  ;;  %v4644_v47 = vmax.f32 %v4484_v51, %v4516_v57  ;;  %v4612_v18 = vld [vmem:[#allocation2 + $0xb4] sm:$0xff]  ;;  %v4599_v5 = vld [vmem:[#allocation2 + $0x1c] sm:$0xff]  ;;  %v4639_v4 = vmax.f32 %v4479_v36, %v4511_v58  ;;  %v4547_v22 = vld [vmem:[#allocation2 + $0xaa] sm:$0xff]  ;;  %v4643_v29 = vmax.f32 %v4483_v52, %v4515_v37 }
 0x557   : > { %v4481_v35 = vld [vmem:[#allocation2 + $0x90] sm:$0xff]  ;;  %v4543_v32 = vld [vmem:[#allocation2 + $0x7a] sm:$0xff]  ;;  %v8904_v20 = vmax.f32 %v4695_v61, %v4599_v5  ;;  %v4605_v51 = vld [vmem:[#allocation2 + $0x64] sm:$0xff] }
 0x558   : > { %4815 = vrot.lane.b32.xlu0 %v8890_v39, %s6440_s14  ;;  %v4708_v14 = vmax.f32 %v4644_v47, %v4676_v25  ;;  %v4513_v41 = vld [vmem:[#allocation2 + $0x91] sm:$0xff]  ;;  %v4671_v23 = vmax.f32 %v4543_v32, %v4575_v45  ;;  %v8910_v25 = vmax.f32 %v4701_v43, %v4605_v51 }
 0x559   : > { %v4545_v62 = vld [vmem:[#allocation2 + $0x92] sm:$0xff]  ;;  %v4641_v10 = vmax.f32 %v4481_v35, %v4513_v41 }
 0x55a   : > { %v8896_v27 = vmax.f32 %v4708_v14, %v4612_v18  ;;  %v4601_v28 = vld [vmem:[#allocation2 + $0x34] sm:$0xff]  ;;  %v4673_v24 = vmax.f32 %v4545_v62, %v4577_v40  ;;  %v4579_v56 = vld [vmem:[#allocation2 + $0xab] sm:$0xff]  ;;  %v4703_v63 = vmax.f32 %v4639_v4, %v4671_v23 }
 0x55b   : > { %v8902_v3 = vmax.f32 %v4697_v1, %v4601_v28  ;;  %v4603_v57 = vld [vmem:[#allocation2 + $0x4c] sm:$0xff]  ;;  %v4675_v6 = vmax.f32 %v4547_v22, %v4579_v56  ;;  %v4609_v14 = vld [vmem:[#allocation2 + $0x94] sm:$0xff]  ;;  %v4607_v1 = vld [vmem:[#allocation2 + $0x7c] sm:$0xff] }
 0x55c   : > { %4789 = vrot.lane.b32.xlu0 %v8894_v16, %s6440_s14  ;;  %4819 = vrot.lane.b32.xlu1 %v8896_v27, %s6440_s14  ;;  %v8912_v49 = vmax.f32 %v4699_v0, %v4603_v57  ;;  %v4705_v47 = vmax.f32 %v4641_v10, %v4673_v24  ;;  %v8921_v11 = vmax.f32 %v4703_v63, %v4607_v1  ;;  %v4611_v50 = vld [vmem:[#allocation2 + $0xac] sm:$0xff] }
 0x55d   : > { %v4707_v30 = vmax.f32 %v4643_v29, %v4675_v6 }
 0x55e   : > { %v8919_v18 = vmax.f32 %v4705_v47, %v4609_v14 }
 0x55f   : > { %v8929_v58 = vmax.f32 %v4707_v30, %v4611_v50 }
 0x560   : > { %4797 = vrot.lane.b32.xlu0 %v8902_v3, %s6440_s14  ;;  %4793 = vrot.lane.b32.xlu1 %v8904_v20, %s6440_s14 }
 0x563   : > { %v4376_v34 = vpop.permute.xlu1 %4375  ;;  %v4374_v61 = vpop.permute.xlu0 %4373 }
 0x564   : > { %4805 = vrot.lane.b32.xlu0 %v8910_v25, %s6440_s14  ;;  %4801 = vrot.lane.b32.xlu1 %v8912_v49, %s6440_s14  ;;  %4454 = vst.msk [vmem:[#allocation2 + $0xca] sm:$0xff] %vm1270_vm6, %v4376_v34  ;;  %4453 = vst.msk [vmem:[#allocation2 + $0xc2] sm:$0xff] %vm1270_vm6, %v4374_v61 }
 0x567   : > { %v4380_v2 = vpop.permute.xlu1 %4379  ;;  %v4378_v36 = vpop.permute.xlu0 %4377 }
 0x568   : > { %4813 = vrot.lane.b32.xlu0 %v8919_v18, %s6440_s14  ;;  %4809 = vrot.lane.b32.xlu1 %v8921_v11, %s6440_s14  ;;  %4456 = vst.msk [vmem:[#allocation2 + $0xe2] sm:$0xff] %vm1270_vm6, %v4380_v2  ;;  %4455 = vst.msk [vmem:[#allocation2 + $0xda] sm:$0xff] %vm1270_vm6, %v4378_v36 }
 0x56b   : > { %v4384_v35 = vpop.permute.xlu1 %4383  ;;  %v4382_v32 = vpop.permute.xlu0 %4381  ;;  %v4486_v10 = vld [vmem:[#allocation2 + $0xc8] sm:$0xff] }
 0x56c   : > { %5079 = vrot.lane.b32.xlu0 %v8862_v9, %s6441_s29  ;;  %4817 = vrot.lane.b32.xlu1 %v8929_v58, %s6440_s14  ;;  %4458 = vst.msk [vmem:[#allocation2 + $0xfa] sm:$0xff] %vm1270_vm6, %v4384_v35  ;;  %4457 = vst.msk [vmem:[#allocation2 + $0xf2] sm:$0xff] %vm1270_vm6, %v4382_v32  ;;  %v4550_v24 = vld [vmem:[#allocation2 + $0xca] sm:$0xff] }
 0x56d   : > { %v4582_v4 = vld [vmem:[#allocation2 + $0xcb] sm:$0xff] }
 0x56e   : > { %v4518_v23 = vld [vmem:[#allocation2 + $0xc9] sm:$0xff]  ;;  %v4678_v14 = vmax.f32 %v4550_v24, %v4582_v4 }
 0x56f   : > { %v4388_v45 = vpop.permute.xlu1 %4387  ;;  %v4386_v41 = vpop.permute.xlu0 %4385  ;;  %v4552_v52 = vld [vmem:[#allocation2 + $0xe2] sm:$0xff]  ;;  %v4646_v34 = vmax.f32 %v4486_v10, %v4518_v23  ;;  %v4614_v10 = vld [vmem:[#allocation2 + $0xcc] sm:$0xff]  ;;  %v4487_v13 = vld [vmem:[#allocation2 + $0xd8] sm:$0xff] }
 0x570   : > { %5087 = vrot.lane.b32.xlu0 %v8872_v38, %s6441_s29  ;;  %5083 = vrot.lane.b32.xlu1 %v8866_v44, %s6441_s29  ;;  %4460 = vst.msk [vmem:[#allocation2 + $0x112] sm:$0xff] %vm1270_vm6, %v4388_v45  ;;  %4459 = vst.msk [vmem:[#allocation2 + $0x10a] sm:$0xff] %vm1270_vm6, %v4386_v41  ;;  %v4584_v37 = vld [vmem:[#allocation2 + $0xe3] sm:$0xff]  ;;  %v4519_v17 = vld [vmem:[#allocation2 + $0xd9] sm:$0xff] }
 0x571   : > { %v4488_v22 = vld [vmem:[#allocation2 + $0xe0] sm:$0xff]  ;;  %v4680_v1 = vmax.f32 %v4552_v52, %v4584_v37  ;;  %v4647_v31 = vmax.f32 %v4487_v13, %v4519_v17 }
 0x572   : > { %v4520_v56 = vld [vmem:[#allocation2 + $0xe1] sm:$0xff] }
 0x573   : > { %v4392_v62 = vpop.permute.xlu1 %4391  ;;  %v4390_v40 = vpop.permute.xlu0 %4389  ;;  %v4554_v51 = vld [vmem:[#allocation2 + $0xfa] sm:$0xff]  ;;  %v4648_v61 = vmax.f32 %v4488_v22, %v4520_v56 }
 0x574   : > { %5095 = vrot.lane.b32.xlu0 %v8882_v19, %s6441_s29  ;;  %5091 = vrot.lane.b32.xlu1 %v8876_v33, %s6441_s29  ;;  %4462 = vst.msk [vmem:[#allocation2 + $0x12a] sm:$0xff] %vm1270_vm6, %v4392_v62  ;;  %4461 = vst.msk [vmem:[#allocation2 + $0x122] sm:$0xff] %vm1270_vm6, %v4390_v40  ;;  %v4490_v47 = vld [vmem:[#allocation2 + $0xf8] sm:$0xff]  ;;  %v4710_v62 = vmax.f32 %v4646_v34, %v4678_v14 }
 0x575   : > { %v4522_v63 = vld [vmem:[#allocation2 + $0xf9] sm:$0xff] }
 0x576   : > { %v4586_v29 = vld [vmem:[#allocation2 + $0xfb] sm:$0xff]  ;;  %v4650_v30 = vmax.f32 %v4490_v47, %v4522_v63 }
 0x577   : > { %v4396_v28 = vpop.permute.xlu1 %4395  ;;  %v4394_v5 = vpop.permute.xlu0 %4393  ;;  %v4682_v2 = vmax.f32 %v4554_v51, %v4586_v29  ;;  %v4556_v50 = vld [vmem:[#allocation2 + $0x112] sm:$0xff]  ;;  %v8980_v51 = vmax.f32 %v4710_v62, %v4614_v10  ;;  %v4581_v62 = vld [vmem:[#allocation2 + $0xc3] sm:$0xff] }
 0x578   : > { %5103 = vrot.lane.b32.xlu0 %v8890_v39, %s6441_s29  ;;  %5099 = vrot.lane.b32.xlu1 %v8886_v15, %s6441_s29  ;;  %4464 = vst.msk [vmem:[#allocation2 + $0x142] sm:$0xff] %vm1270_vm6, %v4396_v28  ;;  %4463 = vst.msk [vmem:[#allocation2 + $0x13a] sm:$0xff] %vm1270_vm6, %v4394_v5  ;;  %v4588_v36 = vld [vmem:[#allocation2 + $0x113] sm:$0xff] }
 0x579   : > { %v4492_v35 = vld [vmem:[#allocation2 + $0x110] sm:$0xff]  ;;  %v4684_v4 = vmax.f32 %v4556_v50, %v4588_v36 }
 0x57a   : > { %v4524_v32 = vld [vmem:[#allocation2 + $0x111] sm:$0xff] }
 0x57b   : > { %v4400_v43 = vpop.permute.xlu1 %4399  ;;  %v4398_v0 = vpop.permute.xlu0 %4397  ;;  %v4558_v45 = vld [vmem:[#allocation2 + $0x12a] sm:$0xff]  ;;  %v4652_v24 = vmax.f32 %v4492_v35, %v4524_v32  ;;  %v4517_v32 = vld [vmem:[#allocation2 + $0xc1] sm:$0xff] }
 0x57c   : > { %5077 = vrot.lane.b32.xlu0 %v8894_v16, %s6441_s29  ;;  %5107 = vrot.lane.b32.xlu1 %v8896_v27, %s6441_s29  ;;  %4466 = vst.msk [vmem:[#allocation2 + $0x15a] sm:$0xff] %vm1270_vm6, %v4400_v43  ;;  %4465 = vst.msk [vmem:[#allocation2 + $0x152] sm:$0xff] %vm1270_vm6, %v4398_v0  ;;  %v4494_v40 = vld [vmem:[#allocation2 + $0x128] sm:$0xff]  ;;  %v4712_v43 = vmax.f32 %v4648_v61, %v4680_v1  ;;  %v4714_v0 = vmax.f32 %v4650_v30, %v4682_v2  ;;  %v4618_v61 = vld [vmem:[#allocation2 + $0xfc] sm:$0xff] }
 0x57d   : > { %v4526_v28 = vld [vmem:[#allocation2 + $0x129] sm:$0xff]  ;;  %v4485_v30 = vld [vmem:[#allocation2 + $0xc0] sm:$0xff]  ;;  %v4716_v36 = vmax.f32 %v4652_v24, %v4684_v4  ;;  %v4620_v24 = vld [vmem:[#allocation2 + $0x114] sm:$0xff] }
 0x57e   : > { %v4590_v5 = vld [vmem:[#allocation2 + $0x12b] sm:$0xff]  ;;  %v4654_v23 = vmax.f32 %v4494_v40, %v4526_v28  ;;  %v8990_v50 = vmax.f32 %v4714_v0, %v4618_v61  ;;  %v4583_v0 = vld [vmem:[#allocation2 + $0xdb] sm:$0xff] }
 0x57f   : > { %v4404_v57 = vpop.permute.xlu1 %4403  ;;  %v4402_v6 = vpop.permute.xlu0 %4401  ;;  %v4686_v52 = vmax.f32 %v4558_v45, %v4590_v5  ;;  %v4560_v37 = vld [vmem:[#allocation2 + $0x142] sm:$0xff]  ;;  %v4622_v4 = vld [vmem:[#allocation2 + $0x12c] sm:$0xff] }
 0x580   : > { %5085 = vrot.lane.b32.xlu0 %v8902_v3, %s6441_s29  ;;  %5081 = vrot.lane.b32.xlu1 %v8904_v20, %s6441_s29  ;;  %4468 = vst.msk [vmem:[#allocation2 + $0x172] sm:$0xff] %vm1270_vm6, %v4404_v57  ;;  %4467 = vst.msk [vmem:[#allocation2 + $0x16a] sm:$0xff] %vm1270_vm6, %v4402_v6  ;;  %v4592_v22 = vld [vmem:[#allocation2 + $0x143] sm:$0xff] }
 0x581   : > { %v4496_v57 = vld [vmem:[#allocation2 + $0x140] sm:$0xff]  ;;  %v4718_v35 = vmax.f32 %v4654_v23, %v4686_v52  ;;  %v4688_v5 = vmax.f32 %v4560_v37, %v4592_v22  ;;  %v4489_v23 = vld [vmem:[#allocation2 + $0xf0] sm:$0xff]  ;;  %v9000_v52 = vmax.f32 %v4716_v36, %v4620_v24  ;;  %v4645_v22 = vmax.f32 %v4485_v30, %v4517_v32  ;;  %v4491_v32 = vld [vmem:[#allocation2 + $0x108] sm:$0xff] }
 0x582   : > { %v4528_v47 = vld [vmem:[#allocation2 + $0x141] sm:$0xff]  ;;  %v4587_v24 = vld [vmem:[#allocation2 + $0x10b] sm:$0xff] }
 0x583   : > { %v8972_v41 = vpop.permute.xlu0 %4227  ;;  %v4562_v63 = vld [vmem:[#allocation2 + $0x15a] sm:$0xff]  ;;  %v4616_v1 = vld [vmem:[#allocation2 + $0xe4] sm:$0xff]  ;;  %v4656_v28 = vmax.f32 %v4496_v57, %v4528_v47  ;;  %v9002_v37 = vmax.f32 %v4718_v35, %v4622_v4  ;;  %v4521_v47 = vld [vmem:[#allocation2 + $0xf1] sm:$0xff] }
 0x584   : > { %5093 = vrot.lane.b32.xlu0 %v8910_v25, %s6441_s29  ;;  %5089 = vrot.lane.b32.xlu1 %v8912_v49, %s6441_s29  ;;  %10195 = vst [vmem:[#allocation59_spill] sm:$0xff] %v8972_v41  ;;  %v4498_v29 = vld [vmem:[#allocation2 + $0x158] sm:$0xff]  ;;  %v8988_v2 = vmax.f32 %v4712_v43, %v4616_v1  ;;  %v4549_v45 = vld [vmem:[#allocation2 + $0xc2] sm:$0xff]  ;;  %v4649_v30 = vmax.f32 %v4489_v23, %v4521_v47 }
 0x585   : > { %v4530_v6 = vld [vmem:[#allocation2 + $0x159] sm:$0xff]  ;;  %v4677_v57 = vmax.f32 %v4549_v45, %v4581_v62  ;;  %v4523_v45 = vld [vmem:[#allocation2 + $0x109] sm:$0xff] }
 0x586   : > { %v4594_v34 = vld [vmem:[#allocation2 + $0x15b] sm:$0xff]  ;;  %v4658_v10 = vmax.f32 %v4498_v29, %v4530_v6  ;;  %v4585_v29 = vld [vmem:[#allocation2 + $0xf3] sm:$0xff]  ;;  %v4555_v62 = vld [vmem:[#allocation2 + $0x10a] sm:$0xff] }
 0x587   : > { %v8978_v56 = vpop.permute.xlu0 %4171  ;;  %v4690_v46 = vmax.f32 %v4562_v63, %v4594_v34  ;;  %v4564_v21 = vld [vmem:[#allocation2 + $0x172] sm:$0xff]  ;;  %v4551_v1 = vld [vmem:[#allocation2 + $0xda] sm:$0xff]  ;;  %v4720_v34 = vmax.f32 %v4656_v28, %v4688_v5  ;;  %v4624_v28 = vld [vmem:[#allocation2 + $0x144] sm:$0xff] }
 0x588   : > { %5101 = vrot.lane.b32.xlu0 %v8919_v18, %s6441_s29  ;;  %5097 = vrot.lane.b32.xlu1 %v8921_v11, %s6441_s29  ;;  %10196 = vst [vmem:[#allocation60_spill] sm:$0xff] %v8978_v56  ;;  %v4532_v53 = vld [vmem:[#allocation2 + $0x171] sm:$0xff]  ;;  %v4679_v35 = vmax.f32 %v4551_v1, %v4583_v0  ;;  %v4589_v4 = vld [vmem:[#allocation2 + $0x123] sm:$0xff] }
 0x589   : > { %v8982_v14 = vpop.permute.xlu1 %4173  ;;  %v4596_v43 = vld [vmem:[#allocation2 + $0x173] sm:$0xff]  ;;  %v9014_v17 = vmax.f32 %v4720_v34, %v4624_v28  ;;  %v4613_v1 = vld [vmem:[#allocation2 + $0xc4] sm:$0xff]  ;;  %v4651_v34 = vmax.f32 %v4491_v32, %v4523_v45 }
 0x58a   : > { %10197 = vst [vmem:[#allocation53_spill] sm:$0xff] %v8982_v14  ;;  %v4500_v14 = vld [vmem:[#allocation2 + $0x170] sm:$0xff]  ;;  %v4711_v47 = vmax.f32 %v4647_v31, %v4679_v35  ;;  %v4615_v35 = vld [vmem:[#allocation2 + $0xdc] sm:$0xff] }
 0x58b   : > { %v8992_v40 = vpop.permute.xlu0 %4235  ;;  %v4553_v63 = vld [vmem:[#allocation2 + $0xf2] sm:$0xff]  ;;  %v4660_v42 = vmax.f32 %v4500_v14, %v4532_v53  ;;  %v4493_v53 = vld [vmem:[#allocation2 + $0x120] sm:$0xff]  ;;  %v4709_v14 = vmax.f32 %v4645_v22, %v4677_v57  ;;  %v4683_v22 = vmax.f32 %v4555_v62, %v4587_v24 }
 0x58c   : > { %5105 = vrot.lane.b32.xlu1 %v8929_v58, %s6441_s29  ;;  %4823 = vrot.lane.b32.xlu0 %v8980_v51, %s6440_s14  ;;  %10198 = vst [vmem:[#allocation54_spill] sm:$0xff] %v8992_v40  ;;  %v4692_v40 = vmax.f32 %v4564_v21, %v4596_v43  ;;  %v4681_v36 = vmax.f32 %v4553_v63, %v4585_v29  ;;  %v4557_v43 = vld [vmem:[#allocation2 + $0x122] sm:$0xff]  ;;  %v4628_v63 = vld [vmem:[#allocation2 + $0x174] sm:$0xff] }
 0x58d   : > { %v8994_v61 = vpop.permute.xlu1 %4181  ;;  %v9026_v28 = vmax.f32 %v4709_v14, %v4613_v1  ;;  %v4561_v56 = vld [vmem:[#allocation2 + $0x152] sm:$0xff]  ;;  %v9038_v45 = vmax.f32 %v4711_v47, %v4615_v35  ;;  %v4715_v24 = vmax.f32 %v4651_v34, %v4683_v22  ;;  %v4531_v1 = vld [vmem:[#allocation2 + $0x169] sm:$0xff] }
 0x58e   : > { %10199 = vst [vmem:[#allocation61_spill] sm:$0xff] %v8994_v61  ;;  %v4722_v61 = vmax.f32 %v4658_v10, %v4690_v46  ;;  %v4626_v46 = vld [vmem:[#allocation2 + $0x15c] sm:$0xff]  ;;  %v4724_v5 = vmax.f32 %v4660_v42, %v4692_v40  ;;  %v4713_v0 = vmax.f32 %v4649_v30, %v4681_v36  ;;  %v4593_v30 = vld [vmem:[#allocation2 + $0x153] sm:$0xff] }
 0x58f   : > { %v9004_v6 = vpop.permute.xlu0 %4179  ;;  %v4525_v10 = vld [vmem:[#allocation2 + $0x121] sm:$0xff]  ;;  %v4495_v42 = vld [vmem:[#allocation2 + $0x138] sm:$0xff]  ;;  %v4619_v47 = vld [vmem:[#allocation2 + $0x10c] sm:$0xff] }
 0x590   : > { %4827 = vrot.lane.b32.xlu1 %v8988_v2, %s6440_s14  ;;  %4831 = vrot.lane.b32.xlu0 %v8990_v50, %s6440_s14  ;;  %10200 = vst [vmem:[#allocation55_spill] sm:$0xff] %v9004_v6  ;;  %v9016_v13 = vmax.f32 %v4722_v61, %v4626_v46  ;;  %v4653_v29 = vmax.f32 %v4493_v53, %v4525_v10  ;;  %v4527_v40 = vld [vmem:[#allocation2 + $0x139] sm:$0xff]  ;;  %v4529_v6 = vld [vmem:[#allocation2 + $0x151] sm:$0xff] }
 0x591   : > { %v9006_v26 = vpop.permute.xlu1 %4245  ;;  %v4685_v61 = vmax.f32 %v4557_v43, %v4589_v4  ;;  %v9028_v46 = vmax.f32 %v4724_v5, %v4628_v63  ;;  %v4617_v36 = vld [vmem:[#allocation2 + $0xf4] sm:$0xff]  ;;  %v4689_v5 = vmax.f32 %v4561_v56, %v4593_v30  ;;  %v4655_v10 = vmax.f32 %v4495_v42, %v4527_v40  ;;  %v4499_v4 = vld [vmem:[#allocation2 + $0x168] sm:$0xff]  ;;  %v4623_v42 = vld [vmem:[#allocation2 + $0x13c] sm:$0xff] }
 0x592   : > { %10201 = vst [vmem:[#allocation56_spill] sm:$0xff] %v9006_v26  ;;  %v4559_v26 = vld [vmem:[#allocation2 + $0x13a] sm:$0xff]  ;;  %v9036_v32 = vmax.f32 %v4713_v0, %v4617_v36  ;;  %v4563_v63 = vld [vmem:[#allocation2 + $0x16a] sm:$0xff] }
 0x593   : > { %v9012_v21 = vpop.permute.xlu0 %4243  ;;  %v4717_v62 = vmax.f32 %v4653_v29, %v4685_v61  ;;  %v4621_v0 = vld [vmem:[#allocation2 + $0x124] sm:$0xff]  ;;  %v4625_v22 = vld [vmem:[#allocation2 + $0x154] sm:$0xff] }
 0x594   : > { %4835 = vrot.lane.b32.xlu1 %v9000_v52, %s6440_s14  ;;  %4839 = vrot.lane.b32.xlu0 %v9002_v37, %s6440_s14  ;;  %10202 = vst [vmem:[#allocation62_spill] sm:$0xff] %v9012_v21  ;;  %v4591_v21 = vld [vmem:[#allocation2 + $0x13b] sm:$0xff] }
 0x595   : > { %v9018_v23 = vpop.permute.xlu1 %4189  ;;  %v4687_v43 = vmax.f32 %v4559_v26, %v4591_v21  ;;  %v9048_v29 = vmax.f32 %v4717_v62, %v4621_v0 }
 0x596   : > { %10203 = vst [vmem:[#allocation63_spill] sm:$0xff] %v9018_v23  ;;  %v4497_v23 = vld [vmem:[#allocation2 + $0x150] sm:$0xff] }
 0x597   : > { %v9024_v57 = vpop.permute.xlu0 %4187  ;;  %v4657_v14 = vmax.f32 %v4497_v23, %v4529_v6  ;;  %v9050_v6 = vmax.f32 %v4715_v24, %v4619_v47  ;;  %v4719_v21 = vmax.f32 %v4655_v10, %v4687_v43  ;;  %v4659_v23 = vmax.f32 %v4499_v4, %v4531_v1 }
 0x598   : > { %4843 = vrot.lane.b32.xlu1 %v9014_v17, %s6440_s14  ;;  %4847 = vrot.lane.b32.xlu0 %v9016_v13, %s6440_s14  ;;  %10204 = vst [vmem:[#allocation68_spill] sm:$0xff] %v9024_v57 }
 0x599   : > { %v9030_v31 = vpop.permute.xlu1 %4253  ;;  %v4721_v26 = vmax.f32 %v4657_v14, %v4689_v5  ;;  %v9064_v36 = vmax.f32 %v4719_v21, %v4623_v42 }
 0x59a   : > { %10205 = vst [vmem:[#allocation69_spill] sm:$0xff] %v9030_v31  ;;  %v4595_v31 = vld [vmem:[#allocation2 + $0x16b] sm:$0xff] }
 0x59b   : > { %v9040_v53 = vpop.permute.xlu0 %4251  ;;  %v4691_v61 = vmax.f32 %v4563_v63, %v4595_v31  ;;  %v9062_v30 = vmax.f32 %v4721_v26, %v4625_v22  ;;  %v4627_v31 = vld [vmem:[#allocation2 + $0x16c] sm:$0xff] }
 0x59c   : > { %4821 = vrot.lane.b32.xlu0 %v9026_v28, %s6440_s14  ;;  %4851 = vrot.lane.b32.xlu1 %v9028_v46, %s6440_s14  ;;  %10206 = vst [vmem:[#allocation70_spill] sm:$0xff] %v9040_v53 }
 0x59d   : > { %v9042_v57 = vpop.permute.xlu1 %4197  ;;  %v4723_v35 = vmax.f32 %v4659_v23, %v4691_v61 }
 0x59e   : > { %10207 = vst [vmem:[#allocation71_spill] sm:$0xff] %v9042_v57 }
 0x59f   : > { %v9052_v56 = vpop.permute.xlu0 %4195  ;;  %v9074_v14 = vmax.f32 %v4723_v35, %v4627_v31 }
 0x5a0   : > { %4829 = vrot.lane.b32.xlu0 %v9036_v32, %s6440_s14  ;;  %4825 = vrot.lane.b32.xlu1 %v9038_v45, %s6440_s14  ;;  %10208 = vst [vmem:[#allocation72_spill] sm:$0xff] %v9052_v56 }
 0x5a1   : > { %v9054_v34 = vpop.permute.xlu1 %4261 }
 0x5a2   : > { %10209 = vst [vmem:[#allocation73_spill] sm:$0xff] %v9054_v34 }
 0x5a3   : > { %v9060_v40 = vpop.permute.xlu0 %4259 }
 0x5a4   : > { %4837 = vrot.lane.b32.xlu0 %v9048_v29, %s6440_s14  ;;  %4833 = vrot.lane.b32.xlu1 %v9050_v6, %s6440_s14  ;;  %10210 = vst [vmem:[#allocation74_spill] sm:$0xff] %v9060_v40 }
 0x5a5   : > { %v9066_v62 = vpop.permute.xlu1 %4205 }
 0x5a6   : > { %10211 = vst [vmem:[#allocation75_spill] sm:$0xff] %v9066_v62 }
 0x5a7   : > { %v9072_v24 = vpop.permute.xlu0 %4203 }
 0x5a8   : > { %4845 = vrot.lane.b32.xlu0 %v9062_v30, %s6440_s14  ;;  %4841 = vrot.lane.b32.xlu1 %v9064_v36, %s6440_s14  ;;  %10212 = vst [vmem:[#allocation76_spill] sm:$0xff] %v9072_v24 }
 0x5a9   : > { %v9076_v5 = vpop.permute.xlu1 %4269 }
 0x5aa   : > { %10213 = vst [vmem:[#allocation77_spill] sm:$0xff] %v9076_v5 }
 0x5ab   : > { %v9082_v10 = vpop.permute.xlu0 %4267 }
 0x5ac   : > { %5111 = vrot.lane.b32.xlu0 %v8980_v51, %s6441_s29  ;;  %4849 = vrot.lane.b32.xlu1 %v9074_v14, %s6440_s14  ;;  %10214 = vst [vmem:[#allocation78_spill] sm:$0xff] %v9082_v10 }
 0x5ad   : > { %v9084_v43 = vpop.permute.xlu1 %4213 }
 0x5ae   : > { %10215 = vst [vmem:[#allocation79_spill] sm:$0xff] %v9084_v43 }
 0x5af   : > { %v9090_v4 = vpop.permute.xlu0 %4229 }
 0x5b0   : > { %5119 = vrot.lane.b32.xlu0 %v8990_v50, %s6441_s29  ;;  %5115 = vrot.lane.b32.xlu1 %v8988_v2, %s6441_s29  ;;  %10216 = vst [vmem:[#allocation80_spill] sm:$0xff] %v9090_v4 }
 0x5b1   : > { %v9092_v1 = vpop.permute.xlu1 %4277 }
 0x5b2   : > { %10217 = vst [vmem:[#allocation81_spill] sm:$0xff] %v9092_v1 }
 0x5b3   : > { %v9098_v63 = vpop.permute.xlu0 %4237 }
 0x5b4   : > { %5127 = vrot.lane.b32.xlu0 %v9002_v37, %s6441_s29  ;;  %5123 = vrot.lane.b32.xlu1 %v9000_v52, %s6441_s29  ;;  %10218 = vst [vmem:[#allocation82_spill] sm:$0xff] %v9098_v63 }
 0x5b5   : > { %v9104_v0 = vpop.permute.xlu1 %4221 }
 0x5b6   : > { %10219 = vst [vmem:[#allocation83_spill] sm:$0xff] %v9104_v0 }
 0x5b7   : > { %v4792_v47 = vpop.permute.xlu0 %4791 }
 0x5b8   : > { %5135 = vrot.lane.b32.xlu0 %v9016_v13, %s6441_s29  ;;  %5131 = vrot.lane.b32.xlu1 %v9014_v17, %s6441_s29  ;;  %v9123_v22 = vmax.f32 %v8862_v9, %v4792_v47 }
 0x5b9   : > { %v4796_v26 = vpop.permute.xlu1 %4795 }
 0x5ba   : > { %v9130_v31 = vmax.f32 %v8866_v44, %v4796_v26 }
 0x5bb   : > { %v4800_v21 = vpop.permute.xlu0 %4799 }
 0x5bc   : > { %5109 = vrot.lane.b32.xlu0 %v9026_v28, %s6441_s29  ;;  %5139 = vrot.lane.b32.xlu1 %v9028_v46, %s6441_s29  ;;  %v9133_v0 = vmax.f32 %v8872_v38, %v4800_v21 }
 0x5be   : > { %v4804_v23 = vpop.permute.xlu1 %4803 }
 0x5bf   : > { %v9140_v9 = vmax.f32 %v8876_v33, %v4804_v23 }
 0x5c0   : > { %5117 = vrot.lane.b32.xlu0 %v9036_v32, %s6441_s29  ;;  %5113 = vrot.lane.b32.xlu1 %v9038_v45, %s6441_s29 }
 0x5c2   : > { %v4808_v61 = vpop.permute.xlu0 %4807 }
 0x5c3   : > { %v9143_v47 = vmax.f32 %v8882_v19, %v4808_v61 }
 0x5c4   : > { %5125 = vrot.lane.b32.xlu0 %v9048_v29, %s6441_s29  ;;  %5121 = vrot.lane.b32.xlu1 %v9050_v6, %s6441_s29 }
 0x5c6   : > { %v4812_v42 = vpop.permute.xlu1 %4811 }
 0x5c7   : > { %v9150_v38 = vmax.f32 %v8886_v15, %v4812_v42 }
 0x5c8   : > { %5133 = vrot.lane.b32.xlu0 %v9062_v30, %s6441_s29  ;;  %5129 = vrot.lane.b32.xlu1 %v9064_v36, %s6441_s29 }
 0x5ca   : > { %v4816_v35 = vpop.permute.xlu0 %4815 }
 0x5cb   : > { %v9153_v26 = vmax.f32 %v8890_v39, %v4816_v35 }
 0x5cc   : > { %5137 = vrot.lane.b32.xlu1 %v9074_v14, %s6441_s29  ;;  %4951 = vrot.lane.b32.xlu0 %v9123_v22, %s6442_s15 }
 0x5ce   : > { %v4820_v1 = vpop.permute.xlu1 %4819  ;;  %v4790_v43 = vpop.permute.xlu0 %4789 }
 0x5cf   : > { %v9160_v19 = vmax.f32 %v8896_v27, %v4820_v1  ;;  %v9163_v23 = vmax.f32 %v8894_v16, %v4790_v43 }
 0x5d0   : > { %4955 = vrot.lane.b32.xlu1 %v9130_v31, %s6442_s15  ;;  %4959 = vrot.lane.b32.xlu0 %v9133_v0, %s6442_s15 }
 0x5d2   : > { %v4794_v62 = vpop.permute.xlu1 %4793  ;;  %v4798_v44 = vpop.permute.xlu0 %4797 }
 0x5d3   : > { %v9170_v39 = vmax.f32 %v8904_v20, %v4794_v62  ;;  %v9173_v42 = vmax.f32 %v8902_v3, %v4798_v44 }
 0x5d4   : > { %4963 = vrot.lane.b32.xlu1 %v9140_v9, %s6442_s15  ;;  %4967 = vrot.lane.b32.xlu0 %v9143_v47, %s6442_s15 }
 0x5d6   : > { %v4802_v21 = vpop.permute.xlu1 %4801  ;;  %v4806_v33 = vpop.permute.xlu0 %4805 }
 0x5d7   : > { %v9182_v16 = vmax.f32 %v8912_v49, %v4802_v21  ;;  %v9185_v43 = vmax.f32 %v8910_v25, %v4806_v33 }
 0x5d8   : > { %4971 = vrot.lane.b32.xlu1 %v9150_v38, %s6442_s15  ;;  %4975 = vrot.lane.b32.xlu0 %v9153_v26, %s6442_s15 }
 0x5da   : > { %v4810_v61 = vpop.permute.xlu1 %4809  ;;  %v4814_v15 = vpop.permute.xlu0 %4813 }
 0x5db   : > { %v9196_v3 = vmax.f32 %v8921_v11, %v4810_v61  ;;  %v9199_v1 = vmax.f32 %v8919_v18, %v4814_v15 }
 0x5dc   : > { %4979 = vrot.lane.b32.xlu1 %v9160_v19, %s6442_s15  ;;  %4949 = vrot.lane.b32.xlu0 %v9163_v23, %s6442_s15 }
 0x5de   : > { %v4818_v35 = vpop.permute.xlu1 %4817  ;;  %v9175_v27 = vpop.permute.xlu0 %5079 }
 0x5df   : > { %v9210_v44 = vmax.f32 %v8929_v58, %v4818_v35 }
 0x5e0   : > { %4953 = vrot.lane.b32.xlu1 %v9170_v39, %s6442_s15  ;;  %4957 = vrot.lane.b32.xlu0 %v9173_v42, %s6442_s15 }
 0x5e2   : > { %v9187_v20 = vpop.permute.xlu1 %5083  ;;  %v9189_v62 = vpop.permute.xlu0 %5087 }
 0x5e4   : > { %4961 = vrot.lane.b32.xlu1 %v9182_v16, %s6442_s15  ;;  %4965 = vrot.lane.b32.xlu0 %v9185_v43, %s6442_s15 }
 0x5e6   : > { %v9201_v49 = vpop.permute.xlu1 %5091  ;;  %v9203_v25 = vpop.permute.xlu0 %5095 }
 0x5e8   : > { %4969 = vrot.lane.b32.xlu1 %v9196_v3, %s6442_s15  ;;  %4973 = vrot.lane.b32.xlu0 %v9199_v1, %s6442_s15 }
 0x5ea   : > { %v9212_v21 = vpop.permute.xlu1 %5099  ;;  %v9214_v11 = vpop.permute.xlu0 %5103 }
 0x5ec   : > { %4977 = vrot.lane.b32.xlu1 %v9210_v44, %s6442_s15 }
 0x5ee   : > { %v9218_v18 = vpop.permute.xlu1 %5107  ;;  %v9220_v33 = vpop.permute.xlu0 %5077 }
 0x5f2   : > { %v9222_v61 = vpop.permute.xlu1 %5081  ;;  %v9224_v15 = vpop.permute.xlu0 %5085 }
 0x5f6   : > { %v9226_v57 = vpop.permute.xlu1 %5089  ;;  %v9228_v5 = vpop.permute.xlu0 %5093 }
 0x5fa   : > { %v9230_v58 = vpop.permute.xlu1 %5097  ;;  %v9232_v35 = vpop.permute.xlu0 %5101 }
 0x5fe   : > { %v9234_v34 = vpop.permute.xlu1 %5105  ;;  %v4824_v63 = vpop.permute.xlu0 %4823 }
 0x5ff   : > { %v9237_v4 = vmax.f32 %v8980_v51, %v4824_v63 }
 0x601   : > { %4983 = vrot.lane.b32.xlu0 %v9237_v4, %s6442_s15 }
 0x602   : > { %v4828_v10 = vpop.permute.xlu1 %4827  ;;  %v4832_v24 = vpop.permute.xlu0 %4831 }
 0x603   : > { %v9242_v40 = vmax.f32 %v8988_v2, %v4828_v10  ;;  %v9245_v56 = vmax.f32 %v8990_v50, %v4832_v24 }
 0x605   : > { %4987 = vrot.lane.b32.xlu1 %v9242_v40, %s6442_s15  ;;  %4991 = vrot.lane.b32.xlu0 %v9245_v56, %s6442_s15 }
 0x606   : > { %v4836_v53 = vpop.permute.xlu1 %4835  ;;  %v4840_v51 = vpop.permute.xlu0 %4839 }
 0x607   : > { %v9252_v63 = vmax.f32 %v9000_v52, %v4836_v53  ;;  %v9255_v55 = vmax.f32 %v9002_v37, %v4840_v51 }
 0x609   : > { %4995 = vrot.lane.b32.xlu1 %v9252_v63, %s6442_s15  ;;  %4999 = vrot.lane.b32.xlu0 %v9255_v55, %s6442_s15 }
 0x60a   : > { %v4844_v2 = vpop.permute.xlu1 %4843  ;;  %v4848_v50 = vpop.permute.xlu0 %4847 }
 0x60b   : > { %v9262_v24 = vmax.f32 %v9014_v17, %v4844_v2  ;;  %v9265_v10 = vmax.f32 %v9016_v13, %v4848_v50 }
 0x60d   : > { %5003 = vrot.lane.b32.xlu1 %v9262_v24, %s6442_s15  ;;  %5007 = vrot.lane.b32.xlu0 %v9265_v10, %s6442_s15 }
 0x60e   : > { %v4852_v52 = vpop.permute.xlu1 %4851  ;;  %v4822_v37 = vpop.permute.xlu0 %4821 }
 0x60f   : > { %v9272_v53 = vmax.f32 %v9028_v46, %v4852_v52  ;;  %v9275_v51 = vmax.f32 %v9026_v28, %v4822_v37 }
 0x611   : > { %10220 = vst [vmem:[#allocation84_spill] sm:$0xff] %v9275_v51  ;;  %5011 = vrot.lane.b32.xlu1 %v9272_v53, %s6442_s15  ;;  %4981 = vrot.lane.b32.xlu0 %v9275_v51, %s6442_s15 }
 0x612   : > { %v4826_v17 = vpop.permute.xlu1 %4825  ;;  %v4830_v13 = vpop.permute.xlu0 %4829 }
 0x613   : > { %v9282_v2 = vmax.f32 %v9038_v45, %v4826_v17  ;;  %v9285_v50 = vmax.f32 %v9036_v32, %v4830_v13 }
 0x615   : > { %10221 = vst [vmem:[#allocation85_spill] sm:$0xff] %v9282_v2  ;;  %10222 = vst [vmem:[#allocation86_spill] sm:$0xff] %v9285_v50  ;;  %4985 = vrot.lane.b32.xlu1 %v9282_v2, %s6442_s15  ;;  %4989 = vrot.lane.b32.xlu0 %v9285_v50, %s6442_s15  ;;  %v10242_v50 = vld [vmem:[#allocation37_spill] sm:$0xff] }
 0x616   : > { %v4834_v28 = vpop.permute.xlu1 %4833  ;;  %v4838_v46 = vpop.permute.xlu0 %4837  ;;  %v10243_v2 = vld [vmem:[#allocation33_spill] sm:$0xff] }
 0x617   : > { %v9292_v52 = vmax.f32 %v9050_v6, %v4834_v28  ;;  %v9295_v37 = vmax.f32 %v9048_v29, %v4838_v46  ;;  %v10244_v7 = vcombine.low %v10242_v50, %v10243_v2  ;;  %v10252_v2 = vld [vmem:[#allocation21_spill] sm:$0xff] }
 0x619   : > { %10223 = vst [vmem:[#allocation87_spill] sm:$0xff] %v9292_v52  ;;  %10224 = vst [vmem:[#allocation88_spill] sm:$0xff] %v9295_v37  ;;  %4993 = vrot.lane.b32.xlu1 %v9292_v52, %s6442_s15  ;;  %4997 = vrot.lane.b32.xlu0 %v9295_v37, %s6442_s15  ;;  %v10236_v37 = vld [vmem:[#allocation23_spill] sm:$0xff] }
 0x61a   : > { %v4842_v32 = vpop.permute.xlu1 %4841  ;;  %v4846_v45 = vpop.permute.xlu0 %4845 }
 0x61b   : > { %v9302_v17 = vmax.f32 %v9064_v36, %v4842_v32  ;;  %v9305_v13 = vmax.f32 %v9062_v30, %v4846_v45  ;;  %v10228_v30 = vcombine.high %v8589_v48, %v8566_v60  ;;  %v10229_v32 = vcombine.low %v8592_v12, %v8578_v54  ;;  %v10231_v45 = vld [vmem:[#allocation13_spill] sm:$0xff]  ;;  %v10233_v60 = vld [vmem:[#allocation26_spill] sm:$0xff]  ;;  %v10234_v48 = vld [vmem:[#allocation28_spill] sm:$0xff] }
 0x61d   : > { %10225 = vst [vmem:[#allocation89_spill] sm:$0xff] %v9302_v17  ;;  %10226 = vst [vmem:[#allocation90_spill] sm:$0xff] %v9305_v13  ;;  %5001 = vrot.lane.b32.xlu1 %v9302_v17, %s6442_s15  ;;  %5005 = vrot.lane.b32.xlu0 %v9305_v13, %s6442_s15  ;;  %v10237_v13 = vld [vmem:[#allocation14_spill] sm:$0xff] }
 0x61e   : > { %v4850_v29 = vpop.permute.xlu1 %4849  ;;  %v9311_v6 = vpop.permute.xlu0 %5111  ;;  %v10238_v51 = vcombine.low %v10236_v37, %v10237_v13 }
 0x61f   : > { %v9314_v28 = vmax.f32 %v9074_v14, %v4850_v29  ;;  %v10230_v14 = vld [vmem:[#allocation16_spill] sm:$0xff] }
 0x620   : > { %v10232_v29 = vcombine.high %v10230_v14, %v10231_v45  ;;  %v10239_v14 = vld [vmem:[#allocation36_spill] sm:$0xff] }
 0x621   : > { %10227 = vst [vmem:[#allocation91_spill] sm:$0xff] %v9314_v28  ;;  %5009 = vrot.lane.b32.xlu1 %v9314_v28, %s6442_s15  ;;  %4275 = vrot.lane.b32.xlu0 %v10228_v30, %s6430_s11  ;;  %v10235_v30 = vcombine.high %v10233_v60, %v10234_v48  ;;  %v10240_v45 = vld [vmem:[#allocation32_spill] sm:$0xff] }
 0x622   : > { %v9322_v36 = vpop.permute.xlu1 %5115  ;;  %v9324_v46 = vpop.permute.xlu0 %5119 }
 0x625   : > { %4211 = vrot.lane.b32.xlu1 %v10229_v32, %s6429_s10  ;;  %2619 = vrot.lane.b32.xlu0 %v10232_v29, %s6431_s13  ;;  %v10241_v29 = vcombine.low %v10239_v14, %v10240_v45 }
 0x626   : > { %v9334_v28 = vpop.permute.xlu1 %5123  ;;  %v9336_v17 = vpop.permute.xlu0 %5127 }
 0x629   : > { %2601 = vrot.lane.b32.xlu1 %v10235_v30, %s6433_s25  ;;  %2683 = vrot.lane.b32.xlu0 %v10238_v51, %s6429_s10  ;;  %v10247_v51 = vcombine.high %v8592_v12, %v8578_v54  ;;  %v10248_v30 = vcombine.high %v10239_v14, %v10240_v45  ;;  %v10256_v54 = vcombine.high %v10236_v37, %v10237_v13 }
 0x62a   : > { %v9346_v32 = vpop.permute.xlu1 %5131  ;;  %v9348_v52 = vpop.permute.xlu0 %5135 }
 0x62d   : > { %2665 = vrot.lane.b32.xlu1 %v10241_v29, %s6432_s17  ;;  %2609 = vrot.lane.b32.xlu0 %v10244_v7, %s6432_s17  ;;  %v10251_v7 = vld [vmem:[#allocation24_spill] sm:$0xff] }
 0x62e   : > { %v9358_v60 = vpop.permute.xlu1 %5139  ;;  %v9360_v48 = vpop.permute.xlu0 %5109  ;;  %v10253_v50 = vcombine.low %v10251_v7, %v10252_v2 }
 0x62f   : > { %10245 = vst [vmem:[#allocation16_spill] sm:$0xff] %v9358_v60  ;;  %10246 = vst [vmem:[#allocation13_spill] sm:$0xff] %v9360_v48 }
 0x631   : > { %4219 = vrot.lane.b32.xlu1 %v10247_v51, %s6430_s11  ;;  %2673 = vrot.lane.b32.xlu0 %v10248_v30, %s6431_s13 }
 0x632   : > { %v9370_v29 = vpop.permute.xlu1 %5113  ;;  %v9372_v41 = vpop.permute.xlu0 %5117 }
 0x633   : > { %10249 = vst [vmem:[#allocation26_spill] sm:$0xff] %v9370_v29  ;;  %10250 = vst [vmem:[#allocation28_spill] sm:$0xff] %v9372_v41 }
 0x635   : > { %2627 = vrot.lane.b32.xlu1 %v10253_v50, %s6429_s10 }
 0x636   : > { %v9378_v48 = vpop.permute.xlu1 %5121  ;;  %v9380_v60 = vpop.permute.xlu0 %5125 }
 0x637   : > { %10254 = vst [vmem:[#allocation23_spill] sm:$0xff] %v9378_v48  ;;  %10255 = vst [vmem:[#allocation14_spill] sm:$0xff] %v9380_v60 }
 0x639   : > { %2691 = vrot.lane.b32.xlu1 %v10256_v54, %s6430_s11 }
 0x63a   : > { %v9386_v12 = vpop.permute.xlu1 %5129  ;;  %v9388_v14 = vpop.permute.xlu0 %5133 }
 0x63b   : > { %10257 = vst [vmem:[#allocation36_spill] sm:$0xff] %v9386_v12  ;;  %10258 = vst [vmem:[#allocation32_spill] sm:$0xff] %v9388_v14 }
 0x63e   : > { %v9390_v45 = vpop.permute.xlu1 %5137  ;;  %v4952_v51 = vpop.permute.xlu0 %4951 }
 0x63f   : > { %10259 = vst [vmem:[#allocation92_spill] sm:$0xff] %v9390_v45  ;;  %v5046_v37 = vmax.f32 %v9123_v22, %v4952_v51 }
 0x642   : > { %v4956_v30 = vpop.permute.xlu1 %4955  ;;  %v4960_v41 = vpop.permute.xlu0 %4959 }
 0x643   : > { %v5048_v60 = vmax.f32 %v9130_v31, %v4956_v30  ;;  %v5050_v29 = vmax.f32 %v9133_v0, %v4960_v41  ;;  %v9408_v31 = vmax.f32 %v5046_v37, %v9175_v27 }
 0x645   : > { %v9401_v14 = vmax.f32 %v5048_v60, %v9187_v20  ;;  %v9404_v48 = vmax.f32 %v5050_v29, %v9189_v62 }
 0x646   : > { %v4964_v2 = vpop.permute.xlu1 %4963  ;;  %v4968_v50 = vpop.permute.xlu0 %4967 }
 0x647   : > { %v5052_v7 = vmax.f32 %v9140_v9, %v4964_v2  ;;  %v5054_v9 = vmax.f32 %v9143_v47, %v4968_v50  ;;  %v5477_v20 = vcombine.low %v9408_v31, %v9404_v48 }
 0x649   : > { %v9397_v13 = vmax.f32 %v5052_v7, %v9201_v49  ;;  %v9419_v62 = vmax.f32 %v5054_v9, %v9203_v25  ;;  %v9434_v7 = vrot.slane %v5477_v20, %v6864_v59 }
 0x64a   : > { %v4972_v54 = vpop.permute.xlu1 %4971  ;;  %v4976_v12 = vpop.permute.xlu0 %4975 }
 0x64b   : > { %v5058_v45 = vmax.f32 %v9153_v26, %v4976_v12  ;;  %v5493_v41 = vcombine.low %v9401_v14, %v9397_v13  ;;  %v5056_v0 = vmax.f32 %v9150_v38, %v4972_v54 }
 0x64d   : > { %v9414_v22 = vmax.f32 %v5058_v45, %v9214_v11  ;;  %v9423_v27 = vrot.slane %v5493_v41, %v6864_v59  ;;  %v9426_v2 = vmax.f32 %v5056_v0, %v9212_v21 }
 0x64e   : > { %v4980_v26 = vpop.permute.xlu1 %4979  ;;  %v4950_v49 = vpop.permute.xlu0 %4949 }
 0x64f   : > { %v5060_v47 = vmax.f32 %v9160_v19, %v4980_v26  ;;  %v5509_v38 = vcombine.low %v9419_v62, %v9414_v22  ;;  %v5541_v25 = vcombine.low %v9434_v7, %v9423_v27  ;;  %v5045_v54 = vmax.f32 %v9163_v23, %v4950_v49 }
 0x651   : > { %v9431_v11 = vmax.f32 %v5060_v47, %v9218_v18  ;;  %v9441_v21 = vrot.slane %v5509_v38, %v6864_v59  ;;  %v9454_v26 = vrot.slane %v5541_v25, %v6874_v8 }
 0x652   : > { %v4954_v60 = vpop.permute.xlu1 %4953  ;;  %v4958_v29 = vpop.permute.xlu0 %4957 }
 0x653   : > { %v5525_v19 = vcombine.low %v9426_v2, %v9431_v11  ;;  %v5047_v51 = vmax.f32 %v9170_v39, %v4954_v60  ;;  %v5049_v30 = vmax.f32 %v9173_v42, %v4958_v29 }
 0x655   : > { %v9444_v12 = vrot.slane %v5525_v19, %v6864_v59  ;;  %v5175_v39 = vmax.f32 %v5047_v51, %v9222_v61  ;;  %v5177_v42 = vmax.f32 %v5049_v30, %v9224_v15 }
 0x656   : > { %v4962_v45 = vpop.permute.xlu1 %4961  ;;  %v4966_v18 = vpop.permute.xlu0 %4965 }
 0x657   : > { %v5051_v50 = vmax.f32 %v9182_v16, %v4962_v45  ;;  %v5573_v37 = vcombine.low %v9441_v21, %v9444_v12  ;;  %v5053_v47 = vmax.f32 %v9185_v43, %v4966_v18 }
 0x659   : > { %v5179_v9 = vmax.f32 %v5051_v50, %v9226_v57  ;;  %v9457_v20 = vrot.slane %v5573_v37, %v6874_v8  ;;  %v5173_v57 = vmax.f32 %v5045_v54, %v9220_v33 }
 0x65a   : > { %v4970_v41 = vpop.permute.xlu1 %4969  ;;  %v4974_v0 = vpop.permute.xlu0 %4973 }
 0x65b   : > { %v5057_v16 = vmax.f32 %v9199_v1, %v4974_v0  ;;  %v5606_v23 = vcombine.high %v9454_v26, %v9457_v20  ;;  %v5221_v49 = vcombine.low %v5175_v39, %v5179_v9  ;;  %v5055_v38 = vmax.f32 %v9196_v3, %v4970_v41 }
 0x65c   : > { %v5605_v61 = vcombine.low %v9454_v26, %v9457_v20  ;;  %v5205_v15 = vcombine.low %v5173_v57, %v5177_v42  ;;  %v5181_v1 = vmax.f32 %v5053_v47, %v9228_v5  ;;  %v5222_v51 = vcombine.high %v5175_v39, %v5179_v9 }
 0x65d   : > { %v5185_v60 = vmax.f32 %v5057_v16, %v9232_v35  ;;  %5807 = vrot.lane.b32.xlu0 %v5606_v23, %s6435_s28  ;;  %v5229_v19 = vrot.slane %v5221_v49, %v6864_v59  ;;  %v5183_v33 = vmax.f32 %v5055_v38, %v9230_v58  ;;  %v5526_v58 = vcombine.high %v9426_v2, %v9431_v11 }
 0x65e   : > { %v4978_v29 = vpop.permute.xlu1 %4977  ;;  %v5213_v35 = vrot.slane %v5205_v15, %v6864_v59  ;;  %v5206_v41 = vcombine.high %v5173_v57, %v5177_v42  ;;  %v5542_v16 = vcombine.high %v9434_v7, %v9423_v27  ;;  %v5510_v47 = vcombine.high %v9419_v62, %v9414_v22 }
 0x65f   : > { %v5059_v43 = vmax.f32 %v9210_v44, %v4978_v29  ;;  %v5237_v25 = vcombine.low %v5181_v1, %v5185_v60  ;;  %v5238_v37 = vcombine.high %v5181_v1, %v5185_v60  ;;  %v5494_v44 = vcombine.high %v9401_v14, %v9397_v13 }
 0x660   : > { %v5270_v30 = vcombine.high %v5213_v35, %v5229_v19  ;;  %v5269_v50 = vcombine.low %v5213_v35, %v5229_v19  ;;  %v9493_v14 = vrot.slane %v5222_v51, %v6864_v59  ;;  %v5478_v27 = vcombine.high %v9408_v31, %v9404_v48 }
 0x661   : > { %v5187_v3 = vmax.f32 %v5059_v43, %v9234_v34  ;;  %v5245_v54 = vrot.slane %v5237_v25, %v6864_v59  ;;  %v5574_v34 = vcombine.high %v9441_v21, %v9444_v12  ;;  %v9497_v2 = vrot.slane %v5238_v37, %v6864_v59 }
 0x662   : > { %v5284_v13 = vrot.slane %v5270_v30, %v6874_v8  ;;  %v9501_v21 = vrot.slane %v5269_v50, %v6874_v8  ;;  %v5540_v22 = vrot.slane %v5526_v58, %v6864_v59  ;;  %v5220_v62 = vrot.slane %v5206_v41, %v6864_v59 }
 0x663   : > { %v5253_v45 = vcombine.low %v5183_v33, %v5187_v3  ;;  %v5254_v18 = vcombine.high %v5183_v33, %v5187_v3  ;;  %v5588_v57 = vrot.slane %v5574_v34, %v6874_v8  ;;  %v5508_v49 = vrot.slane %v5494_v44, %v6864_v59 }
 0x664   : > { %v5524_v48 = vrot.slane %v5510_v47, %v6864_v59  ;;  %v5285_v31 = vcombine.low %v5220_v62, %v9493_v14  ;;  %v5556_v60 = vrot.slane %v5542_v16, %v6874_v8  ;;  %v5492_v29 = vrot.slane %v5478_v27, %v6864_v59 }
 0x665   : > { %v5261_v5 = vrot.slane %v5253_v45, %v6864_v59  ;;  %v9486_v0 = vrot.slane %v5254_v18, %v6864_v59 }
 0x666   : > { %v5589_v15 = vcombine.low %v5524_v48, %v5540_v22  ;;  %v5608_v1 = vcombine.high %v5556_v60, %v5588_v57  ;;  %v5607_v43 = vcombine.low %v5556_v60, %v5588_v57  ;;  %v5557_v33 = vcombine.low %v5492_v29, %v5508_v49  ;;  %v10262_v57 = vld [vmem:[#allocation20_spill] sm:$0xff] }
 0x667   : > { %v5301_v9 = vcombine.low %v5245_v54, %v5261_v5  ;;  %v5302_v39 = vcombine.high %v5245_v54, %v5261_v5  ;;  %v5317_v7 = vcombine.low %v9497_v2, %v9486_v0  ;;  %v5293_v25 = vrot.slane %v5285_v31, %v6874_v8 }
 0x668   : > { %v5590_v35 = vcombine.high %v5524_v48, %v5540_v22  ;;  %v5597_v51 = vrot.slane %v5589_v15, %v6874_v8  ;;  %v5558_v30 = vcombine.high %v5492_v29, %v5508_v49  ;;  %v5565_v50 = vrot.slane %v5557_v33, %v6874_v8  ;;  %v10264_v15 = vld [vmem:[#allocation42_spill] sm:$0xff]  ;;  %v10268_v33 = vld [vmem:[#allocation43_spill] sm:$0xff] }
 0x669   : > { %v5316_v11 = vrot.slane %v5302_v39, %v6874_v8  ;;  %v9504_v12 = vrot.slane %v5301_v9, %v6874_v8  ;;  %v5325_v19 = vrot.slane %v5317_v7, %v6874_v8  ;;  %v5318_v47 = vcombine.high %v9497_v2, %v9486_v0 }
 0x66a   : > { %v5609_v5 = vcombine.low %v5565_v50, %v5597_v51  ;;  %v5610_v44 = vcombine.high %v5565_v50, %v5597_v51  ;;  %v5604_v58 = vrot.slane %v5590_v35, %v6874_v8  ;;  %v5572_v41 = vrot.slane %v5558_v30, %v6874_v8  ;;  %v10271_v51 = vld [vmem:[#allocation29_spill] sm:$0xff] }
 0x66b   : > { %v5335_v42 = vcombine.low %v5284_v13, %v5316_v11  ;;  %v5334_v23 = vcombine.high %v9501_v21, %v9504_v12  ;;  %v5333_v38 = vcombine.low %v9501_v21, %v9504_v12  ;;  %v5336_v45 = vcombine.high %v5284_v13, %v5316_v11 }
 0x66c   : > { %v5337_v18 = vcombine.low %v5293_v25, %v5325_v19  ;;  %v5612_v16 = vcombine.high %v5572_v41, %v5604_v58  ;;  %v5338_v27 = vcombine.high %v5293_v25, %v5325_v19  ;;  %v5286_v22 = vcombine.high %v5220_v62, %v9493_v14  ;;  %v10261_v62 = vld [vmem:[#allocation15_spill] sm:$0xff] }
 0x66d   : > { %5759 = vrot.lane.b32.xlu1 %v5335_v42, %s6434_s26  ;;  %5751 = vrot.lane.b32.xlu0 %v5334_v23, %s6435_s28  ;;  %v5611_v2 = vcombine.low %v5572_v41, %v5604_v58  ;;  %v10263_v49 = vcombine.low %v10261_v62, %v10262_v57  ;;  %v10277_v41 = vld [vmem:[#allocation47_spill] sm:$0xff]  ;;  %v10283_v62 = vld [vmem:[#allocation49_spill] sm:$0xff] }
 0x671   : > { %5823 = vrot.lane.b32.xlu1 %v5608_v1, %s6433_s25  ;;  %5815 = vrot.lane.b32.xlu0 %v5607_v43, %s6434_s26  ;;  %v10265_v1 = vld [vmem:[#allocation30_spill] sm:$0xff]  ;;  %v10266_v43 = vld [vmem:[#allocation31_spill] sm:$0xff] }
 0x672   : > { %v10267_v19 = vcombine.low %v10265_v1, %v10266_v43  ;;  %v10289_v43 = vld [vmem:[#allocation60_spill] sm:$0xff] }
 0x673   : > { %v4984_v3 = vpop.permute.xlu0 %4983 }
 0x674   : > { %v5062_v7 = vmax.f32 %v9237_v4, %v4984_v3  ;;  %v5332_v4 = vrot.slane %v5318_v47, %v6874_v8 }
 0x675   : > { %5767 = vrot.lane.b32.xlu1 %v5336_v45, %s6433_s25  ;;  %5775 = vrot.lane.b32.xlu0 %v5337_v18, %s6432_s17  ;;  %v10269_v45 = vld [vmem:[#allocation40_spill] sm:$0xff]  ;;  %v10270_v18 = vld [vmem:[#allocation27_spill] sm:$0xff] }
 0x676   : > { %v9564_v31 = vmax.f32 %v5062_v7, %v9311_v6  ;;  %v2695_v6 = vsel %vm394_vm0, %v10267_v19, %v10264_v15  ;;  %v10272_v30 = vcombine.low %v10270_v18, %v10271_v51  ;;  %v10288_v15 = vld [vmem:[#allocation48_spill] sm:$0xff]  ;;  %v10294_v51 = vld [vmem:[#allocation85_spill] sm:$0xff] }
 0x677   : > { %v4988_v37 = vpop.permute.xlu1 %4987  ;;  %v4992_v54 = vpop.permute.xlu0 %4991  ;;  %v10290_v19 = vld [vmem:[#allocation64_spill] sm:$0xff] }
 0x678   : > { %v5064_v13 = vmax.f32 %v9242_v40, %v4988_v37  ;;  %v5066_v11 = vmax.f32 %v9245_v56, %v4992_v54  ;;  %v2715_v50 = vsel %vm394_vm0, %v10272_v30, %v10269_v45  ;;  %v10273_v37 = vld [vmem:[#allocation25_spill] sm:$0xff]  ;;  %v10274_v54 = vld [vmem:[#allocation22_spill] sm:$0xff] }
 0x679   : > { %5831 = vrot.lane.b32.xlu1 %v5609_v5, %s6432_s17  ;;  %5839 = vrot.lane.b32.xlu0 %v5610_v44, %s6431_s13  ;;  %v10275_v5 = vld [vmem:[#allocation19_spill] sm:$0xff]  ;;  %v10293_v45 = vld [vmem:[#allocation54_spill] sm:$0xff] }
 0x67a   : > { %v9550_v40 = vmax.f32 %v5064_v13, %v9322_v36  ;;  %v9553_v56 = vmax.f32 %v5066_v11, %v9324_v46  ;;  %v10276_v44 = vcombine.low %v10274_v54, %v10275_v5  ;;  %v10279_v11 = vld [vmem:[#allocation44_spill] sm:$0xff]  ;;  %v10296_v54 = vld [vmem:[#allocation87_spill] sm:$0xff] }
 0x67b   : > { %v4996_v34 = vpop.permute.xlu1 %4995  ;;  %v5000_v9 = vpop.permute.xlu0 %4999 }
 0x67c   : > { %v5068_v39 = vmax.f32 %v9252_v63, %v4996_v34  ;;  %v5070_v14 = vmax.f32 %v9255_v55, %v5000_v9  ;;  %v2716_v58 = vsel %vm394_vm0, %v10276_v44, %v10273_v37  ;;  %v10297_v44 = vld [vmem:[#allocation55_spill] sm:$0xff] }
 0x67d   : > { %5855 = vrot.lane.b32.xlu1 %v5612_v16, %s6430_s11  ;;  %5783 = vrot.lane.b32.xlu0 %v5338_v27, %s6431_s13  ;;  %v9614_v27 = vsel %vm2697_vm7, %v2715_v50, %v10279_v11  ;;  %v10295_v50 = vld [vmem:[#allocation86_spill] sm:$0xff]  ;;  %v10299_v11 = vld [vmem:[#allocation68_spill] sm:$0xff] }
 0x67e   : > { %v9545_v42 = vmax.f32 %v5068_v39, %v9334_v28  ;;  %v10260_v28 = vld [vmem:[#allocation46_spill] sm:$0xff]  ;;  %v10278_v39 = vld [vmem:[#allocation16_spill] sm:$0xff] }
 0x67f   : > { %v5004_v63 = vpop.permute.xlu1 %5003  ;;  %v5008_v23 = vpop.permute.xlu0 %5007  ;;  %v2696_v48 = vsel %vm394_vm0, %v10263_v49, %v10260_v28  ;;  %v10284_v49 = vld [vmem:[#allocation59_spill] sm:$0xff] }
 0x680   : > { %v5074_v0 = vmax.f32 %v9265_v10, %v5008_v23  ;;  %v5300_v10 = vrot.slane %v5286_v22, %v6874_v8  ;;  %v5629_v36 = vcombine.low %v9550_v40, %v9545_v42  ;;  %v5072_v46 = vmax.f32 %v9262_v24, %v5004_v63  ;;  %v10280_v22 = vld [vmem:[#allocation41_spill] sm:$0xff] }
 0x681   : > { %5847 = vrot.lane.b32.xlu0 %v5611_v2, %s6429_s10  ;;  %v2699_v25 = vsel %vm2697_vm7, %v2696_v48, %v10268_v33  ;;  %v5613_v24 = vcombine.low %v9564_v31, %v9553_v56  ;;  %v2718_v7 = vsel %vm2697_vm7, %v2716_v58, %v10280_v22  ;;  %v10282_v23 = vld [vmem:[#allocation45_spill] sm:$0xff]  ;;  %v10285_v48 = vld [vmem:[#allocation67_spill] sm:$0xff] }
 0x682   : > { %v9570_v55 = vmax.f32 %v5074_v0, %v9348_v52  ;;  %v9585_v52 = vmax.f32 %v5070_v14, %v9336_v17  ;;  %v5339_v35 = vcombine.low %v5300_v10, %v5332_v4  ;;  %v2702_v34 = vsel %vm2700_vm8, %v2699_v25, %v10277_v41  ;;  %v10298_v41 = vld [vmem:[#allocation62_spill] sm:$0xff] }
 0x683   : > { %v5012_v60 = vpop.permute.xlu1 %5011  ;;  %v9573_v29 = vpop.permute.xlu0 %4981  ;;  %v9601_v17 = vrot.slane %v5629_v36, %v6864_v59  ;;  %v2720_v0 = vsel %vm2700_vm8, %v2718_v7, %v10282_v23  ;;  %v5621_v2 = vrot.slane %v5613_v24, %v6864_v59  ;;  %v5340_v28 = vcombine.high %v5300_v10, %v5332_v4  ;;  %v10286_v36 = vld [vmem:[#allocation65_spill] sm:$0xff]  ;;  %v10300_v7 = vld [vmem:[#allocation70_spill] sm:$0xff] }
 0x684   : > { %v5076_v3 = vmax.f32 %v9272_v53, %v5012_v60  ;;  %v9604_v53 = vmax.f32 %v5072_v46, %v9346_v32  ;;  %v5645_v9 = vcombine.low %v9585_v52, %v9570_v55  ;;  %v10281_v32 = vld [vmem:[#allocation17_spill] sm:$0xff]  ;;  %v9629_v57 = vsel %vm2703_vm9, %v2720_v0, %v10283_v62 }
 0x685   : > { %5791 = vrot.lane.b32.xlu0 %v5339_v35, %s6429_s10  ;;  %v9620_v63 = vsel %vm2697_vm7, %v2695_v6, %v10281_v32  ;;  %v10287_v46 = vcombine.low %v10285_v48, %v10286_v36  ;;  %v9638_v1 = vsel %vm2703_vm9, %v2702_v34, %v10288_v15  ;;  %v10291_v6 = vld [vmem:[#allocation66_spill] sm:$0xff]  ;;  %v5677_v10 = vcombine.low %v5621_v2, %v9601_v17 }
 0x686   : > { %v9609_v16 = vmax.f32 %v5076_v3, %v10278_v39  ;;  %v10292_v33 = vcombine.low %v10290_v19, %v10291_v6  ;;  %v5653_v25 = vrot.slane %v5645_v9, %v6864_v59  ;;  %v5678_v62 = vcombine.high %v5621_v2, %v9601_v17  ;;  %v10306_v19 = vld [vmem:[#allocation28_spill] sm:$0xff] }
 0x687   : > { %v4986_v47 = vpop.permute.xlu1 %4985  ;;  %v4990_v13 = vpop.permute.xlu0 %4989  ;;  %v4295_v60 = vsel %vm394_vm0, %v10287_v46, %v10284_v49  ;;  %v9669_v36 = vrot.slane %v5677_v10, %v6874_v8  ;;  %v10309_v2 = vld [vmem:[#allocation88_spill] sm:$0xff] }
 0x688   : > { %v5661_v14 = vcombine.low %v9604_v53, %v9609_v16  ;;  %v4281_v4 = vsel %vm394_vm0, %v10292_v33, %v10289_v43  ;;  %v4297_v18 = vsel %vm2697_vm7, %v4295_v60, %v10293_v45  ;;  %v5063_v30 = vmax.f32 %v10294_v51, %v4986_v47  ;;  %v10301_v47 = vld [vmem:[#allocation84_spill] sm:$0xff]  ;;  %v10304_v60 = vld [vmem:[#allocation74_spill] sm:$0xff]  ;;  %v10311_v51 = vld [vmem:[#allocation13_spill] sm:$0xff] }
 0x689   : > { %5799 = vrot.lane.b32.xlu0 %v5340_v28, %s6430_s11  ;;  %v5065_v37 = vmax.f32 %v10295_v50, %v4990_v13  ;;  %v4283_v58 = vsel %vm2697_vm7, %v4281_v4, %v10297_v44  ;;  %v4299_v34 = vsel %vm2700_vm8, %v4297_v18, %v10298_v41  ;;  %v5061_v23 = vmax.f32 %v10301_v47, %v9573_v29  ;;  %v10302_v13 = vld [vmem:[#allocation23_spill] sm:$0xff]  ;;  %v10305_v43 = vld [vmem:[#allocation26_spill] sm:$0xff]  ;;  %v10313_v44 = vld [vmem:[#allocation32_spill] sm:$0xff] }
 0x68a   : > { %v5669_v24 = vrot.slane %v5661_v14, %v6864_v59  ;;  %v4285_v22 = vsel %vm2700_vm8, %v4283_v58, %v10299_v11  ;;  %v4301_v32 = vsel %vm2703_vm9, %v4299_v34, %v10300_v7  ;;  %v10303_v14 = vld [vmem:[#allocation72_spill] sm:$0xff]  ;;  %v5191_v29 = vmax.f32 %v5063_v30, %v10305_v43  ;;  %v10307_v33 = vld [vmem:[#allocation90_spill] sm:$0xff] }
 0x68b   : > { %v4994_v3 = vpop.permute.xlu1 %4993  ;;  %v4998_v35 = vpop.permute.xlu0 %4997  ;;  %v4287_v28 = vsel %vm2703_vm9, %v4285_v22, %v10303_v14  ;;  %v4303_v15 = vsel %vm2706_vm10, %v4301_v32, %v10304_v60  ;;  %v5193_v6 = vmax.f32 %v5065_v37, %v10306_v19  ;;  %v10310_v45 = vld [vmem:[#allocation78_spill] sm:$0xff]  ;;  %v5189_v30 = vmax.f32 %v5061_v23, %v10311_v51  ;;  %v10315_v23 = vld [vmem:[#allocation91_spill] sm:$0xff]  ;;  %v10317_v60 = vld [vmem:[#allocation92_spill] sm:$0xff] }
 0x68c   : > { %v5067_v5 = vmax.f32 %v10296_v54, %v4994_v3  ;;  %v5709_v9 = vcombine.low %v5653_v25, %v5669_v24  ;;  %v5710_v39 = vcombine.high %v5653_v25, %v5669_v24  ;;  %v10308_v25 = vld [vmem:[#allocation76_spill] sm:$0xff]  ;;  %v5069_v24 = vmax.f32 %v10309_v2, %v4998_v35  ;;  %v10312_v54 = vld [vmem:[#allocation89_spill] sm:$0xff]  ;;  %v10314_v32 = vld [vmem:[#allocation14_spill] sm:$0xff] }
 0x68d   : > { %v4289_v17 = vsel %vm2706_vm10, %v4287_v28, %v10308_v25  ;;  %v4305_v18 = vsel %vm2709_vm11, %v4303_v15, %v10310_v45  ;;  %v9694_v34 = vrot.slane %v5678_v62, %v6874_v8  ;;  %v5662_v11 = vcombine.high %v9604_v53, %v9609_v16  ;;  %v10316_v16 = vld [vmem:[#allocation36_spill] sm:$0xff] }
 0x68e   : > { %v5195_v0 = vmax.f32 %v5067_v5, %v10302_v13  ;;  %v9672_v46 = vrot.slane %v5709_v9, %v6874_v8  ;;  %v9685_v3 = vrot.slane %v5710_v39, %v6874_v8  ;;  %v5614_v39 = vcombine.high %v9564_v31, %v9553_v56 }
 0x68f   : > { %v5002_v49 = vpop.permute.xlu1 %5001  ;;  %v5006_v48 = vpop.permute.xlu0 %5005  ;;  %v5341_v22 = vcombine.low %v5189_v30, %v5193_v6  ;;  %v5342_v7 = vcombine.high %v5189_v30, %v5193_v6  ;;  %v5197_v47 = vmax.f32 %v5069_v24, %v10314_v32  ;;  %v5630_v28 = vcombine.high %v9550_v40, %v9545_v42 }
 0x690   : > { %v5073_v4 = vmax.f32 %v10307_v33, %v5006_v48  ;;  %v5742_v10 = vcombine.high %v9669_v36, %v9672_v46  ;;  %v5357_v50 = vcombine.low %v5191_v29, %v5195_v0  ;;  %v5358_v37 = vcombine.high %v5191_v29, %v5195_v0 }
 0x691   : > { %v5071_v5 = vmax.f32 %v10312_v54, %v5002_v49  ;;  %v5741_v9 = vcombine.low %v9669_v36, %v9672_v46  ;;  %v5743_v0 = vcombine.low %v9694_v34, %v9685_v3  ;;  %v5646_v56 = vcombine.high %v9585_v52, %v9570_v55 }
 0x692   : > { %v5201_v58 = vmax.f32 %v5073_v4, %v10313_v44  ;;  %5809 = vrot.lane.b32.xlu0 %v5742_v10, %s6435_s28  ;;  %v5365_v31 = vrot.slane %v5357_v50, %v6864_v59  ;;  %v9715_v53 = vrot.slane %v5358_v37, %v6864_v59  ;;  %v5349_v42 = vrot.slane %v5341_v22, %v6864_v59  ;;  %v10318_v4 = vld [vmem:[#allocation50_spill] sm:$0xff] }
 0x693   : > { %v5010_v35 = vpop.permute.xlu1 %5009  ;;  %v4276_v41 = vpop.permute.xlu0 %4275  ;;  %v5199_v62 = vmax.f32 %v5071_v5, %v10316_v16  ;;  %v9722_v40 = vrot.slane %v5342_v7, %v6864_v59  ;;  %v5676_v19 = vrot.slane %v5662_v11, %v6864_v59  ;;  %v2724_v25 = vsel %vm2706_vm10, %v9629_v57, %v10318_v4  ;;  %v10319_v22 = vld [vmem:[#allocation18_spill] sm:$0xff] }
 0x694   : > { %v5075_v13 = vmax.f32 %v10315_v23, %v5010_v35  ;;  %v9707_v14 = vsel %vm2712_vm12, %v4305_v18, %v4276_v41  ;;  %v5373_v49 = vcombine.low %v5197_v47, %v5201_v58  ;;  %v5374_v48 = vcombine.high %v5197_v47, %v5201_v58 }
 0x695   : > { %v5644_v2 = vrot.slane %v5630_v28, %v6864_v59  ;;  %v5660_v24 = vrot.slane %v5646_v56, %v6864_v59  ;;  %v5405_v10 = vcombine.low %v5349_v42, %v5365_v31  ;;  %v5628_v57 = vrot.slane %v5614_v39, %v6864_v59 }
 0x696   : > { %v5203_v15 = vmax.f32 %v5075_v13, %v10317_v60  ;;  %5817 = vrot.lane.b32.xlu0 %v5743_v0, %s6434_s26  ;;  %v5381_v45 = vrot.slane %v5373_v49, %v6864_v59  ;;  %v5406_v11 = vcombine.high %v5349_v42, %v5365_v31  ;;  %v2719_v7 = vsel %vm2700_vm8, %v9614_v27, %v10319_v22  ;;  %v10331_v22 = vld [vmem:[#allocation35_spill] sm:$0xff] }
 0x697   : > { %v4212_v43 = vpop.permute.xlu1 %4211  ;;  %v2620_v29 = vpop.permute.xlu0 %2619  ;;  %v5725_v5 = vcombine.low %v5660_v24, %v5676_v19  ;;  %v5693_v41 = vcombine.low %v5628_v57, %v5644_v2 }
 0x698   : > { %v4291_v55 = vsel %vm2709_vm11, %v4289_v17, %v4212_v43  ;;  %v9727_v52 = vsel %vm2706_vm10, %v9638_v1, %v2620_v29  ;;  %v5389_v6 = vcombine.low %v5199_v62, %v5203_v15  ;;  %v5390_v33 = vcombine.high %v5199_v62, %v5203_v15 }
 0x699   : > { %v5421_v17 = vcombine.low %v9722_v40, %v9715_v53  ;;  %v5388_v1 = vrot.slane %v5374_v48, %v6864_v59  ;;  %v5733_v56 = vrot.slane %v5725_v5, %v6874_v8  ;;  %v5701_v48 = vrot.slane %v5693_v41, %v6874_v8 }
 0x69a   : > { %v5397_v18 = vrot.slane %v5389_v6, %v6864_v59  ;;  %v5404_v51 = vrot.slane %v5390_v33, %v6864_v59  ;;  %v5420_v60 = vrot.slane %v5406_v11, %v6874_v8  ;;  %v5726_v29 = vcombine.high %v5660_v24, %v5676_v19  ;;  %v10330_v11 = vld [vmem:[#allocation39_spill] sm:$0xff] }
 0x69b   : > { %v2602_v30 = vpop.permute.xlu1 %2601  ;;  %v2684_v50 = vpop.permute.xlu0 %2683  ;;  %v5429_v59 = vrot.slane %v5421_v17, %v6874_v8  ;;  %v5746_v42 = vcombine.high %v5701_v48, %v5733_v56  ;;  %v5694_v33 = vcombine.high %v5628_v57, %v5644_v2  ;;  %v5422_v2 = vcombine.high %v9722_v40, %v9715_v53  ;;  %v10324_v53 = vld [vmem:[#allocation34_spill] sm:$0xff] }
 0x69c   : > { %v2701_v37 = vsel %vm2700_vm8, %v9620_v63, %v2602_v30  ;;  %v9745_v54 = vsel %vm2709_vm11, %v2724_v25, %v2684_v50  ;;  %v5437_v44 = vcombine.low %v5381_v45, %v5397_v18  ;;  %v5438_v58 = vcombine.high %v5381_v45, %v5397_v18  ;;  %v10321_v18 = vld [vmem:[#allocation33_spill] sm:$0xff]  ;;  %v10323_v50 = vld [vmem:[#allocation38_spill] sm:$0xff] }
 0x69d   : > { %v5453_v35 = vcombine.low %v5388_v1, %v5404_v51  ;;  %v9753_v63 = vrot.slane %v5405_v10, %v6874_v8  ;;  %v5744_v25 = vcombine.high %v9694_v34, %v9685_v3  ;;  %v5740_v10 = vrot.slane %v5726_v29, %v6874_v8  ;;  %v10320_v34 = vld [vmem:[#allocation37_spill] sm:$0xff] }
 0x69e   : > { %v9756_v23 = vrot.slane %v5437_v44, %v6874_v8  ;;  %v5452_v31 = vrot.slane %v5438_v58, %v6874_v8  ;;  %v5454_v19 = vcombine.high %v5388_v1, %v5404_v51  ;;  %v5745_v45 = vcombine.low %v5701_v48, %v5733_v56  ;;  %v5891_v44 = vld [vmem:[%s10009_s4 + $0x10] sm:$0xff]  ;;  %v10327_v58 = vld [vmem:[#allocation24_spill] sm:$0xff] }
 0x69f   : > { %v2666_v32 = vpop.permute.xlu1 %2665  ;;  %v2610_v47 = vpop.permute.xlu0 %2609  ;;  %v5461_v39 = vrot.slane %v5453_v35, %v6874_v8  ;;  %v10322_v30 = vcombine.high %v10320_v34, %v10321_v18  ;;  %v5436_v1 = vrot.slane %v5422_v2, %v6874_v8  ;;  %v10325_v40 = vcombine.low %v10323_v50, %v10324_v53  ;;  %v10328_v35 = vld [vmem:[#allocation21_spill] sm:$0xff] }
 0x6a0   : > { %v2721_v13 = vsel %vm2703_vm9, %v2719_v7, %v2666_v32  ;;  %v9760_v0 = vsel %vm2703_vm9, %v2701_v37, %v2610_v47  ;;  %v5470_v27 = vcombine.high %v9753_v63, %v9756_v23  ;;  %v5469_v16 = vcombine.low %v9753_v63, %v9756_v23  ;;  %v5890_v47 = vld [vmem:[%s10009_s4 + $0x8] sm:$0xff]  ;;  %v10340_v63 = vld [vmem:[#allocation69_spill] sm:$0xff] }
 0x6a1   : > { %v5473_v28 = vcombine.low %v5429_v59, %v5461_v39  ;;  %v5471_v6 = vcombine.low %v5420_v60, %v5452_v31  ;;  %v5474_v4 = vcombine.high %v5429_v59, %v5461_v39  ;;  %v5472_v17 = vcombine.high %v5420_v60, %v5452_v31  ;;  %v5892_v59 = vld [vmem:[%s10009_s4 + $0x18] sm:$0xff] }
 0x6a2   : > { %5753 = vrot.lane.b32.xlu1 %v5470_v27, %s6435_s28  ;;  %v5468_v3 = vrot.slane %v5454_v19, %v6874_v8  ;;  %v10326_v37 = vcombine.high %v10323_v50, %v10324_v53  ;;  %v10329_v41 = vcombine.high %v10327_v58, %v10328_v35  ;;  %v10332_v7 = vcombine.low %v10330_v11, %v10331_v22  ;;  %v10339_v35 = vld [vmem:[#allocation56_spill] sm:$0xff] }
 0x6a3   : > { %5777 = vrot.lane.b32.xlu0 %v5473_v28, %s6432_s17  ;;  %v4220_v62 = vpop.permute.xlu1 %4219  ;;  %v2674_v49 = vpop.permute.xlu0 %2673  ;;  %v10333_v32 = vcombine.high %v10330_v11, %v10331_v22 }
 0x6a4   : > { %v9773_v15 = vsel %vm2712_vm12, %v4291_v55, %v4220_v62  ;;  %v9776_v43 = vsel %vm2706_vm10, %v2721_v13, %v2674_v49  ;;  %v5708_v55 = vrot.slane %v5694_v33, %v6874_v8  ;;  %v5475_v51 = vcombine.low %v5436_v1, %v5468_v3  ;;  %v5889_v8 = vld [vmem:[%s10009_s4] sm:$0xff] }
 0x6a5   : > { %v5476_v5 = vcombine.high %v5436_v1, %v5468_v3  ;;  %v10335_v1 = vld [vmem:[#allocation52_spill] sm:$0xff] }
 0x6a6   : > { %5761 = vrot.lane.b32.xlu1 %v5471_v6, %s6434_s26  ;;  %v5747_v24 = vcombine.low %v5708_v55, %v5740_v10  ;;  %v5748_v57 = vcombine.high %v5708_v55, %v5740_v10 }
 0x6a7   : > { %5841 = vrot.lane.b32.xlu0 %v5746_v42, %s6431_s13  ;;  %v9832_v56 = vpop.permute.xlu1 %2627 }
 0x6aa   : > { %5825 = vrot.lane.b32.xlu1 %v5744_v25, %s6433_s25 }
 0x6ab   : > { %5785 = vrot.lane.b32.xlu0 %v5474_v4, %s6431_s13  ;;  %v9834_v62 = vpop.permute.xlu1 %2691 }
 0x6ae   : > { %5769 = vrot.lane.b32.xlu1 %v5472_v17, %s6433_s25 }
 0x6af   : > { %5849 = vrot.lane.b32.xlu0 %v5747_v24, %s6429_s10 }
 0x6b2   : > { %5833 = vrot.lane.b32.xlu1 %v5745_v45, %s6432_s17  ;;  %s6198_s17 = sshll.u32 %s6496_s22, 10  ;;  %s6443_s22 = smov [#allocation6]  }
 0x6b3   : > { %2617 = vrot.lane.b32.xlu0 %v10322_v30, %s6431_s13  ;;  %v10334_v30 = vld [vmem:[#allocation80_spill] sm:$0xff]  ;;  %s6092_s13 = sshll.u32 %s242_s9, 4  ;;  %s6362_s14 = sshll.u32 %s6443_s22, 4  ;;  %s9956_s13 = int_to_ptr.vmem [resolvable:$true] %s6092_s13  ;;  %s6363_s14 = int_to_ptr.vmem [resolvable:$false] %s6362_s14 }
 0x6b4   : > { %s6358_s12 = scalar_lea.vmem %s9956_s13, 1024  ;;  %s6364_s29 = scalar_lea.vmem %s6363_s14, 2048 }
 0x6b5   : > { %p6359_p11 = scmp.ne.s32.totalorder %s9956_s13, %s6358_s12  ;;  %p6365_p5 = scmp.lt.s32.totalorder %s9956_s13, %s6363_s14 }
 0x6b6   : > { %5793 = vrot.lane.b32.xlu1 %v5475_v51, %s6429_s10  ;;  %v10336_v51 = vld [vmem:[#allocation51_spill] sm:$0xff]  ;;  %p6366_p7 = scmp.lt.s32.totalorder %s6364_s29, %s6358_s12 }
 0x6b7   : > { %2681 = vrot.lane.b32.xlu0 %v10325_v40, %s6429_s10  ;;  %v10337_v50 = vcombine.low %v10335_v1, %v10336_v51  ;;  %p6360_p13 = pnand %p6359_p11, %p10359_p12 }
 0x6b8   : > { %p6367_p8 = por %p6366_p7, %p6365_p5 }
 0x6b9   : > { %v4296_v53 = vsel %vm394_vm0, %v10337_v50, %v10334_v30  ;;  %p6361_p4 = pneg %p6360_p13 }
 0x6ba   : > { %5857 = vrot.lane.b32.xlu1 %v5748_v57, %s6430_s11 }
 0x6bb   : > { %2689 = vrot.lane.b32.xlu0 %v10326_v37, %s6430_s11  ;;  %v10338_v37 = vld [vmem:[#allocation82_spill] sm:$0xff]  ;;  %p6368_p10 = pnand %p6367_p8, %p6361_p4 }
 0x6be   : > { %5801 = vrot.lane.b32.xlu1 %v5476_v5, %s6430_s11 }
 0x6bf   : > { %5895 = vperm.xlu0 %6280, %v5889_v8   ;;  %v4298_v8 = vsel %vm2697_vm7, %v4296_v53, %v10338_v37  ;;  %v10348_v53 = vld [vmem:[#allocation77_spill] sm:$0xff]  ;;  %v10350_v37 = vld [vmem:[#allocation75_spill] sm:$0xff] }
 0x6c2   : > { %2635 = vrot.lane.b32.xlu1 %v10329_v41, %s6430_s11  ;;  %v4300_v41 = vsel %vm2700_vm8, %v4298_v8, %v10339_v35 }
 0x6c3   : > { %5905 = vperm.xlu0 %6280, %v5891_v44   ;;  %v4302_v23 = vsel %vm2703_vm9, %v4300_v41, %v10340_v63  ;;  %v2728_v41 = vsel %vm2712_vm12, %v9745_v54, %v9834_v62  ;;  %v10355_v62 = vld [vmem:[#allocation11_spill] sm:$0xff] }
 0x6c4   : > { %v508_v63 = vld [vmem:[%s10008_s3 + $0x10] sm:$0xff] }
 0x6c6   : > { %2625 = vrot.lane.b32.xlu1 %v10332_v7, %s6429_s10  ;;  %s9961_s10 = scalar_lea.hbm %s10010_s5, %s6198_s17 }
 0x6ca   : > { %2633 = vrot.lane.b32.xlu1 %v10333_v32, %s6430_s11  ;;  %s6079_s11 = scalar_lea.sflag [#allocation5], %s6572_s23 }
 0x6ce   : > { %5900 = vperm.xlu1 %6281, %v5890_v47  }
 0x6cf   : > { %v5808_v39 = vpop.permute.xlu0 %5807 }
 0x6d0   : > { %v5875_v36 = vsel %vm394_vm0, %v5605_v61, %v5808_v39 }
 0x6d2   : > { %5910 = vperm.xlu1 %6281, %v5892_v59  }
 0x6df   : > { %v5752_v13 = vpop.permute.xlu0 %5751  ;;  %v5760_v48 = vpop.permute.xlu1 %5759 }
 0x6e0   : > { %v5861_v26 = vsel %vm394_vm0, %v5333_v38, %v5752_v13 }
 0x6e1   : > { %v5863_v47 = vsel %vm2697_vm7, %v5861_v26, %v5760_v48  ;;  %v507_v26 = vld [vmem:[%s10008_s3 + $0x8] sm:$0xff] }
 0x6e3   : > { %v5816_v28 = vpop.permute.xlu0 %5815  ;;  %v5824_v29 = vpop.permute.xlu1 %5823 }
 0x6e7   : > { %v5776_v27 = vpop.permute.xlu0 %5775  ;;  %v5768_v6 = vpop.permute.xlu1 %5767 }
 0x6e8   : > { %v5865_v12 = vsel %vm2700_vm8, %v5863_v47, %v5768_v6  ;;  %v10346_v6 = vld [vmem:[#allocation61_spill] sm:$0xff] }
 0x6eb   : > { %v5840_v31 = vpop.permute.xlu0 %5839  ;;  %v5832_v4 = vpop.permute.xlu1 %5831 }
 0x6ef   : > { %v5784_v49 = vpop.permute.xlu0 %5783  ;;  %v5856_v10 = vpop.permute.xlu1 %5855 }
 0x6f3   : > { %v5848_v60 = vpop.permute.xlu0 %5847 }
 0x6f7   : > { %v5792_v42 = vpop.permute.xlu0 %5791 }
 0x6fb   : > { %v5800_v33 = vpop.permute.xlu0 %5799 }
 0x704   : > { %v5810_v25 = vpop.permute.xlu0 %5809 }
 0x705   : > { %v5876_v18 = vsel %vm394_vm0, %v5741_v9, %v5810_v25  ;;  %v5877_v9 = vsel %vm2697_vm7, %v5875_v36, %v5816_v28  ;;  %v10341_v28 = vld [vmem:[#allocation73_spill] sm:$0xff] }
 0x706   : > { %v5879_v7 = vsel %vm2700_vm8, %v5877_v9, %v5824_v29  ;;  %v4304_v29 = vsel %vm2706_vm10, %v4302_v23, %v10341_v28  ;;  %v10343_v25 = vld [vmem:[#allocation57_spill] sm:$0xff]  ;;  %v10353_v9 = vld [vmem:[#allocation83_spill] sm:$0xff]  ;;  %v509_v23 = vld [vmem:[%s10008_s3 + $0x18] sm:$0xff] }
 0x708   : > { %v5818_v55 = vpop.permute.xlu0 %5817 }
 0x709   : > { %v5878_v40 = vsel %vm2697_vm7, %v5876_v18, %v5818_v55  ;;  %v10344_v55 = vld [vmem:[#allocation58_spill] sm:$0xff]  ;;  %v10347_v18 = vld [vmem:[#allocation63_spill] sm:$0xff] }
 0x70a   : > { %v10345_v48 = vcombine.low %v10343_v25, %v10344_v55 }
 0x714   : > { %v5754_v19 = vpop.permute.xlu1 %5753 }
 0x715   : > { %v5778_v24 = vpop.permute.xlu0 %5777  ;;  %v5862_v58 = vsel %vm394_vm0, %v5469_v16, %v5754_v19  ;;  %v5881_v16 = vsel %vm2703_vm9, %v5879_v7, %v5832_v4  ;;  %v10342_v4 = vld [vmem:[#allocation53_spill] sm:$0xff]  ;;  %v10358_v7 = vmov 0.0  }
 0x716   : > { %v5883_v13 = vsel %vm2706_vm10, %v5881_v16, %v5840_v31  ;;  %v4282_v19 = vsel %vm394_vm0, %v10345_v48, %v10342_v4  ;;  %v5867_v31 = vsel %vm2703_vm9, %v5865_v12, %v5776_v27 }
 0x717   : > { %v5869_v1 = vsel %vm2706_vm10, %v5867_v31, %v5784_v49 }
 0x718   : > { %v5762_v17 = vpop.permute.xlu1 %5761 }
 0x719   : > { %v5842_v2 = vpop.permute.xlu0 %5841  ;;  %v5864_v11 = vsel %vm2697_vm7, %v5862_v58, %v5762_v17 }
 0x71c   : > { %v5826_v45 = vpop.permute.xlu1 %5825 }
 0x71d   : > { %v5786_v3 = vpop.permute.xlu0 %5785  ;;  %v5880_v5 = vsel %vm2700_vm8, %v5878_v40, %v5826_v45 }
 0x720   : > { %v5770_v34 = vpop.permute.xlu1 %5769 }
 0x721   : > { %v5850_v44 = vpop.permute.xlu0 %5849  ;;  %v5866_v20 = vsel %vm2700_vm8, %v5864_v11, %v5770_v34 }
 0x722   : > { %v5868_v59 = vsel %vm2703_vm9, %v5866_v20, %v5778_v24  ;;  %v5885_v24 = vsel %vm2709_vm11, %v5883_v13, %v5848_v60  ;;  %v4306_v60 = vsel %vm2709_vm11, %v4304_v29, %v10348_v53  ;;  %v10356_v20 = vld [vmem:[#allocation10_spill] sm:$0xff] }
 0x723   : > { %v5870_v17 = vsel %vm2706_vm10, %v5868_v59, %v5786_v3  ;;  %v10349_v3 = vld [vmem:[#allocation71_spill] sm:$0xff]  ;;  %v5887_v27 = vsel %vm2712_vm12, %v5885_v24, %v5856_v10 }
 0x724   : > { %v5834_v57 = vpop.permute.xlu1 %5833 }
 0x725   : > { %v5882_v46 = vsel %vm2703_vm9, %v5880_v5, %v5834_v57  ;;  %v2618_v32 = vpop.permute.xlu0 %2617  ;;  %v5871_v57 = vsel %vm2709_vm11, %v5869_v1, %v5792_v42  ;;  %v10351_v5 = vld [vmem:[#allocation79_spill] sm:$0xff] }
 0x726   : > { %v5884_v61 = vsel %vm2706_vm10, %v5882_v46, %v5842_v2  ;;  %v4284_v2 = vsel %vm2697_vm7, %v4282_v19, %v10346_v6  ;;  %v5873_v49 = vsel %vm2712_vm12, %v5871_v57, %v5800_v33  ;;  %v10352_v46 = vld [vmem:[#allocation81_spill] sm:$0xff]  ;;  %v2711_v33 = vsel %vm2709_vm11, %v9727_v52, %v9832_v56 }
 0x727   : > { %v5886_v21 = vsel %vm2709_vm11, %v5884_v61, %v5850_v44  ;;  %v4286_v30 = vsel %vm2700_vm8, %v4284_v2, %v10347_v18  ;;  %v4308_v42 = vsel %vm2712_vm12, %v4306_v60, %v10352_v46  ;;  %v2707_v52 = vsel %vm2706_vm10, %v9760_v0, %v2618_v32  ;;  %v506_v0 = vld [vmem:[%s10008_s3] sm:$0xff] }
 0x728   : > { %v5794_v22 = vpop.permute.xlu1 %5793  ;;  %v4288_v40 = vsel %vm2703_vm9, %v4286_v30, %v10349_v3  ;;  %v10357_v61 = vld [vmem:[#allocation9_spill] sm:$0xff] }
 0x729   : > { %v5872_v45 = vsel %vm2709_vm11, %v5870_v17, %v5794_v22  ;;  %v2682_v51 = vpop.permute.xlu0 %2681  ;;  %v4290_v8 = vsel %vm2706_vm10, %v4288_v40, %v10350_v37 }
 0x72a   : > { %v4292_v44 = vsel %vm2709_vm11, %v4290_v8, %v10351_v5  ;;  %v2725_v11 = vsel %vm2709_vm11, %v9776_v43, %v2682_v51  ;;  %v10354_v43 = vld [vmem:[#allocation12_spill] sm:$0xff] }
 0x72b   : > { %v4294_v58 = vsel %vm2712_vm12, %v4292_v44, %v10353_v9 }
 0x72c   : > { %v5858_v39 = vpop.permute.xlu1 %5857 }
 0x72d   : > { %v5888_v38 = vsel %vm2712_vm12, %v5886_v21, %v5858_v39  ;;  %v2690_v10 = vpop.permute.xlu0 %2689 }
 0x72e   : > { %5941 = vmatprep.subr.mxu0 %v5888_v38  ;;  %6199 = vmatprep.subr.mxu1 %v5888_v38 }
 0x730   : > { %v5802_v34 = vpop.permute.xlu1 %5801 }
 0x731   : > { %v5874_v50 = vsel %vm2712_vm12, %v5872_v45, %v5802_v34 }
 0x732   : > { %5942 = vmatpush1.msra.mxu0 %v5874_v50  ;;  %6207 = vmatpush1.msra.mxu1 %v5874_v50 }
 0x733   : > { %5943 = vmatprep.subr.mxu0 %v5887_v27  ;;  %6200 = vmatprep.subr.mxu1 %v5887_v27 }
 0x734   : > { %v2636_v36 = vpop.permute.xlu1 %2635  ;;  %5944 = vmatpush1.msra.mxu0 %v5873_v49  ;;  %6208 = vmatpush1.msra.mxu1 %v5873_v49 }
 0x735   : > { %5945 = vmatprep.subr.mxu0 %v4308_v42  ;;  %6201 = vmatprep.subr.mxu1 %v4308_v42  ;;  %v2714_v22 = vsel %vm2712_vm12, %v2711_v33, %v2636_v36 }
 0x736   : > { %5946 = vmatpush1.msra.mxu0 %v4294_v58  ;;  %6209 = vmatpush1.msra.mxu1 %v4294_v58 }
 0x737   : > { %5947 = vmatprep.subr.mxu0 %v9707_v14  ;;  %6202 = vmatprep.subr.mxu1 %v9707_v14  ;;  %v2727_v14 = vsel %vm2712_vm12, %v2725_v11, %v2690_v10 }
 0x738   : > { %v2626_v35 = vpop.permute.xlu1 %2625  ;;  %5948 = vmatpush1.msra.mxu0 %v9773_v15  ;;  %6210 = vmatpush1.msra.mxu1 %v9773_v15 }
 0x739   : > { %5949 = vmatprep.subr.mxu0 %v2728_v41  ;;  %6203 = vmatprep.subr.mxu1 %v2728_v41  ;;  %v2710_v15 = vsel %vm2709_vm11, %v2707_v52, %v2626_v35 }
 0x73a   : > { %5950 = vmatpush1.msra.mxu0 %v2714_v22  ;;  %6211 = vmatpush1.msra.mxu1 %v2714_v22  ;;  %v5896_v16 = vpop.permute.xlu0 %5895 }
 0x73b   : > { %5951 = vmatprep.subr.mxu0 %v2727_v14  ;;  %6204 = vmatprep.subr.mxu1 %v2727_v14 }
 0x73c   : > { %v2634_v56 = vpop.permute.xlu1 %2633 }
 0x73d   : > { %v2713_v54 = vsel %vm2712_vm12, %v2710_v15, %v2634_v56 }
 0x73e   : > { %5952 = vmatpush1.msra.mxu0 %v2713_v54  ;;  %6212 = vmatpush1.msra.mxu1 %v2713_v54  ;;  %v5906_v25 = vpop.permute.xlu0 %5905 }
 0x73f   : > { %5953 = vmatprep.subr.mxu0 %v10354_v43  ;;  %6205 = vmatprep.subr.mxu1 %v10354_v43 }
 0x740   : > { %5954 = vmatpush1.msra.mxu0 %v10355_v62  ;;  %6213 = vmatpush1.msra.mxu1 %v10355_v62 }
 0x741   : > { %5955 = vmatprep.subr.mxu0 %v10356_v20  ;;  %6206 = vmatprep.subr.mxu1 %v10356_v20 }
 0x742   : > { %5956 = vmatpush1.msra.mxu0 %v10357_v61  ;;  %6214 = vmatpush1.msra.mxu1 %v10357_v61 }
 0x743   : > { %6180 = vmatmul.mubr.msk.f32.vlgmr.msra.gmra.mxu0 %vm2703_vm9, %v506_v0  ;;  %6181 = vmatmul.mubr.msk.f32.vlgmr.msra.gmra.mxu1 %vm2703_vm9, %v507_v26 }
 0x744   : > { %6001 = vmatprep.mubr.f32.mxu1 %v10358_v7 }
 0x747   : > { %6182 = vmatmul.mubr.msk.f32.gmra.mxu1 %vm2703_vm9, %v508_v63 }
 0x748   : > { %6007 = vmatprep.mubr.f32.mxu1 %v10358_v7 }
 0x749   : > { %v5901_v32 = vpop.permute.xlu1 %5900 }
 0x74b   : > { %6183 = vmatmul.mubr.msk.f32.gmra.mxu1 %vm2703_vm9, %v509_v23 }
 0x74d   : > { %v5911_v31 = vpop.permute.xlu1 %5910 }
 0x803   : > { %v5991_v47 = vpop.f32.mrf.mxu0  ;;  %v5997_v59 = vpop.f32.mrf.mxu1 }
 0x804   : > { %v5992_v39 = vadd.f32 %v5991_v47, %v5896_v16  ;;  %v5998_v21 = vadd.f32 %v5997_v59, %v5901_v32 }
 0x805   : > { %v5993_v12 = vpop.f32.mrf.mxu0  ;;  %v5999_v38 = vpop.f32.mrf.mxu1 }
 0x806   : > { %v6184_v13 = vmul.f32 -1.442695, %v5992_v39  ;;  %v6186_v28 = vmul.f32 -1.442695, %v5998_v21  ;;  %v5994_v29 = vadd.f32 %v5993_v12, %v5896_v16  ;;  %v6000_v4 = vadd.f32 %v5999_v38, %v5901_v32 }
 0x807   : > { %v6003_v55 = vpop.f32.mrf.mxu1 }
 0x808   : > { %6298 = vpow2.f32 %v6184_v13  ;;  %v6185_v48 = vmul.f32 -1.442695, %v5994_v29  ;;  %v6187_v19 = vmul.f32 -1.442695, %v6000_v4  ;;  %v6004_v24 = vadd.f32 %v6003_v55, %v5906_v25 }
 0x809   : > { %6300 = vpow2.f32 %v6186_v28  ;;  %v6005_v17 = vpop.f32.mrf.mxu1 }
 0x80a   : > { %6302 = vpow2.f32 %v6185_v48  ;;  %v6188_v6 = vmul.f32 -1.442695, %v6004_v24  ;;  %v6006_v2 = vadd.f32 %v6005_v17, %v5906_v25 }
 0x80b   : > { %6304 = vpow2.f32 %v6187_v19  ;;  %v6009_v45 = vpop.f32.mrf.mxu1 }
 0x80c   : > { %6306 = vpow2.f32 %v6188_v6  ;;  %v6189_v34 = vmul.f32 -1.442695, %v6006_v2  ;;  %v6010_v18 = vadd.f32 %v6009_v45, %v5911_v31 }
 0x80d   : > { %v6011_v30 = vpop.f32.mrf.mxu1 }
 0x80e   : > { %6308 = vpow2.f32 %v6189_v34  ;;  %v6190_v1 = vmul.f32 -1.442695, %v6010_v18  ;;  %v6012_v51 = vadd.f32 %v6011_v30, %v5911_v31 }
 0x810   : > { %6310 = vpow2.f32 %v6190_v1  ;;  %v6191_v50 = vmul.f32 -1.442695, %v6012_v51 }
 0x812   : > { %6312 = vpow2.f32 %v6191_v50 }
 0x815   : > { %v6299_v53 = vpop.eup %6298 }
 0x816   : > { %v6301_v60 = vpop.eup %6300  ;;  %v6038_v3 = vadd.f32 1.0, %v6299_v53 }
 0x817   : > { %v6303_v40 = vpop.eup %6302  ;;  %v6040_v57 = vadd.f32 1.0, %v6301_v60 }
 0x818   : > { %v6305_v27 = vpop.eup %6304  ;;  %6314 = vrcp.f32 %v6038_v3  ;;  %v6039_v37 = vadd.f32 1.0, %v6303_v40 }
 0x819   : > { %v6307_v8 = vpop.eup %6306  ;;  %6316 = vrcp.f32 %v6040_v57  ;;  %v6041_v49 = vadd.f32 1.0, %v6305_v27 }
 0x81a   : > { %6318 = vrcp.f32 %v6039_v37  ;;  %v6042_v5 = vadd.f32 1.0, %v6307_v8 }
 0x81b   : > { %v6309_v44 = vpop.eup %6308  ;;  %6320 = vrcp.f32 %v6041_v49 }
 0x81c   : > { %6322 = vrcp.f32 %v6042_v5  ;;  %v6043_v36 = vadd.f32 1.0, %v6309_v44 }
 0x81d   : > { %v6311_v46 = vpop.eup %6310 }
 0x81e   : > { %6324 = vrcp.f32 %v6043_v36  ;;  %v6044_v42 = vadd.f32 1.0, %v6311_v46 }
 0x81f   : > { %v6313_v9 = vpop.eup %6312 }
 0x820   : > { %6326 = vrcp.f32 %v6044_v42  ;;  %v6045_v58 = vadd.f32 1.0, %v6313_v9 }
 0x822   : > { %6328 = vrcp.f32 %v6045_v58 }
 0x825   : > { %v6315_v10 = vpop.eup %6314 }
 0x826   : > { %v6317_v33 = vpop.eup %6316  ;;  %v6062_v35 = vmul.f32 %v6315_v10, %v5992_v39 }
 0x827   : > { %v6319_v41 = vpop.eup %6318  ;;  %v6064_v11 = vmul.f32 %v6317_v33, %v5998_v21 }
 0x828   : > { %v6321_v22 = vpop.eup %6320  ;;  %6070 = vst [vmem:[%s242_s9] sm:$0xff] %v6062_v35  ;;  %v6063_v14 = vmul.f32 %v6319_v41, %v5994_v29 }
 0x829   : > { %v6323_v52 = vpop.eup %6322  ;;  %6072 = vst [vmem:[%s242_s9 + $0x10] sm:$0xff] %v6064_v11  ;;  %v6065_v15 = vmul.f32 %v6321_v22, %v6000_v4 }
 0x82a   : > { %6071 = vst [vmem:[%s242_s9 + $0x8] sm:$0xff] %v6063_v14  ;;  %v6066_v56 = vmul.f32 %v6323_v52, %v6004_v24 }
 0x82b   : > { %v6325_v54 = vpop.eup %6324  ;;  %6073 = vst [vmem:[%s242_s9 + $0x18] sm:$0xff] %v6065_v15 }
 0x82c   : > { %6074 = vst [vmem:[%s242_s9 + $0x20] sm:$0xff] %v6066_v56  ;;  %v6067_v43 = vmul.f32 %v6325_v54, %v6006_v2 }
 0x82d   : > { %v6327_v62 = vpop.eup %6326 }
 0x82e   : > { %6075 = vst [vmem:[%s242_s9 + $0x28] sm:$0xff] %v6067_v43  ;;  %v6068_v0 = vmul.f32 %v6327_v62, %v6010_v18 }
 0x82f   : > { %v6329_v26 = vpop.eup %6328 }
 0x830   : > { %6076 = vst [vmem:[%s242_s9 + $0x30] sm:$0xff] %v6068_v0  ;;  %v6069_v20 = vmul.f32 %v6329_v26, %v6012_v51 }
 0x832   : > { %6077 = vst [vmem:[%s242_s9 + $0x38] sm:$0xff] %v6069_v20 }
 0x833   : > { %6371 = shalt.err (!%p6368_p10)
}
 0x834   : > { %s6372_s15 = scalar_lea.hbm %s9961_s10, 1024  ;;  %s6376_s7 = scalar_lea.hbm %s10010_s5, 2048 }
 0x835   : > { %p6373_p0 = scmp.ne.s32.totalorder %s9961_s10, %s6372_s15  ;;  %p6377_p1 = scmp.lt.s32.totalorder %s9961_s10, %s10010_s5 }
 0x836   : > { %p6378_p3 = scmp.lt.s32.totalorder %s6376_s7, %s6372_s15 }
 0x837   : > { %p6374_p2 = pnand %p6373_p0, %p10359_p12 }
 0x838   : > { %p6379_p6 = por %p6378_p3, %p6377_p1 }
 0x839   : > { %p6375_p9 = pneg %p6374_p2 }
 0x83b   : > { %p6380_p11 = pnand %p6379_p6, %p6375_p9 }
 0x83d   : > { %6383 = shalt.err (!%p6380_p11)
}
 0x83e   : > { %s6444_s25 = smov 256  }
 0x83f   : > { %6217 = dma.vmem_to_hbm [thread:$0]  (%p10359_p12), %s9956_s13, 1024, %s9961_s10, %s6079_s11, %s6444_s25, %s6444_s25, %s6435_s28  }
 0x840 PF: > { %s6107_s26 = sand.u32 1, %s6410_s18   ;;  %p10360_p13 = scmp.ne.s32.totalorder %s10090_s6, 0 }
 0x841   : > { %p10361_p4 = scmp.ge.s32.totalorder %s6422_s21, 2  ;;  %s6108_s12 = scalar_lea.sflag [#allocation5], %s6107_s26 }
 0x843   : > { %p6224_p5 = pnand %p10361_p4, %p10360_p13 }
 0x845   : > { %p6225_p7 = pneg %p6224_p5 }
 0x847   : > { %6405 = dma.done.wait (%p6225_p7), %s6108_s12, 1024  }
 0x848   : > { %6407 = vsyncadd (%p6225_p7), %s6108_s12, 4294966272  ;;  %p18_p8 = scmp.ge.s32.totalorder %s6500_s24, 4   ;;  %s10362_s18 = smov %s6414_s19 }
 0x849   : > { %s10363_s19 = smov %s6418_s20  ;;  %s10364_s20 = smov %s6512_s27 }
 0x84a   : > { %s10365_s21 = smov %s6500_s24  ;;  %20 = sbr.rel (!%p18_p8) target bundleno = 5 (0x5), region = 85 }
 0x84f   :  { %6113 = vsyncpa [#allocation4], 1 }
 0x850   :  { %6115 = vsyncpa [#allocation4 + $0x1], 1 }
 0x851   :  { %6116 = vsyncpa [#allocation5], 1 }
 0x852   :  { %6118 = vsyncpa [#allocation5 + $0x1], 1 }

</bundles_post_ra>
